<compile_context>
chip_gen: v6e
topology: v6e:2x2x1
jax: 0.10.0
libtpu: 0.0.40
codegen_flags: <defaults>
</compile_context>

<pallas_src>
import functools
import math

import jax
import jax.numpy as jnp
from jax.experimental import pallas as pl
from jax.experimental.pallas import tpu as pltpu


# ---------------------------------------------------------------------------
# exact (erf-based) GELU matching torch.nn.functional.gelu(approximate='none').
# TODO(synk): if a bundle dump shows VALU as the binding slot on v5e, swap this
#             polynomial for a tanh-based gelu so the work moves to the EUP slot.
def _erf(x):
    a1, a2, a3, a4, a5 = 0.254829592, -0.284496736, 1.421413741, -1.453152027, 1.061405429
    p = 0.3275911
    ax = jnp.abs(x)
    t = 1.0 / (1.0 + p * ax)
    poly = ((((a5 * t + a4) * t + a3) * t + a2) * t + a1) * t
    y = 1.0 - poly * jnp.exp(-ax * ax)
    return jnp.where(x >= 0, y, -y)


def _gelu_exact(x):
    return 0.5 * x * (1.0 + _erf(x * (2.0 ** -0.5)))


_SELU_ALPHA = 1.6732632423543772
_SELU_SCALE = 1.0507009873554805


def _selu(x):
    return _SELU_SCALE * jnp.where(x > 0, x, _SELU_ALPHA * (jnp.exp(x) - 1.0))


def _dot(a, b):
    """bf16 x bf16 MXU matmul with f32 accumulation (weights are packed bf16)."""
    return jnp.dot(a.astype(jnp.bfloat16), b.astype(jnp.bfloat16),
                   preferred_element_type=jnp.float32)


# ---------------------------------------------------------------------------
# Pallas kernel: `batch_tile` batch elements per grid step.
def _cross_attn_decoder_kernel(
    q_ref, k_ref, v_ref,
    wq_ref, wk_ref, wv_ref, bq_ref, bk_ref, bv_ref,
    wo_ref, bo_ref, w1_ref, b1_ref, w2_ref, b2_ref,
    out_ref,
    *, nhead, head_dim, residual_strategy_1, activation,
):
    B, L, E = q_ref.shape
    S = k_ref.shape[1]
    Dh = head_dim

    # (B, L, E) -> (B*L, E): leading-dim merge, layout-trivial.
    q2 = q_ref[...].reshape(B * L, E)          # residual source (f32 or bf16)
    k2 = k_ref[...].reshape(B * S, E)
    v2 = v_ref[...].reshape(B * S, E)

    # ---- in-projections: one big (rows, E) x (E, E) matmul each.
    # NOTE: 1/sqrt(head_dim) is already folded into wq / bq by pack_params.
    # Cast to bf16 ONCE after the bias add (no per-head casts / relayouts).
    qp = (_dot(q2, wq_ref[...]) + bq_ref[...]).astype(jnp.bfloat16)
    kp = (_dot(k2, wk_ref[...]) + bk_ref[...]).astype(jnp.bfloat16)
    vp = (_dot(v2, wv_ref[...]) + bv_ref[...]).astype(jnp.bfloat16)

    # ---- per-head SDPA, batched over the tile's batch elements via 3-D einsums.
    # TODO(synk): for nhead >= 8, switch to lax.fori_loop(..., unroll=True) over
    #             heads (pl.ds lane slices) to bound live ranges; a short static
    #             unroll is fine for small head counts.
    o_heads = []
    for h in range(nhead):
        lo = h * Dh
        qh = qp[:, lo:lo + Dh].reshape(B, L, Dh)
        kh = kp[:, lo:lo + Dh].reshape(B, S, Dh)
        vh = vp[:, lo:lo + Dh].reshape(B, S, Dh)

        s = jnp.einsum('bld,bsd->bls', qh, kh,
                       preferred_element_type=jnp.float32)        # (B, L, S)
        s = s - jnp.max(s, axis=-1, keepdims=True)
        p = jnp.exp(s)
        p = p * pl.reciprocal(jnp.sum(p, axis=-1, keepdims=True), approx=True)
        o_heads.append(jnp.einsum('bls,bsd->bld', p.astype(jnp.bfloat16), vh,
                                  preferred_element_type=jnp.float32))  # (B, L, Dh)

    # ---- out-projection: one K=E matmul (full MXU contraction depth) instead of
    # H small K=Dh matmuls; head outputs are assembled by a lane-dim concatenate.
    o_cat = jnp.concatenate(o_heads, axis=-1).reshape(B * L, E)
    sa = _dot(o_cat, wo_ref[...]) + bo_ref[...]

    # ---- residual strategy 1 (default 'none')
    if residual_strategy_1 == "sum":
        x = q2.astype(jnp.float32) + sa
    elif residual_strategy_1 == "multiply":
        x = q2.astype(jnp.float32) * sa
    else:
        x = sa

    # ---- feed-forward block: linear1 -> activation -> linear2
    act = _gelu_exact if activation == "gelu" else _selu
    h1 = act(_dot(x, w1_ref[...]) + b1_ref[...])
    y = _dot(h1, w2_ref[...]) + b2_ref[...]

    out_ref[...] = y.reshape(B, L, E).astype(out_ref.dtype)
    # TODO(synk): when E < 128 a lane-dense (B, L*E) output slab would avoid masked
    #             vst.msk partial stores; skipped here to keep blocking on leading
    #             dims only (last-two block dims stay equal to the full array dims).


# ---------------------------------------------------------------------------
def pack_params(params, *, nhead):
    """Pre-transpose / pre-scale / bf16-pack the weights ONCE (outside the call)."""
    E = params["out_proj_weight"].shape[0]
    F = params["linear1_weight"].shape[0]
    assert E % nhead == 0, "embed_dim must be divisible by nhead"
    head_dim = E // nhead
    scale = 1.0 / math.sqrt(head_dim)

    wq, wk, wv = jnp.split(params["in_proj_weight"], 3, axis=0)
    bq, bk, bv = jnp.split(params["in_proj_bias"], 3)
    wdt = jnp.bfloat16                       # halves weight DMA / VMEM residency
    return {
        "wq": (wq.T * scale).astype(wdt),    # (E, E), scale folded in
        "wk": wk.T.astype(wdt),
        "wv": wv.T.astype(wdt),
        "bq": (bq * scale).reshape(1, E).astype(jnp.float32),
        "bk": bk.reshape(1, E).astype(jnp.float32),
        "bv": bv.reshape(1, E).astype(jnp.float32),
        "wo": params["out_proj_weight"].T.astype(wdt),          # (E, E)
        "bo": params["out_proj_bias"].reshape(1, E).astype(jnp.float32),
        "w1": params["linear1_weight"].T.astype(wdt),           # (E, F)
        "b1": params["linear1_bias"].reshape(1, F).astype(jnp.float32),
        "w2": params["linear2_weight"].T.astype(wdt),           # (F, E)
        "b2": params["linear2_bias"].reshape(1, E).astype(jnp.float32),
    }


def cross_attention_decoder_layer(q, k, v, packed, *, nhead,
                                  residual_strategy_1="none",
                                  activation="gelu",
                                  src_key_padding_mask=None,
                                  need_weights=False,
                                  batch_tile=None):
    """q: (L, N, E), k/v: (S, N, E)  (batch_first=False, like the PyTorch module)."""
    # TODO(synk): src_key_padding_mask and need_weights=True (averaged attention
    #             weights) paths are not emitted.
    assert src_key_padding_mask is None
    L, N, E = q.shape
    S = k.shape[0]
    F = packed["w1"].shape[1]
    assert E % nhead == 0
    head_dim = E // nhead
    # Lane-sliced head loop assumes sublane-aligned head slices; fail loudly rather
    # than hitting a confusing Mosaic relayout / lowering error.
    assert head_dim % 8 == 0, "head_dim must be a multiple of 8 for this kernel"
    out_dtype = q.dtype

    # batch-major for row-major (rows, E) tiles inside the kernel.
    # k/v (and q when it is only an MXU operand) go in as bf16: halves input DMA
    # bytes and double-buffered block VMEM.  q stays f32 when it feeds a residual.
    # TODO(synk): blocking the time-major (L,N,E) arrays directly over N would drop
    #             these HBM transposes but needs (8,128)-aligned middle-dim blocks.
    qb = jnp.transpose(q, (1, 0, 2))                              # (N, L, E)
    kb = jnp.transpose(k, (1, 0, 2)).astype(jnp.bfloat16)         # (N, S, E)
    vb = jnp.transpose(v, (1, 0, 2)).astype(jnp.bfloat16)         # (N, S, E)
    if residual_strategy_1 == "none":
        qb = qb.astype(jnp.bfloat16)

    weight_bytes = sum(int(a.size) * a.dtype.itemsize for a in packed.values())

    # VMEM budget per TensorCore (v7x floor = 64 MiB if the query is unavailable).
    try:
        vmem_cap = int(pltpu.get_tpu_info().vmem_capacity_bytes)
    except Exception:
        vmem_cap = 64 * 1024 * 1024
    vmem_cap = min(vmem_cap, 128 * 1024 * 1024)
    budget = int(0.70 * vmem_cap)

    out_isz = jnp.dtype(out_dtype).itemsize
    q_isz = qb.dtype.itemsize

    def vmem_estimate(bt):
        io = 2 * (bt * L * E * q_isz          # q block, double-buffered
                  + 2 * bt * S * E * 2        # k/v bf16 blocks, double-buffered
                  + bt * L * E * out_isz)     # out block, double-buffered
        acts = (bt * L * E * 2 + 2 * bt * S * E * 2      # qp / kp / vp bf16
                + 2 * bt * L * S * 4                     # scores / probs f32
                + 3 * bt * L * E * 4                     # o_cat, sa/x, y f32
                + bt * L * F * 4)                        # h1 f32
        return int(1.5 * (io + acts)) + weight_bytes     # weights single-buffered

    if batch_tile is None:
        # M = batch_tile * L ~ 256 rows feeds the 256-wide v6e/v7x MXU and amortizes
        # per-step overhead; >= 2 grid steps keeps both v7x TensorCores busy via the
        # "parallel" batch axis; shrink while the VMEM estimate exceeds the budget.
        batch_tile = max(1, min(N, -(-256 // max(L, 1))))
        if N >= 2:
            batch_tile = min(batch_tile, -(-N // 2))
        while batch_tile > 1 and vmem_estimate(batch_tile) > budget:
            batch_tile = max(1, batch_tile // 2)

    n_pad = (-N) % batch_tile
    if n_pad:
        # TODO(synk): a pl.when-masked ragged tail tile would avoid this HBM pad copy.
        qb = jnp.pad(qb, ((0, n_pad), (0, 0), (0, 0)))
        kb = jnp.pad(kb, ((0, n_pad), (0, 0), (0, 0)))
        vb = jnp.pad(vb, ((0, n_pad), (0, 0), (0, 0)))
    Np = N + n_pad
    grid = (Np // batch_tile,)

    vmem_limit = min(vmem_cap,
                     max(32 * 1024 * 1024, int(1.5 * vmem_estimate(batch_tile))))

    # advisory cost estimate so XLA can schedule surrounding ops around the call
    flops_per_b = (2 * L * E * E + 2 * 2 * S * E * E          # in-projections
                   + nhead * 2 * 2 * L * S * head_dim         # scores + p@v
                   + 2 * L * E * E                            # out-projection
                   + 2 * L * E * F + 2 * L * F * E)           # feed-forward
    cost = pl.CostEstimate(
        flops=int(Np * flops_per_b),
        transcendentals=int(Np * (nhead * L * S + L * F)),
        bytes_accessed=int(qb.size * q_isz + kb.size * 2 + vb.size * 2
                           + Np * L * E * out_isz + weight_bytes),
    )

    kernel = functools.partial(
        _cross_attn_decoder_kernel,
        nhead=nhead,
        head_dim=head_dim,
        residual_strategy_1=residual_strategy_1,
        activation=activation,
    )

    def run(single_buffer_weights):
        def wspec(shape):
            # Constant-index weight blocks resident across the whole grid; single-
            # buffer them so default double-buffering doesn't waste VMEM (v7x).
            idx = lambda b, _s=shape: (0,) * len(_s)
            if single_buffer_weights:
                return pl.BlockSpec(shape, idx,
                                    pipeline_mode=pl.Buffered(buffer_count=1))
            return pl.BlockSpec(shape, idx)

        in_specs = [
            pl.BlockSpec((batch_tile, L, E), lambda b: (b, 0, 0)),
            pl.BlockSpec((batch_tile, S, E), lambda b: (b, 0, 0)),
            pl.BlockSpec((batch_tile, S, E), lambda b: (b, 0, 0)),
            wspec((E, E)), wspec((E, E)), wspec((E, E)),
            wspec((1, E)), wspec((1, E)), wspec((1, E)),
            wspec((E, E)), wspec((1, E)),
            wspec((E, F)), wspec((1, F)),
            wspec((F, E)), wspec((1, E)),
        ]
        out_spec = pl.BlockSpec((batch_tile, L, E), lambda b: (b, 0, 0))

        return pl.pallas_call(
            kernel,
            out_shape=jax.ShapeDtypeStruct((Np, L, E), out_dtype),
            grid=grid,
            in_specs=in_specs,
            out_specs=out_spec,
            compiler_params=pltpu.CompilerParams(
                dimension_semantics=("parallel",),
                vmem_limit_bytes=vmem_limit,
            ),
            cost_estimate=cost,
        )(qb, kb, vb,
          packed["wq"], packed["wk"], packed["wv"],
          packed["bq"], packed["bk"], packed["bv"],
          packed["wo"], packed["bo"],
          packed["w1"], packed["b1"], packed["w2"], packed["b2"])

    try:
        out_nle = run(True)      # single-buffered resident weights (preferred)
    except Exception:
        # TODO(synk): fallback for jax versions without BlockSpec.pipeline_mode /
        #             pl.Buffered(1); only costs extra weight-buffer VMEM.
        out_nle = run(False)

    x = jnp.transpose(out_nle[:N], (1, 0, 2))   # back to (L, N, E)
    return x, None


# ---------------------------------------------------------------------------
# deterministic parameter init matching _reset_parameters (xavier_uniform / zeros)
def _xavier_uniform(key, shape):
    fan_out, fan_in = shape
    a = (6.0 / (fan_in + fan_out)) ** 0.5
    return jax.random.uniform(key, shape, jnp.float32, minval=-a, maxval=a)


def init_params(key, embed_dim, dim_feedforward):
    k0, k1, k2, k3 = jax.random.split(key, 4)
    return {
        "in_proj_weight": _xavier_uniform(k0, (3 * embed_dim, embed_dim)),
        "in_proj_bias": jnp.zeros((3 * embed_dim,), jnp.float32),
        "out_proj_weight": _xavier_uniform(k1, (embed_dim, embed_dim)),
        "out_proj_bias": jnp.zeros((embed_dim,), jnp.float32),
        "linear1_weight": _xavier_uniform(k2, (dim_feedforward, embed_dim)),
        "linear1_bias": jnp.zeros((dim_feedforward,), jnp.float32),
        "linear2_weight": _xavier_uniform(k3, (embed_dim, dim_feedforward)),
        "linear2_bias": jnp.zeros((embed_dim,), jnp.float32),
    }


# ---------------------------------------------------------------------------
# pure-JAX reference (same math as torch.nn.MultiheadAttention, eval mode),
# default matmul precision (no HIGHEST) to match the kernel's MXU path.
def reference_forward(q, k, v, params, *, nhead, residual_strategy_1="none",
                      activation="gelu"):
    L, N, E = q.shape
    S = k.shape[0]
    H, Dh = nhead, E // nhead
    wq, wk, wv = jnp.split(params["in_proj_weight"], 3, axis=0)
    bq, bk, bv = jnp.split(params["in_proj_bias"], 3)
    lin = lambda x, w, b: jnp.dot(x, w.T) + b
    qp, kp, vp = lin(q, wq, bq), lin(k, wk, bk), lin(v, wv, bv)
    qh = qp.reshape(L, N * H, Dh).transpose(1, 0, 2) * (Dh ** -0.5)
    kh = kp.reshape(S, N * H, Dh).transpose(1, 0, 2)
    vh = vp.reshape(S, N * H, Dh).transpose(1, 0, 2)
    attn = jax.nn.softmax(jnp.einsum("bld,bsd->bls", qh, kh), axis=-1)
    o = jnp.einsum("bls,bsd->bld", attn, vh)
    o = o.transpose(1, 0, 2).reshape(L, N, E)
    sa = lin(o, params["out_proj_weight"], params["out_proj_bias"])
    if residual_strategy_1 == "sum":
        x = q + sa
    elif residual_strategy_1 == "multiply":
        x = q * sa
    else:
        x = sa
    act = (lambda t: jax.nn.gelu(t, approximate=False)) if activation == "gelu" \
        else jax.nn.selu
    h1 = act(lin(x, params["linear1_weight"], params["linear1_bias"]))
    return lin(h1, params["linear2_weight"], params["linear2_bias"])


# ---------------------------------------------------------------------------
if __name__ == "__main__":
    L, S, N = 8, 8, 4          # query len, key/value len, batch
    E, H, FF = 32, 4, 64       # embed_dim, nhead, dim_feedforward

    root = jax.random.PRNGKey(0)
    kp_, kq_, kk_, kv_ = jax.random.split(root, 4)
    params = init_params(kp_, E, FF)
    packed = pack_params(params, nhead=H)      # packed ONCE, outside the call

    q = jax.random.normal(kq_, (L, N, E), jnp.float32)
    k = jax.random.normal(kk_, (S, N, E), jnp.float32)
    v = jax.random.normal(kv_, (S, N, E), jnp.float32)

    out, weights = cross_attention_decoder_layer(
        q, k, v, packed, nhead=H, residual_strategy_1="none", activation="gelu")
    out = jax.block_until_ready(out)

    ref = jax.block_until_ready(
        reference_forward(q, k, v, params, nhead=H, residual_strategy_1="none",
                          activation="gelu"))

    assert out.shape == (L, N, E)
    assert weights is None
    # bf16 MXU operands in the kernel vs. default-precision f32 reference:
    # expected difference is a few 1e-3; a real bug would be O(0.1-1).
    err = float(jnp.max(jnp.abs(out - ref)))
    assert jnp.allclose(out, ref, atol=5e-2, rtol=5e-2), err

    print("KERNEL_OK")
</pallas_src>

<mosaic_0001>
module attributes {stable_mosaic.version = 11 : i64} {
  func.func @_cross_attn_decoder_kernel(%arg0: i32, %arg1: memref<2x8x32xbf16, #tpu.memory_space<vmem>>, %arg2: memref<2x8x32xbf16, #tpu.memory_space<vmem>>, %arg3: memref<2x8x32xbf16, #tpu.memory_space<vmem>>, %arg4: memref<32x32xbf16, #tpu.memory_space<vmem>>, %arg5: memref<32x32xbf16, #tpu.memory_space<vmem>>, %arg6: memref<32x32xbf16, #tpu.memory_space<vmem>>, %arg7: memref<1x32xf32, #tpu.memory_space<vmem>>, %arg8: memref<1x32xf32, #tpu.memory_space<vmem>>, %arg9: memref<1x32xf32, #tpu.memory_space<vmem>>, %arg10: memref<32x32xbf16, #tpu.memory_space<vmem>>, %arg11: memref<1x32xf32, #tpu.memory_space<vmem>>, %arg12: memref<32x64xbf16, #tpu.memory_space<vmem>>, %arg13: memref<1x64xf32, #tpu.memory_space<vmem>>, %arg14: memref<64x32xbf16, #tpu.memory_space<vmem>>, %arg15: memref<1x32xf32, #tpu.memory_space<vmem>>, %arg16: memref<2x8x32xf32, #tpu.memory_space<vmem>>) attributes {dimension_semantics = [#tpu.dimension_semantics<parallel>], iteration_bounds = array<i64: 2>, scalar_prefetch = 0 : i64, scratch_operands = 0 : i64, tpu.core_type = #tpu.core_type<tc>, window_params = [{transform_indices = @transform_0, window_bounds = array<i64: 2, 8, 32>}, {transform_indices = @transform_1, window_bounds = array<i64: 2, 8, 32>}, {transform_indices = @transform_2, window_bounds = array<i64: 2, 8, 32>}, {pipeline_mode = #tpu.pipeline_mode<synchronous>, transform_indices = @transform_3, window_bounds = array<i64: 32, 32>}, {pipeline_mode = #tpu.pipeline_mode<synchronous>, transform_indices = @transform_4, window_bounds = array<i64: 32, 32>}, {pipeline_mode = #tpu.pipeline_mode<synchronous>, transform_indices = @transform_5, window_bounds = array<i64: 32, 32>}, {pipeline_mode = #tpu.pipeline_mode<synchronous>, transform_indices = @transform_6, window_bounds = array<i64: 1, 32>}, {pipeline_mode = #tpu.pipeline_mode<synchronous>, transform_indices = @transform_7, window_bounds = array<i64: 1, 32>}, {pipeline_mode = #tpu.pipeline_mode<synchronous>, transform_indices = @transform_8, window_bounds = array<i64: 1, 32>}, {pipeline_mode = #tpu.pipeline_mode<synchronous>, transform_indices = @transform_9, window_bounds = array<i64: 32, 32>}, {pipeline_mode = #tpu.pipeline_mode<synchronous>, transform_indices = @transform_10, window_bounds = array<i64: 1, 32>}, {pipeline_mode = #tpu.pipeline_mode<synchronous>, transform_indices = @transform_11, window_bounds = array<i64: 32, 64>}, {pipeline_mode = #tpu.pipeline_mode<synchronous>, transform_indices = @transform_12, window_bounds = array<i64: 1, 64>}, {pipeline_mode = #tpu.pipeline_mode<synchronous>, transform_indices = @transform_13, window_bounds = array<i64: 64, 32>}, {pipeline_mode = #tpu.pipeline_mode<synchronous>, transform_indices = @transform_14, window_bounds = array<i64: 1, 32>}, {transform_indices = @transform_15, window_bounds = array<i64: 2, 8, 32>}]} {
    %c0 = arith.constant 0 : index
    %c0_0 = arith.constant 0 : index
    %c0_1 = arith.constant 0 : index
    %0 = vector.load %arg1[%c0, %c0_0, %c0_1] : memref<2x8x32xbf16, #tpu.memory_space<vmem>>, vector<2x8x32xbf16>
    %1 = vector.shape_cast %0 : vector<2x8x32xbf16> to vector<16x32xbf16>
    %c0_2 = arith.constant 0 : index
    %c0_3 = arith.constant 0 : index
    %c0_4 = arith.constant 0 : index
    %2 = vector.load %arg2[%c0_2, %c0_3, %c0_4] : memref<2x8x32xbf16, #tpu.memory_space<vmem>>, vector<2x8x32xbf16>
    %3 = vector.shape_cast %2 : vector<2x8x32xbf16> to vector<16x32xbf16>
    %c0_5 = arith.constant 0 : index
    %c0_6 = arith.constant 0 : index
    %c0_7 = arith.constant 0 : index
    %4 = vector.load %arg3[%c0_5, %c0_6, %c0_7] : memref<2x8x32xbf16, #tpu.memory_space<vmem>>, vector<2x8x32xbf16>
    %5 = vector.shape_cast %4 : vector<2x8x32xbf16> to vector<16x32xbf16>
    %c0_8 = arith.constant 0 : index
    %c0_9 = arith.constant 0 : index
    %6 = vector.load %arg4[%c0_8, %c0_9] : memref<32x32xbf16, #tpu.memory_space<vmem>>, vector<32x32xbf16>
    %cst = arith.constant dense<0.000000e+00> : vector<16x32xf32>
    %7 = tpu.matmul %1, %6, %cst {dimension_numbers = #tpu.dot_dimension_numbers<[1], [0], [0], [1], [0, 0, 1, 1], [], []>} : vector<16x32xbf16>, vector<32x32xbf16>, vector<16x32xf32> -> vector<16x32xf32>
    %c0_10 = arith.constant 0 : index
    %c0_11 = arith.constant 0 : index
    %8 = vector.load %arg7[%c0_10, %c0_11] : memref<1x32xf32, #tpu.memory_space<vmem>>, vector<1x32xf32>
    %9 = vector.broadcast %8 : vector<1x32xf32> to vector<16x32xf32>
    %10 = arith.addf %7, %9 : vector<16x32xf32>
    %11 = arith.truncf %10 : vector<16x32xf32> to vector<16x32xbf16>
    %c0_12 = arith.constant 0 : index
    %c0_13 = arith.constant 0 : index
    %12 = vector.load %arg5[%c0_12, %c0_13] : memref<32x32xbf16, #tpu.memory_space<vmem>>, vector<32x32xbf16>
    %cst_14 = arith.constant dense<0.000000e+00> : vector<16x32xf32>
    %13 = tpu.matmul %3, %12, %cst_14 {dimension_numbers = #tpu.dot_dimension_numbers<[1], [0], [0], [1], [0, 0, 1, 1], [], []>} : vector<16x32xbf16>, vector<32x32xbf16>, vector<16x32xf32> -> vector<16x32xf32>
    %c0_15 = arith.constant 0 : index
    %c0_16 = arith.constant 0 : index
    %14 = vector.load %arg8[%c0_15, %c0_16] : memref<1x32xf32, #tpu.memory_space<vmem>>, vector<1x32xf32>
    %15 = vector.broadcast %14 : vector<1x32xf32> to vector<16x32xf32>
    %16 = arith.addf %13, %15 : vector<16x32xf32>
    %17 = arith.truncf %16 : vector<16x32xf32> to vector<16x32xbf16>
    %c0_17 = arith.constant 0 : index
    %c0_18 = arith.constant 0 : index
    %18 = vector.load %arg6[%c0_17, %c0_18] : memref<32x32xbf16, #tpu.memory_space<vmem>>, vector<32x32xbf16>
    %cst_19 = arith.constant dense<0.000000e+00> : vector<16x32xf32>
    %19 = tpu.matmul %5, %18, %cst_19 {dimension_numbers = #tpu.dot_dimension_numbers<[1], [0], [0], [1], [0, 0, 1, 1], [], []>} : vector<16x32xbf16>, vector<32x32xbf16>, vector<16x32xf32> -> vector<16x32xf32>
    %c0_20 = arith.constant 0 : index
    %c0_21 = arith.constant 0 : index
    %20 = vector.load %arg9[%c0_20, %c0_21] : memref<1x32xf32, #tpu.memory_space<vmem>>, vector<1x32xf32>
    %21 = vector.broadcast %20 : vector<1x32xf32> to vector<16x32xf32>
    %22 = arith.addf %19, %21 : vector<16x32xf32>
    %23 = arith.truncf %22 : vector<16x32xf32> to vector<16x32xbf16>
    %24 = vector.extract_strided_slice %11 {offsets = [0, 0], sizes = [16, 8], strides = [1, 1]} : vector<16x32xbf16> to vector<16x8xbf16>
    %25 = vector.shape_cast %24 : vector<16x8xbf16> to vector<2x8x8xbf16>
    %26 = vector.extract_strided_slice %17 {offsets = [0, 0], sizes = [16, 8], strides = [1, 1]} : vector<16x32xbf16> to vector<16x8xbf16>
    %27 = vector.shape_cast %26 : vector<16x8xbf16> to vector<2x8x8xbf16>
    %28 = vector.extract_strided_slice %23 {offsets = [0, 0], sizes = [16, 8], strides = [1, 1]} : vector<16x32xbf16> to vector<16x8xbf16>
    %29 = vector.shape_cast %28 : vector<16x8xbf16> to vector<2x8x8xbf16>
    "tpu.trace_start"() <{level = 10 : i32, message = "bld,bsd->bls"}> : () -> ()
    %cst_22 = arith.constant dense<0.000000e+00> : vector<2x8x8xf32>
    %30 = tpu.matmul %25, %27, %cst_22 {dimension_numbers = #tpu.dot_dimension_numbers<[2], [2], [1], [1], [0, 0, 0, 1, 1, 1], [0], [0]>} : vector<2x8x8xbf16>, vector<2x8x8xbf16>, vector<2x8x8xf32> -> vector<2x8x8xf32>
    "tpu.trace_stop"() : () -> ()
    %cst_23 = arith.constant dense<0xFF800000> : vector<2x8xf32>
    %31 = vector.multi_reduction <maximumf>, %30, %cst_23 [2] : vector<2x8x8xf32> to vector<2x8xf32>
    %32 = vector.shape_cast %31 : vector<2x8xf32> to vector<2x8x1xf32>
    %33 = vector.broadcast %32 : vector<2x8x1xf32> to vector<2x8x8xf32>
    %34 = arith.subf %30, %33 : vector<2x8x8xf32>
    %35 = math.exp %34 : vector<2x8x8xf32>
    %cst_24 = arith.constant dense<0.000000e+00> : vector<2x8xf32>
    %36 = vector.multi_reduction <add>, %35, %cst_24 [2] : vector<2x8x8xf32> to vector<2x8xf32>
    %37 = vector.shape_cast %36 : vector<2x8xf32> to vector<2x8x1xf32>
    %38 = tpu.reciprocal %37 {approx = true} : vector<2x8x1xf32> -> vector<2x8x1xf32>
    %39 = vector.broadcast %38 : vector<2x8x1xf32> to vector<2x8x8xf32>
    %40 = arith.mulf %35, %39 : vector<2x8x8xf32>
    %41 = arith.truncf %40 : vector<2x8x8xf32> to vector<2x8x8xbf16>
    "tpu.trace_start"() <{level = 10 : i32, message = "bls,bsd->bld"}> : () -> ()
    %cst_25 = arith.constant dense<0.000000e+00> : vector<2x8x8xf32>
    %42 = tpu.matmul %41, %29, %cst_25 {dimension_numbers = #tpu.dot_dimension_numbers<[2], [1], [1], [2], [0, 0, 0, 1, 1, 2], [0], [0]>} : vector<2x8x8xbf16>, vector<2x8x8xbf16>, vector<2x8x8xf32> -> vector<2x8x8xf32>
    "tpu.trace_stop"() : () -> ()
    %43 = vector.extract_strided_slice %11 {offsets = [0, 8], sizes = [16, 8], strides = [1, 1]} : vector<16x32xbf16> to vector<16x8xbf16>
    %44 = vector.shape_cast %43 : vector<16x8xbf16> to vector<2x8x8xbf16>
    %45 = vector.extract_strided_slice %17 {offsets = [0, 8], sizes = [16, 8], strides = [1, 1]} : vector<16x32xbf16> to vector<16x8xbf16>
    %46 = vector.shape_cast %45 : vector<16x8xbf16> to vector<2x8x8xbf16>
    %47 = vector.extract_strided_slice %23 {offsets = [0, 8], sizes = [16, 8], strides = [1, 1]} : vector<16x32xbf16> to vector<16x8xbf16>
    %48 = vector.shape_cast %47 : vector<16x8xbf16> to vector<2x8x8xbf16>
    "tpu.trace_start"() <{level = 10 : i32, message = "bld,bsd->bls"}> : () -> ()
    %cst_26 = arith.constant dense<0.000000e+00> : vector<2x8x8xf32>
    %49 = tpu.matmul %44, %46, %cst_26 {dimension_numbers = #tpu.dot_dimension_numbers<[2], [2], [1], [1], [0, 0, 0, 1, 1, 1], [0], [0]>} : vector<2x8x8xbf16>, vector<2x8x8xbf16>, vector<2x8x8xf32> -> vector<2x8x8xf32>
    "tpu.trace_stop"() : () -> ()
    %cst_27 = arith.constant dense<0xFF800000> : vector<2x8xf32>
    %50 = vector.multi_reduction <maximumf>, %49, %cst_27 [2] : vector<2x8x8xf32> to vector<2x8xf32>
    %51 = vector.shape_cast %50 : vector<2x8xf32> to vector<2x8x1xf32>
    %52 = vector.broadcast %51 : vector<2x8x1xf32> to vector<2x8x8xf32>
    %53 = arith.subf %49, %52 : vector<2x8x8xf32>
    %54 = math.exp %53 : vector<2x8x8xf32>
    %cst_28 = arith.constant dense<0.000000e+00> : vector<2x8xf32>
    %55 = vector.multi_reduction <add>, %54, %cst_28 [2] : vector<2x8x8xf32> to vector<2x8xf32>
    %56 = vector.shape_cast %55 : vector<2x8xf32> to vector<2x8x1xf32>
    %57 = tpu.reciprocal %56 {approx = true} : vector<2x8x1xf32> -> vector<2x8x1xf32>
    %58 = vector.broadcast %57 : vector<2x8x1xf32> to vector<2x8x8xf32>
    %59 = arith.mulf %54, %58 : vector<2x8x8xf32>
    %60 = arith.truncf %59 : vector<2x8x8xf32> to vector<2x8x8xbf16>
    "tpu.trace_start"() <{level = 10 : i32, message = "bls,bsd->bld"}> : () -> ()
    %cst_29 = arith.constant dense<0.000000e+00> : vector<2x8x8xf32>
    %61 = tpu.matmul %60, %48, %cst_29 {dimension_numbers = #tpu.dot_dimension_numbers<[2], [1], [1], [2], [0, 0, 0, 1, 1, 2], [0], [0]>} : vector<2x8x8xbf16>, vector<2x8x8xbf16>, vector<2x8x8xf32> -> vector<2x8x8xf32>
    "tpu.trace_stop"() : () -> ()
    %62 = vector.extract_strided_slice %11 {offsets = [0, 16], sizes = [16, 8], strides = [1, 1]} : vector<16x32xbf16> to vector<16x8xbf16>
    %63 = vector.shape_cast %62 : vector<16x8xbf16> to vector<2x8x8xbf16>
    %64 = vector.extract_strided_slice %17 {offsets = [0, 16], sizes = [16, 8], strides = [1, 1]} : vector<16x32xbf16> to vector<16x8xbf16>
    %65 = vector.shape_cast %64 : vector<16x8xbf16> to vector<2x8x8xbf16>
    %66 = vector.extract_strided_slice %23 {offsets = [0, 16], sizes = [16, 8], strides = [1, 1]} : vector<16x32xbf16> to vector<16x8xbf16>
    %67 = vector.shape_cast %66 : vector<16x8xbf16> to vector<2x8x8xbf16>
    "tpu.trace_start"() <{level = 10 : i32, message = "bld,bsd->bls"}> : () -> ()
    %cst_30 = arith.constant dense<0.000000e+00> : vector<2x8x8xf32>
    %68 = tpu.matmul %63, %65, %cst_30 {dimension_numbers = #tpu.dot_dimension_numbers<[2], [2], [1], [1], [0, 0, 0, 1, 1, 1], [0], [0]>} : vector<2x8x8xbf16>, vector<2x8x8xbf16>, vector<2x8x8xf32> -> vector<2x8x8xf32>
    "tpu.trace_stop"() : () -> ()
    %cst_31 = arith.constant dense<0xFF800000> : vector<2x8xf32>
    %69 = vector.multi_reduction <maximumf>, %68, %cst_31 [2] : vector<2x8x8xf32> to vector<2x8xf32>
    %70 = vector.shape_cast %69 : vector<2x8xf32> to vector<2x8x1xf32>
    %71 = vector.broadcast %70 : vector<2x8x1xf32> to vector<2x8x8xf32>
    %72 = arith.subf %68, %71 : vector<2x8x8xf32>
    %73 = math.exp %72 : vector<2x8x8xf32>
    %cst_32 = arith.constant dense<0.000000e+00> : vector<2x8xf32>
    %74 = vector.multi_reduction <add>, %73, %cst_32 [2] : vector<2x8x8xf32> to vector<2x8xf32>
    %75 = vector.shape_cast %74 : vector<2x8xf32> to vector<2x8x1xf32>
    %76 = tpu.reciprocal %75 {approx = true} : vector<2x8x1xf32> -> vector<2x8x1xf32>
    %77 = vector.broadcast %76 : vector<2x8x1xf32> to vector<2x8x8xf32>
    %78 = arith.mulf %73, %77 : vector<2x8x8xf32>
    %79 = arith.truncf %78 : vector<2x8x8xf32> to vector<2x8x8xbf16>
    "tpu.trace_start"() <{level = 10 : i32, message = "bls,bsd->bld"}> : () -> ()
    %cst_33 = arith.constant dense<0.000000e+00> : vector<2x8x8xf32>
    %80 = tpu.matmul %79, %67, %cst_33 {dimension_numbers = #tpu.dot_dimension_numbers<[2], [1], [1], [2], [0, 0, 0, 1, 1, 2], [0], [0]>} : vector<2x8x8xbf16>, vector<2x8x8xbf16>, vector<2x8x8xf32> -> vector<2x8x8xf32>
    "tpu.trace_stop"() : () -> ()
    %81 = vector.extract_strided_slice %11 {offsets = [0, 24], sizes = [16, 8], strides = [1, 1]} : vector<16x32xbf16> to vector<16x8xbf16>
    %82 = vector.shape_cast %81 : vector<16x8xbf16> to vector<2x8x8xbf16>
    %83 = vector.extract_strided_slice %17 {offsets = [0, 24], sizes = [16, 8], strides = [1, 1]} : vector<16x32xbf16> to vector<16x8xbf16>
    %84 = vector.shape_cast %83 : vector<16x8xbf16> to vector<2x8x8xbf16>
    %85 = vector.extract_strided_slice %23 {offsets = [0, 24], sizes = [16, 8], strides = [1, 1]} : vector<16x32xbf16> to vector<16x8xbf16>
    %86 = vector.shape_cast %85 : vector<16x8xbf16> to vector<2x8x8xbf16>
    "tpu.trace_start"() <{level = 10 : i32, message = "bld,bsd->bls"}> : () -> ()
    %cst_34 = arith.constant dense<0.000000e+00> : vector<2x8x8xf32>
    %87 = tpu.matmul %82, %84, %cst_34 {dimension_numbers = #tpu.dot_dimension_numbers<[2], [2], [1], [1], [0, 0, 0, 1, 1, 1], [0], [0]>} : vector<2x8x8xbf16>, vector<2x8x8xbf16>, vector<2x8x8xf32> -> vector<2x8x8xf32>
    "tpu.trace_stop"() : () -> ()
    %cst_35 = arith.constant dense<0xFF800000> : vector<2x8xf32>
    %88 = vector.multi_reduction <maximumf>, %87, %cst_35 [2] : vector<2x8x8xf32> to vector<2x8xf32>
    %89 = vector.shape_cast %88 : vector<2x8xf32> to vector<2x8x1xf32>
    %90 = vector.broadcast %89 : vector<2x8x1xf32> to vector<2x8x8xf32>
    %91 = arith.subf %87, %90 : vector<2x8x8xf32>
    %92 = math.exp %91 : vector<2x8x8xf32>
    %cst_36 = arith.constant dense<0.000000e+00> : vector<2x8xf32>
    %93 = vector.multi_reduction <add>, %92, %cst_36 [2] : vector<2x8x8xf32> to vector<2x8xf32>
    %94 = vector.shape_cast %93 : vector<2x8xf32> to vector<2x8x1xf32>
    %95 = tpu.reciprocal %94 {approx = true} : vector<2x8x1xf32> -> vector<2x8x1xf32>
    %96 = vector.broadcast %95 : vector<2x8x1xf32> to vector<2x8x8xf32>
    %97 = arith.mulf %92, %96 : vector<2x8x8xf32>
    %98 = arith.truncf %97 : vector<2x8x8xf32> to vector<2x8x8xbf16>
    "tpu.trace_start"() <{level = 10 : i32, message = "bls,bsd->bld"}> : () -> ()
    %cst_37 = arith.constant dense<0.000000e+00> : vector<2x8x8xf32>
    %99 = tpu.matmul %98, %86, %cst_37 {dimension_numbers = #tpu.dot_dimension_numbers<[2], [1], [1], [2], [0, 0, 0, 1, 1, 2], [0], [0]>} : vector<2x8x8xbf16>, vector<2x8x8xbf16>, vector<2x8x8xf32> -> vector<2x8x8xf32>
    "tpu.trace_stop"() : () -> ()
    %100 = tpu.concatenate %42, %61, %80, %99 in 2 : vector<2x8x8xf32>, vector<2x8x8xf32>, vector<2x8x8xf32>, vector<2x8x8xf32> -> vector<2x8x32xf32>
    %101 = vector.shape_cast %100 : vector<2x8x32xf32> to vector<16x32xf32>
    %c0_38 = arith.constant 0 : index
    %c0_39 = arith.constant 0 : index
    %102 = vector.load %arg10[%c0_38, %c0_39] : memref<32x32xbf16, #tpu.memory_space<vmem>>, vector<32x32xbf16>
    %103 = arith.truncf %101 : vector<16x32xf32> to vector<16x32xbf16>
    %cst_40 = arith.constant dense<0.000000e+00> : vector<16x32xf32>
    %104 = tpu.matmul %103, %102, %cst_40 {dimension_numbers = #tpu.dot_dimension_numbers<[1], [0], [0], [1], [0, 0, 1, 1], [], []>} : vector<16x32xbf16>, vector<32x32xbf16>, vector<16x32xf32> -> vector<16x32xf32>
    %c0_41 = arith.constant 0 : index
    %c0_42 = arith.constant 0 : index
    %105 = vector.load %arg11[%c0_41, %c0_42] : memref<1x32xf32, #tpu.memory_space<vmem>>, vector<1x32xf32>
    %106 = vector.broadcast %105 : vector<1x32xf32> to vector<16x32xf32>
    %107 = arith.addf %104, %106 : vector<16x32xf32>
    %c0_43 = arith.constant 0 : index
    %c0_44 = arith.constant 0 : index
    %108 = vector.load %arg12[%c0_43, %c0_44] : memref<32x64xbf16, #tpu.memory_space<vmem>>, vector<32x64xbf16>
    %109 = arith.truncf %107 : vector<16x32xf32> to vector<16x32xbf16>
    %cst_45 = arith.constant dense<0.000000e+00> : vector<16x64xf32>
    %110 = tpu.matmul %109, %108, %cst_45 {dimension_numbers = #tpu.dot_dimension_numbers<[1], [0], [0], [1], [0, 0, 1, 1], [], []>} : vector<16x32xbf16>, vector<32x64xbf16>, vector<16x64xf32> -> vector<16x64xf32>
    %c0_46 = arith.constant 0 : index
    %c0_47 = arith.constant 0 : index
    %111 = vector.load %arg13[%c0_46, %c0_47] : memref<1x64xf32, #tpu.memory_space<vmem>>, vector<1x64xf32>
    %112 = vector.broadcast %111 : vector<1x64xf32> to vector<16x64xf32>
    %113 = arith.addf %110, %112 : vector<16x64xf32>
    %cst_48 = arith.constant 5.000000e-01 : f32
    %114 = vector.broadcast %cst_48 : f32 to vector<16x64xf32>
    %115 = arith.mulf %114, %113 : vector<16x64xf32>
    %cst_49 = arith.constant 0.707106769 : f32
    %116 = vector.broadcast %cst_49 : f32 to vector<16x64xf32>
    %117 = arith.mulf %113, %116 : vector<16x64xf32>
    %118 = math.absf %117 : vector<16x64xf32>
    %cst_50 = arith.constant 0.327591091 : f32
    %119 = vector.broadcast %cst_50 : f32 to vector<16x64xf32>
    %120 = arith.mulf %119, %118 : vector<16x64xf32>
    %cst_51 = arith.constant 1.000000e+00 : f32
    %121 = vector.broadcast %cst_51 : f32 to vector<16x64xf32>
    %122 = arith.addf %121, %120 : vector<16x64xf32>
    %cst_52 = arith.constant 1.000000e+00 : f32
    %123 = vector.broadcast %cst_52 : f32 to vector<16x64xf32>
    %124 = arith.divf %123, %122 : vector<16x64xf32>
    %cst_53 = arith.constant 1.06140542 : f32
    %125 = vector.broadcast %cst_53 : f32 to vector<16x64xf32>
    %126 = arith.mulf %125, %124 : vector<16x64xf32>
    %cst_54 = arith.constant -1.45315206 : f32
    %127 = vector.broadcast %cst_54 : f32 to vector<16x64xf32>
    %128 = arith.addf %126, %127 : vector<16x64xf32>
    %129 = arith.mulf %128, %124 : vector<16x64xf32>
    %cst_55 = arith.constant 1.42141378 : f32
    %130 = vector.broadcast %cst_55 : f32 to vector<16x64xf32>
    %131 = arith.addf %129, %130 : vector<16x64xf32>
    %132 = arith.mulf %131, %124 : vector<16x64xf32>
    %cst_56 = arith.constant -0.284496725 : f32
    %133 = vector.broadcast %cst_56 : f32 to vector<16x64xf32>
    %134 = arith.addf %132, %133 : vector<16x64xf32>
    %135 = arith.mulf %134, %124 : vector<16x64xf32>
    %cst_57 = arith.constant 0.254829586 : f32
    %136 = vector.broadcast %cst_57 : f32 to vector<16x64xf32>
    %137 = arith.addf %135, %136 : vector<16x64xf32>
    %138 = arith.mulf %137, %124 : vector<16x64xf32>
    %cst_58 = arith.constant 0.000000e+00 : f32
    %139 = vector.broadcast %cst_58 : f32 to vector<16x64xf32>
    %140 = arith.subf %139, %118 : vector<16x64xf32>
    %141 = arith.mulf %140, %118 : vector<16x64xf32>
    %142 = math.exp %141 : vector<16x64xf32>
    %143 = arith.mulf %138, %142 : vector<16x64xf32>
    %cst_59 = arith.constant 1.000000e+00 : f32
    %144 = vector.broadcast %cst_59 : f32 to vector<16x64xf32>
    %145 = arith.subf %144, %143 : vector<16x64xf32>
    %cst_60 = arith.constant 0.000000e+00 : f32
    %146 = vector.broadcast %cst_60 : f32 to vector<16x64xf32>
    %147 = arith.cmpf oge, %117, %146 : vector<16x64xf32>
    %cst_61 = arith.constant 0.000000e+00 : f32
    %148 = vector.broadcast %cst_61 : f32 to vector<16x64xf32>
    %149 = arith.subf %148, %145 : vector<16x64xf32>
    %150 = arith.select %147, %145, %149 : vector<16x64xi1>, vector<16x64xf32>
    %cst_62 = arith.constant 1.000000e+00 : f32
    %151 = vector.broadcast %cst_62 : f32 to vector<16x64xf32>
    %152 = arith.addf %151, %150 : vector<16x64xf32>
    %153 = arith.mulf %115, %152 : vector<16x64xf32>
    %c0_63 = arith.constant 0 : index
    %c0_64 = arith.constant 0 : index
    %154 = vector.load %arg14[%c0_63, %c0_64] : memref<64x32xbf16, #tpu.memory_space<vmem>>, vector<64x32xbf16>
    %155 = arith.truncf %153 : vector<16x64xf32> to vector<16x64xbf16>
    %cst_65 = arith.constant dense<0.000000e+00> : vector<16x32xf32>
    %156 = tpu.matmul %155, %154, %cst_65 {dimension_numbers = #tpu.dot_dimension_numbers<[1], [0], [0], [1], [0, 0, 1, 1], [], []>} : vector<16x64xbf16>, vector<64x32xbf16>, vector<16x32xf32> -> vector<16x32xf32>
    %c0_66 = arith.constant 0 : index
    %c0_67 = arith.constant 0 : index
    %157 = vector.load %arg15[%c0_66, %c0_67] : memref<1x32xf32, #tpu.memory_space<vmem>>, vector<1x32xf32>
    %158 = vector.broadcast %157 : vector<1x32xf32> to vector<16x32xf32>
    %159 = arith.addf %156, %158 : vector<16x32xf32>
    %160 = vector.shape_cast %159 : vector<16x32xf32> to vector<2x8x32xf32>
    %c0_68 = arith.constant 0 : index
    %c0_69 = arith.constant 0 : index
    %c0_70 = arith.constant 0 : index
    %161 = vector.load %arg16[%c0_68, %c0_69, %c0_70] : memref<2x8x32xf32, #tpu.memory_space<vmem>>, vector<2x8x32xf32>
    tpu.vector_store %arg16[%c0_68, %c0_69, %c0_70], %160 {strides = array<i32>} : memref<2x8x32xf32, #tpu.memory_space<vmem>>, vector<2x8x32xf32>,
    return
  }
  func.func @transform_0(%arg0: i32) -> (i32, i32, i32) {
    %c0_i32 = arith.constant 0 : i32
    %c0_i32_0 = arith.constant 0 : i32
    %c0_i32_1 = arith.constant 0 : i32
    return %arg0, %c0_i32, %c0_i32_0 : i32, i32, i32
  }
  func.func @transform_1(%arg0: i32) -> (i32, i32, i32) {
    %c0_i32 = arith.constant 0 : i32
    %c0_i32_0 = arith.constant 0 : i32
    %c0_i32_1 = arith.constant 0 : i32
    return %arg0, %c0_i32, %c0_i32_0 : i32, i32, i32
  }
  func.func @transform_2(%arg0: i32) -> (i32, i32, i32) {
    %c0_i32 = arith.constant 0 : i32
    %c0_i32_0 = arith.constant 0 : i32
    %c0_i32_1 = arith.constant 0 : i32
    return %arg0, %c0_i32, %c0_i32_0 : i32, i32, i32
  }
  func.func @transform_3(%arg0: i32) -> (i32, i32) {
    %c0_i32 = arith.constant 0 : i32
    %c0_i32_0 = arith.constant 0 : i32
    %c0_i32_1 = arith.constant 0 : i32
    return %c0_i32, %c0_i32_0 : i32, i32
  }
  func.func @transform_4(%arg0: i32) -> (i32, i32) {
    %c0_i32 = arith.constant 0 : i32
    %c0_i32_0 = arith.constant 0 : i32
    %c0_i32_1 = arith.constant 0 : i32
    return %c0_i32, %c0_i32_0 : i32, i32
  }
  func.func @transform_5(%arg0: i32) -> (i32, i32) {
    %c0_i32 = arith.constant 0 : i32
    %c0_i32_0 = arith.constant 0 : i32
    %c0_i32_1 = arith.constant 0 : i32
    return %c0_i32, %c0_i32_0 : i32, i32
  }
  func.func @transform_6(%arg0: i32) -> (i32, i32) {
    %c0_i32 = arith.constant 0 : i32
    %c0_i32_0 = arith.constant 0 : i32
    %c0_i32_1 = arith.constant 0 : i32
    return %c0_i32, %c0_i32_0 : i32, i32
  }
  func.func @transform_7(%arg0: i32) -> (i32, i32) {
    %c0_i32 = arith.constant 0 : i32
    %c0_i32_0 = arith.constant 0 : i32
    %c0_i32_1 = arith.constant 0 : i32
    return %c0_i32, %c0_i32_0 : i32, i32
  }
  func.func @transform_8(%arg0: i32) -> (i32, i32) {
    %c0_i32 = arith.constant 0 : i32
    %c0_i32_0 = arith.constant 0 : i32
    %c0_i32_1 = arith.constant 0 : i32
    return %c0_i32, %c0_i32_0 : i32, i32
  }
  func.func @transform_9(%arg0: i32) -> (i32, i32) {
    %c0_i32 = arith.constant 0 : i32
    %c0_i32_0 = arith.constant 0 : i32
    %c0_i32_1 = arith.constant 0 : i32
    return %c0_i32, %c0_i32_0 : i32, i32
  }
  func.func @transform_10(%arg0: i32) -> (i32, i32) {
    %c0_i32 = arith.constant 0 : i32
    %c0_i32_0 = arith.constant 0 : i32
    %c0_i32_1 = arith.constant 0 : i32
    return %c0_i32, %c0_i32_0 : i32, i32
  }
  func.func @transform_11(%arg0: i32) -> (i32, i32) {
    %c0_i32 = arith.constant 0 : i32
    %c0_i32_0 = arith.constant 0 : i32
    %c0_i32_1 = arith.constant 0 : i32
    return %c0_i32, %c0_i32_0 : i32, i32
  }
  func.func @transform_12(%arg0: i32) -> (i32, i32) {
    %c0_i32 = arith.constant 0 : i32
    %c0_i32_0 = arith.constant 0 : i32
    %c0_i32_1 = arith.constant 0 : i32
    return %c0_i32, %c0_i32_0 : i32, i32
  }
  func.func @transform_13(%arg0: i32) -> (i32, i32) {
    %c0_i32 = arith.constant 0 : i32
    %c0_i32_0 = arith.constant 0 : i32
    %c0_i32_1 = arith.constant 0 : i32
    return %c0_i32, %c0_i32_0 : i32, i32
  }
  func.func @transform_14(%arg0: i32) -> (i32, i32) {
    %c0_i32 = arith.constant 0 : i32
    %c0_i32_0 = arith.constant 0 : i32
    %c0_i32_1 = arith.constant 0 : i32
    return %c0_i32, %c0_i32_0 : i32, i32
  }
  func.func @transform_15(%arg0: i32) -> (i32, i32, i32) {
    %c0_i32 = arith.constant 0 : i32
    %c0_i32_0 = arith.constant 0 : i32
    %c0_i32_1 = arith.constant 0 : i32
    return %arg0, %c0_i32, %c0_i32_0 : i32, i32, i32
  }
}

module attributes {stable_mosaic.version = 11 : i64} {
  func.func @_cross_attn_decoder_kernel(%arg0: i32, %arg1: memref<2x8x32xbf16, #tpu.memory_space<vmem>>, %arg2: memref<2x8x32xbf16, #tpu.memory_space<vmem>>, %arg3: memref<2x8x32xbf16, #tpu.memory_space<vmem>>, %arg4: memref<32x32xbf16, #tpu.memory_space<vmem>>, %arg5: memref<32x32xbf16, #tpu.memory_space<vmem>>, %arg6: memref<32x32xbf16, #tpu.memory_space<vmem>>, %arg7: memref<1x32xf32, #tpu.memory_space<vmem>>, %arg8: memref<1x32xf32, #tpu.memory_space<vmem>>, %arg9: memref<1x32xf32, #tpu.memory_space<vmem>>, %arg10: memref<32x32xbf16, #tpu.memory_space<vmem>>, %arg11: memref<1x32xf32, #tpu.memory_space<vmem>>, %arg12: memref<32x64xbf16, #tpu.memory_space<vmem>>, %arg13: memref<1x64xf32, #tpu.memory_space<vmem>>, %arg14: memref<64x32xbf16, #tpu.memory_space<vmem>>, %arg15: memref<1x32xf32, #tpu.memory_space<vmem>>, %arg16: memref<2x8x32xf32, #tpu.memory_space<vmem>>) attributes {dimension_semantics = [#tpu.dimension_semantics<parallel>], iteration_bounds = array<i64: 2>, scalar_prefetch = 0 : i64, scratch_operands = 0 : i64, tpu.core_type = #tpu.core_type<tc>, window_params = [{transform_indices = @transform_0, window_bounds = array<i64: 2, 8, 32>}, {transform_indices = @transform_1, window_bounds = array<i64: 2, 8, 32>}, {transform_indices = @transform_2, window_bounds = array<i64: 2, 8, 32>}, {pipeline_mode = #tpu.pipeline_mode<synchronous>, transform_indices = @transform_3, window_bounds = array<i64: 32, 32>}, {pipeline_mode = #tpu.pipeline_mode<synchronous>, transform_indices = @transform_4, window_bounds = array<i64: 32, 32>}, {pipeline_mode = #tpu.pipeline_mode<synchronous>, transform_indices = @transform_5, window_bounds = array<i64: 32, 32>}, {pipeline_mode = #tpu.pipeline_mode<synchronous>, transform_indices = @transform_6, window_bounds = array<i64: 1, 32>}, {pipeline_mode = #tpu.pipeline_mode<synchronous>, transform_indices = @transform_7, window_bounds = array<i64: 1, 32>}, {pipeline_mode = #tpu.pipeline_mode<synchronous>, transform_indices = @transform_8, window_bounds = array<i64: 1, 32>}, {pipeline_mode = #tpu.pipeline_mode<synchronous>, transform_indices = @transform_9, window_bounds = array<i64: 32, 32>}, {pipeline_mode = #tpu.pipeline_mode<synchronous>, transform_indices = @transform_10, window_bounds = array<i64: 1, 32>}, {pipeline_mode = #tpu.pipeline_mode<synchronous>, transform_indices = @transform_11, window_bounds = array<i64: 32, 64>}, {pipeline_mode = #tpu.pipeline_mode<synchronous>, transform_indices = @transform_12, window_bounds = array<i64: 1, 64>}, {pipeline_mode = #tpu.pipeline_mode<synchronous>, transform_indices = @transform_13, window_bounds = array<i64: 64, 32>}, {pipeline_mode = #tpu.pipeline_mode<synchronous>, transform_indices = @transform_14, window_bounds = array<i64: 1, 32>}, {transform_indices = @transform_15, window_bounds = array<i64: 2, 8, 32>}]} {
    %c0 = arith.constant 0 : index
    %c0_0 = arith.constant 0 : index
    %c0_1 = arith.constant 0 : index
    %0 = vector.load %arg1[%c0, %c0_0, %c0_1] : memref<2x8x32xbf16, #tpu.memory_space<vmem>>, vector<2x8x32xbf16>
    %1 = vector.shape_cast %0 : vector<2x8x32xbf16> to vector<16x32xbf16>
    %c0_2 = arith.constant 0 : index
    %c0_3 = arith.constant 0 : index
    %c0_4 = arith.constant 0 : index
    %2 = vector.load %arg2[%c0_2, %c0_3, %c0_4] : memref<2x8x32xbf16, #tpu.memory_space<vmem>>, vector<2x8x32xbf16>
    %3 = vector.shape_cast %2 : vector<2x8x32xbf16> to vector<16x32xbf16>
    %c0_5 = arith.constant 0 : index
    %c0_6 = arith.constant 0 : index
    %c0_7 = arith.constant 0 : index
    %4 = vector.load %arg3[%c0_5, %c0_6, %c0_7] : memref<2x8x32xbf16, #tpu.memory_space<vmem>>, vector<2x8x32xbf16>
    %5 = vector.shape_cast %4 : vector<2x8x32xbf16> to vector<16x32xbf16>
    %c0_8 = arith.constant 0 : index
    %c0_9 = arith.constant 0 : index
    %6 = vector.load %arg4[%c0_8, %c0_9] : memref<32x32xbf16, #tpu.memory_space<vmem>>, vector<32x32xbf16>
    %cst = arith.constant dense<0.000000e+00> : vector<16x32xf32>
    %7 = tpu.matmul %1, %6, %cst {dimension_numbers = #tpu.dot_dimension_numbers<[1], [0], [0], [1], [0, 0, 1, 1], [], []>} : vector<16x32xbf16>, vector<32x32xbf16>, vector<16x32xf32> -> vector<16x32xf32>
    %c0_10 = arith.constant 0 : index
    %c0_11 = arith.constant 0 : index
    %8 = vector.load %arg7[%c0_10, %c0_11] : memref<1x32xf32, #tpu.memory_space<vmem>>, vector<1x32xf32>
    %9 = vector.broadcast %8 : vector<1x32xf32> to vector<16x32xf32>
    %10 = arith.addf %7, %9 : vector<16x32xf32>
    %11 = arith.truncf %10 : vector<16x32xf32> to vector<16x32xbf16>
    %c0_12 = arith.constant 0 : index
    %c0_13 = arith.constant 0 : index
    %12 = vector.load %arg5[%c0_12, %c0_13] : memref<32x32xbf16, #tpu.memory_space<vmem>>, vector<32x32xbf16>
    %cst_14 = arith.constant dense<0.000000e+00> : vector<16x32xf32>
    %13 = tpu.matmul %3, %12, %cst_14 {dimension_numbers = #tpu.dot_dimension_numbers<[1], [0], [0], [1], [0, 0, 1, 1], [], []>} : vector<16x32xbf16>, vector<32x32xbf16>, vector<16x32xf32> -> vector<16x32xf32>
    %c0_15 = arith.constant 0 : index
    %c0_16 = arith.constant 0 : index
    %14 = vector.load %arg8[%c0_15, %c0_16] : memref<1x32xf32, #tpu.memory_space<vmem>>, vector<1x32xf32>
    %15 = vector.broadcast %14 : vector<1x32xf32> to vector<16x32xf32>
    %16 = arith.addf %13, %15 : vector<16x32xf32>
    %17 = arith.truncf %16 : vector<16x32xf32> to vector<16x32xbf16>
    %c0_17 = arith.constant 0 : index
    %c0_18 = arith.constant 0 : index
    %18 = vector.load %arg6[%c0_17, %c0_18] : memref<32x32xbf16, #tpu.memory_space<vmem>>, vector<32x32xbf16>
    %cst_19 = arith.constant dense<0.000000e+00> : vector<16x32xf32>
    %19 = tpu.matmul %5, %18, %cst_19 {dimension_numbers = #tpu.dot_dimension_numbers<[1], [0], [0], [1], [0, 0, 1, 1], [], []>} : vector<16x32xbf16>, vector<32x32xbf16>, vector<16x32xf32> -> vector<16x32xf32>
    %c0_20 = arith.constant 0 : index
    %c0_21 = arith.constant 0 : index
    %20 = vector.load %arg9[%c0_20, %c0_21] : memref<1x32xf32, #tpu.memory_space<vmem>>, vector<1x32xf32>
    %21 = vector.broadcast %20 : vector<1x32xf32> to vector<16x32xf32>
    %22 = arith.addf %19, %21 : vector<16x32xf32>
    %23 = arith.truncf %22 : vector<16x32xf32> to vector<16x32xbf16>
    %24 = vector.extract_strided_slice %11 {offsets = [0, 0], sizes = [16, 8], strides = [1, 1]} : vector<16x32xbf16> to vector<16x8xbf16>
    %25 = vector.shape_cast %24 : vector<16x8xbf16> to vector<2x8x8xbf16>
    %26 = vector.extract_strided_slice %17 {offsets = [0, 0], sizes = [16, 8], strides = [1, 1]} : vector<16x32xbf16> to vector<16x8xbf16>
    %27 = vector.shape_cast %26 : vector<16x8xbf16> to vector<2x8x8xbf16>
    %28 = vector.extract_strided_slice %23 {offsets = [0, 0], sizes = [16, 8], strides = [1, 1]} : vector<16x32xbf16> to vector<16x8xbf16>
    %29 = vector.shape_cast %28 : vector<16x8xbf16> to vector<2x8x8xbf16>
    "tpu.trace_start"() <{level = 10 : i32, message = "bld,bsd->bls"}> : () -> ()
    %cst_22 = arith.constant dense<0.000000e+00> : vector<2x8x8xf32>
    %30 = tpu.matmul %25, %27, %cst_22 {dimension_numbers = #tpu.dot_dimension_numbers<[2], [2], [1], [1], [0, 0, 0, 1, 1, 1], [0], [0]>} : vector<2x8x8xbf16>, vector<2x8x8xbf16>, vector<2x8x8xf32> -> vector<2x8x8xf32>
    "tpu.trace_stop"() : () -> ()
    %cst_23 = arith.constant dense<0xFF800000> : vector<2x8xf32>
    %31 = vector.multi_reduction <maximumf>, %30, %cst_23 [2] : vector<2x8x8xf32> to vector<2x8xf32>
    %32 = vector.shape_cast %31 : vector<2x8xf32> to vector<2x8x1xf32>
    %33 = vector.broadcast %32 : vector<2x8x1xf32> to vector<2x8x8xf32>
    %34 = arith.subf %30, %33 : vector<2x8x8xf32>
    %35 = math.exp %34 : vector<2x8x8xf32>
    %cst_24 = arith.constant dense<0.000000e+00> : vector<2x8xf32>
    %36 = vector.multi_reduction <add>, %35, %cst_24 [2] : vector<2x8x8xf32> to vector<2x8xf32>
    %37 = vector.shape_cast %36 : vector<2x8xf32> to vector<2x8x1xf32>
    %38 = tpu.reciprocal %37 {approx = true} : vector<2x8x1xf32> -> vector<2x8x1xf32>
    %39 = vector.broadcast %38 : vector<2x8x1xf32> to vector<2x8x8xf32>
    %40 = arith.mulf %35, %39 : vector<2x8x8xf32>
    %41 = arith.truncf %40 : vector<2x8x8xf32> to vector<2x8x8xbf16>
    "tpu.trace_start"() <{level = 10 : i32, message = "bls,bsd->bld"}> : () -> ()
    %cst_25 = arith.constant dense<0.000000e+00> : vector<2x8x8xf32>
    %42 = tpu.matmul %41, %29, %cst_25 {dimension_numbers = #tpu.dot_dimension_numbers<[2], [1], [1], [2], [0, 0, 0, 1, 1, 2], [0], [0]>} : vector<2x8x8xbf16>, vector<2x8x8xbf16>, vector<2x8x8xf32> -> vector<2x8x8xf32>
    "tpu.trace_stop"() : () -> ()
    %43 = vector.extract_strided_slice %11 {offsets = [0, 8], sizes = [16, 8], strides = [1, 1]} : vector<16x32xbf16> to vector<16x8xbf16>
    %44 = vector.shape_cast %43 : vector<16x8xbf16> to vector<2x8x8xbf16>
    %45 = vector.extract_strided_slice %17 {offsets = [0, 8], sizes = [16, 8], strides = [1, 1]} : vector<16x32xbf16> to vector<16x8xbf16>
    %46 = vector.shape_cast %45 : vector<16x8xbf16> to vector<2x8x8xbf16>
    %47 = vector.extract_strided_slice %23 {offsets = [0, 8], sizes = [16, 8], strides = [1, 1]} : vector<16x32xbf16> to vector<16x8xbf16>
    %48 = vector.shape_cast %47 : vector<16x8xbf16> to vector<2x8x8xbf16>
    "tpu.trace_start"() <{level = 10 : i32, message = "bld,bsd->bls"}> : () -> ()
    %cst_26 = arith.constant dense<0.000000e+00> : vector<2x8x8xf32>
    %49 = tpu.matmul %44, %46, %cst_26 {dimension_numbers = #tpu.dot_dimension_numbers<[2], [2], [1], [1], [0, 0, 0, 1, 1, 1], [0], [0]>} : vector<2x8x8xbf16>, vector<2x8x8xbf16>, vector<2x8x8xf32> -> vector<2x8x8xf32>
    "tpu.trace_stop"() : () -> ()
    %cst_27 = arith.constant dense<0xFF800000> : vector<2x8xf32>
    %50 = vector.multi_reduction <maximumf>, %49, %cst_27 [2] : vector<2x8x8xf32> to vector<2x8xf32>
    %51 = vector.shape_cast %50 : vector<2x8xf32> to vector<2x8x1xf32>
    %52 = vector.broadcast %51 : vector<2x8x1xf32> to vector<2x8x8xf32>
    %53 = arith.subf %49, %52 : vector<2x8x8xf32>
    %54 = math.exp %53 : vector<2x8x8xf32>
    %cst_28 = arith.constant dense<0.000000e+00> : vector<2x8xf32>
    %55 = vector.multi_reduction <add>, %54, %cst_28 [2] : vector<2x8x8xf32> to vector<2x8xf32>
    %56 = vector.shape_cast %55 : vector<2x8xf32> to vector<2x8x1xf32>
    %57 = tpu.reciprocal %56 {approx = true} : vector<2x8x1xf32> -> vector<2x8x1xf32>
    %58 = vector.broadcast %57 : vector<2x8x1xf32> to vector<2x8x8xf32>
    %59 = arith.mulf %54, %58 : vector<2x8x8xf32>
    %60 = arith.truncf %59 : vector<2x8x8xf32> to vector<2x8x8xbf16>
    "tpu.trace_start"() <{level = 10 : i32, message = "bls,bsd->bld"}> : () -> ()
    %cst_29 = arith.constant dense<0.000000e+00> : vector<2x8x8xf32>
    %61 = tpu.matmul %60, %48, %cst_29 {dimension_numbers = #tpu.dot_dimension_numbers<[2], [1], [1], [2], [0, 0, 0, 1, 1, 2], [0], [0]>} : vector<2x8x8xbf16>, vector<2x8x8xbf16>, vector<2x8x8xf32> -> vector<2x8x8xf32>
    "tpu.trace_stop"() : () -> ()
    %62 = vector.extract_strided_slice %11 {offsets = [0, 16], sizes = [16, 8], strides = [1, 1]} : vector<16x32xbf16> to vector<16x8xbf16>
    %63 = vector.shape_cast %62 : vector<16x8xbf16> to vector<2x8x8xbf16>
    %64 = vector.extract_strided_slice %17 {offsets = [0, 16], sizes = [16, 8], strides = [1, 1]} : vector<16x32xbf16> to vector<16x8xbf16>
    %65 = vector.shape_cast %64 : vector<16x8xbf16> to vector<2x8x8xbf16>
    %66 = vector.extract_strided_slice %23 {offsets = [0, 16], sizes = [16, 8], strides = [1, 1]} : vector<16x32xbf16> to vector<16x8xbf16>
    %67 = vector.shape_cast %66 : vector<16x8xbf16> to vector<2x8x8xbf16>
    "tpu.trace_start"() <{level = 10 : i32, message = "bld,bsd->bls"}> : () -> ()
    %cst_30 = arith.constant dense<0.000000e+00> : vector<2x8x8xf32>
    %68 = tpu.matmul %63, %65, %cst_30 {dimension_numbers = #tpu.dot_dimension_numbers<[2], [2], [1], [1], [0, 0, 0, 1, 1, 1], [0], [0]>} : vector<2x8x8xbf16>, vector<2x8x8xbf16>, vector<2x8x8xf32> -> vector<2x8x8xf32>
    "tpu.trace_stop"() : () -> ()
    %cst_31 = arith.constant dense<0xFF800000> : vector<2x8xf32>
    %69 = vector.multi_reduction <maximumf>, %68, %cst_31 [2] : vector<2x8x8xf32> to vector<2x8xf32>
    %70 = vector.shape_cast %69 : vector<2x8xf32> to vector<2x8x1xf32>
    %71 = vector.broadcast %70 : vector<2x8x1xf32> to vector<2x8x8xf32>
    %72 = arith.subf %68, %71 : vector<2x8x8xf32>
    %73 = math.exp %72 : vector<2x8x8xf32>
    %cst_32 = arith.constant dense<0.000000e+00> : vector<2x8xf32>
    %74 = vector.multi_reduction <add>, %73, %cst_32 [2] : vector<2x8x8xf32> to vector<2x8xf32>
    %75 = vector.shape_cast %74 : vector<2x8xf32> to vector<2x8x1xf32>
    %76 = tpu.reciprocal %75 {approx = true} : vector<2x8x1xf32> -> vector<2x8x1xf32>
    %77 = vector.broadcast %76 : vector<2x8x1xf32> to vector<2x8x8xf32>
    %78 = arith.mulf %73, %77 : vector<2x8x8xf32>
    %79 = arith.truncf %78 : vector<2x8x8xf32> to vector<2x8x8xbf16>
    "tpu.trace_start"() <{level = 10 : i32, message = "bls,bsd->bld"}> : () -> ()
    %cst_33 = arith.constant dense<0.000000e+00> : vector<2x8x8xf32>
    %80 = tpu.matmul %79, %67, %cst_33 {dimension_numbers = #tpu.dot_dimension_numbers<[2], [1], [1], [2], [0, 0, 0, 1, 1, 2], [0], [0]>} : vector<2x8x8xbf16>, vector<2x8x8xbf16>, vector<2x8x8xf32> -> vector<2x8x8xf32>
    "tpu.trace_stop"() : () -> ()
    %81 = vector.extract_strided_slice %11 {offsets = [0, 24], sizes = [16, 8], strides = [1, 1]} : vector<16x32xbf16> to vector<16x8xbf16>
    %82 = vector.shape_cast %81 : vector<16x8xbf16> to vector<2x8x8xbf16>
    %83 = vector.extract_strided_slice %17 {offsets = [0, 24], sizes = [16, 8], strides = [1, 1]} : vector<16x32xbf16> to vector<16x8xbf16>
    %84 = vector.shape_cast %83 : vector<16x8xbf16> to vector<2x8x8xbf16>
    %85 = vector.extract_strided_slice %23 {offsets = [0, 24], sizes = [16, 8], strides = [1, 1]} : vector<16x32xbf16> to vector<16x8xbf16>
    %86 = vector.shape_cast %85 : vector<16x8xbf16> to vector<2x8x8xbf16>
    "tpu.trace_start"() <{level = 10 : i32, message = "bld,bsd->bls"}> : () -> ()
    %cst_34 = arith.constant dense<0.000000e+00> : vector<2x8x8xf32>
    %87 = tpu.matmul %82, %84, %cst_34 {dimension_numbers = #tpu.dot_dimension_numbers<[2], [2], [1], [1], [0, 0, 0, 1, 1, 1], [0], [0]>} : vector<2x8x8xbf16>, vector<2x8x8xbf16>, vector<2x8x8xf32> -> vector<2x8x8xf32>
    "tpu.trace_stop"() : () -> ()
    %cst_35 = arith.constant dense<0xFF800000> : vector<2x8xf32>
    %88 = vector.multi_reduction <maximumf>, %87, %cst_35 [2] : vector<2x8x8xf32> to vector<2x8xf32>
    %89 = vector.shape_cast %88 : vector<2x8xf32> to vector<2x8x1xf32>
    %90 = vector.broadcast %89 : vector<2x8x1xf32> to vector<2x8x8xf32>
    %91 = arith.subf %87, %90 : vector<2x8x8xf32>
    %92 = math.exp %91 : vector<2x8x8xf32>
    %cst_36 = arith.constant dense<0.000000e+00> : vector<2x8xf32>
    %93 = vector.multi_reduction <add>, %92, %cst_36 [2] : vector<2x8x8xf32> to vector<2x8xf32>
    %94 = vector.shape_cast %93 : vector<2x8xf32> to vector<2x8x1xf32>
    %95 = tpu.reciprocal %94 {approx = true} : vector<2x8x1xf32> -> vector<2x8x1xf32>
    %96 = vector.broadcast %95 : vector<2x8x1xf32> to vector<2x8x8xf32>
    %97 = arith.mulf %92, %96 : vector<2x8x8xf32>
    %98 = arith.truncf %97 : vector<2x8x8xf32> to vector<2x8x8xbf16>
    "tpu.trace_start"() <{level = 10 : i32, message = "bls,bsd->bld"}> : () -> ()
    %cst_37 = arith.constant dense<0.000000e+00> : vector<2x8x8xf32>
    %99 = tpu.matmul %98, %86, %cst_37 {dimension_numbers = #tpu.dot_dimension_numbers<[2], [1], [1], [2], [0, 0, 0, 1, 1, 2], [0], [0]>} : vector<2x8x8xbf16>, vector<2x8x8xbf16>, vector<2x8x8xf32> -> vector<2x8x8xf32>
    "tpu.trace_stop"() : () -> ()
    %100 = tpu.concatenate %42, %61, %80, %99 in 2 : vector<2x8x8xf32>, vector<2x8x8xf32>, vector<2x8x8xf32>, vector<2x8x8xf32> -> vector<2x8x32xf32>
    %101 = vector.shape_cast %100 : vector<2x8x32xf32> to vector<16x32xf32>
    %c0_38 = arith.constant 0 : index
    %c0_39 = arith.constant 0 : index
    %102 = vector.load %arg10[%c0_38, %c0_39] : memref<32x32xbf16, #tpu.memory_space<vmem>>, vector<32x32xbf16>
    %103 = arith.truncf %101 : vector<16x32xf32> to vector<16x32xbf16>
    %cst_40 = arith.constant dense<0.000000e+00> : vector<16x32xf32>
    %104 = tpu.matmul %103, %102, %cst_40 {dimension_numbers = #tpu.dot_dimension_numbers<[1], [0], [0], [1], [0, 0, 1, 1], [], []>} : vector<16x32xbf16>, vector<32x32xbf16>, vector<16x32xf32> -> vector<16x32xf32>
    %c0_41 = arith.constant 0 : index
    %c0_42 = arith.constant 0 : index
    %105 = vector.load %arg11[%c0_41, %c0_42] : memref<1x32xf32, #tpu.memory_space<vmem>>, vector<1x32xf32>
    %106 = vector.broadcast %105 : vector<1x32xf32> to vector<16x32xf32>
    %107 = arith.addf %104, %106 : vector<16x32xf32>
    %c0_43 = arith.constant 0 : index
    %c0_44 = arith.constant 0 : index
    %108 = vector.load %arg12[%c0_43, %c0_44] : memref<32x64xbf16, #tpu.memory_space<vmem>>, vector<32x64xbf16>
    %109 = arith.truncf %107 : vector<16x32xf32> to vector<16x32xbf16>
    %cst_45 = arith.constant dense<0.000000e+00> : vector<16x64xf32>
    %110 = tpu.matmul %109, %108, %cst_45 {dimension_numbers = #tpu.dot_dimension_numbers<[1], [0], [0], [1], [0, 0, 1, 1], [], []>} : vector<16x32xbf16>, vector<32x64xbf16>, vector<16x64xf32> -> vector<16x64xf32>
    %c0_46 = arith.constant 0 : index
    %c0_47 = arith.constant 0 : index
    %111 = vector.load %arg13[%c0_46, %c0_47] : memref<1x64xf32, #tpu.memory_space<vmem>>, vector<1x64xf32>
    %112 = vector.broadcast %111 : vector<1x64xf32> to vector<16x64xf32>
    %113 = arith.addf %110, %112 : vector<16x64xf32>
    %cst_48 = arith.constant 5.000000e-01 : f32
    %114 = vector.broadcast %cst_48 : f32 to vector<16x64xf32>
    %115 = arith.mulf %114, %113 : vector<16x64xf32>
    %cst_49 = arith.constant 0.707106769 : f32
    %116 = vector.broadcast %cst_49 : f32 to vector<16x64xf32>
    %117 = arith.mulf %113, %116 : vector<16x64xf32>
    %118 = math.absf %117 : vector<16x64xf32>
    %cst_50 = arith.constant 0.327591091 : f32
    %119 = vector.broadcast %cst_50 : f32 to vector<16x64xf32>
    %120 = arith.mulf %119, %118 : vector<16x64xf32>
    %cst_51 = arith.constant 1.000000e+00 : f32
    %121 = vector.broadcast %cst_51 : f32 to vector<16x64xf32>
    %122 = arith.addf %121, %120 : vector<16x64xf32>
    %cst_52 = arith.constant 1.000000e+00 : f32
    %123 = vector.broadcast %cst_52 : f32 to vector<16x64xf32>
    %124 = arith.divf %123, %122 : vector<16x64xf32>
    %cst_53 = arith.constant 1.06140542 : f32
    %125 = vector.broadcast %cst_53 : f32 to vector<16x64xf32>
    %126 = arith.mulf %125, %124 : vector<16x64xf32>
    %cst_54 = arith.constant -1.45315206 : f32
    %127 = vector.broadcast %cst_54 : f32 to vector<16x64xf32>
    %128 = arith.addf %126, %127 : vector<16x64xf32>
    %129 = arith.mulf %128, %124 : vector<16x64xf32>
    %cst_55 = arith.constant 1.42141378 : f32
    %130 = vector.broadcast %cst_55 : f32 to vector<16x64xf32>
    %131 = arith.addf %129, %130 : vector<16x64xf32>
    %132 = arith.mulf %131, %124 : vector<16x64xf32>
    %cst_56 = arith.constant -0.284496725 : f32
    %133 = vector.broadcast %cst_56 : f32 to vector<16x64xf32>
    %134 = arith.addf %132, %133 : vector<16x64xf32>
    %135 = arith.mulf %134, %124 : vector<16x64xf32>
    %cst_57 = arith.constant 0.254829586 : f32
    %136 = vector.broadcast %cst_57 : f32 to vector<16x64xf32>
    %137 = arith.addf %135, %136 : vector<16x64xf32>
    %138 = arith.mulf %137, %124 : vector<16x64xf32>
    %cst_58 = arith.constant 0.000000e+00 : f32
    %139 = vector.broadcast %cst_58 : f32 to vector<16x64xf32>
    %140 = arith.subf %139, %118 : vector<16x64xf32>
    %141 = arith.mulf %140, %118 : vector<16x64xf32>
    %142 = math.exp %141 : vector<16x64xf32>
    %143 = arith.mulf %138, %142 : vector<16x64xf32>
    %cst_59 = arith.constant 1.000000e+00 : f32
    %144 = vector.broadcast %cst_59 : f32 to vector<16x64xf32>
    %145 = arith.subf %144, %143 : vector<16x64xf32>
    %cst_60 = arith.constant 0.000000e+00 : f32
    %146 = vector.broadcast %cst_60 : f32 to vector<16x64xf32>
    %147 = arith.cmpf oge, %117, %146 : vector<16x64xf32>
    %cst_61 = arith.constant 0.000000e+00 : f32
    %148 = vector.broadcast %cst_61 : f32 to vector<16x64xf32>
    %149 = arith.subf %148, %145 : vector<16x64xf32>
    %150 = arith.select %147, %145, %149 : vector<16x64xi1>, vector<16x64xf32>
    %cst_62 = arith.constant 1.000000e+00 : f32
    %151 = vector.broadcast %cst_62 : f32 to vector<16x64xf32>
    %152 = arith.addf %151, %150 : vector<16x64xf32>
    %153 = arith.mulf %115, %152 : vector<16x64xf32>
    %c0_63 = arith.constant 0 : index
    %c0_64 = arith.constant 0 : index
    %154 = vector.load %arg14[%c0_63, %c0_64] : memref<64x32xbf16, #tpu.memory_space<vmem>>, vector<64x32xbf16>
    %155 = arith.truncf %153 : vector<16x64xf32> to vector<16x64xbf16>
    %cst_65 = arith.constant dense<0.000000e+00> : vector<16x32xf32>
    %156 = tpu.matmul %155, %154, %cst_65 {dimension_numbers = #tpu.dot_dimension_numbers<[1], [0], [0], [1], [0, 0, 1, 1], [], []>} : vector<16x64xbf16>, vector<64x32xbf16>, vector<16x32xf32> -> vector<16x32xf32>
    %c0_66 = arith.constant 0 : index
    %c0_67 = arith.constant 0 : index
    %157 = vector.load %arg15[%c0_66, %c0_67] : memref<1x32xf32, #tpu.memory_space<vmem>>, vector<1x32xf32>
    %158 = vector.broadcast %157 : vector<1x32xf32> to vector<16x32xf32>
    %159 = arith.addf %156, %158 : vector<16x32xf32>
    %160 = vector.shape_cast %159 : vector<16x32xf32> to vector<2x8x32xf32>
    %c0_68 = arith.constant 0 : index
    %c0_69 = arith.constant 0 : index
    %c0_70 = arith.constant 0 : index
    %161 = vector.load %arg16[%c0_68, %c0_69, %c0_70] : memref<2x8x32xf32, #tpu.memory_space<vmem>>, vector<2x8x32xf32>
    tpu.vector_store %arg16[%c0_68, %c0_69, %c0_70], %160 {strides = array<i32>} : memref<2x8x32xf32, #tpu.memory_space<vmem>>, vector<2x8x32xf32>,
    return
  }
  func.func @transform_0(%arg0: i32) -> (i32, i32, i32) {
    %c0_i32 = arith.constant 0 : i32
    %c0_i32_0 = arith.constant 0 : i32
    %c0_i32_1 = arith.constant 0 : i32
    return %arg0, %c0_i32, %c0_i32_0 : i32, i32, i32
  }
  func.func @transform_1(%arg0: i32) -> (i32, i32, i32) {
    %c0_i32 = arith.constant 0 : i32
    %c0_i32_0 = arith.constant 0 : i32
    %c0_i32_1 = arith.constant 0 : i32
    return %arg0, %c0_i32, %c0_i32_0 : i32, i32, i32
  }
  func.func @transform_2(%arg0: i32) -> (i32, i32, i32) {
    %c0_i32 = arith.constant 0 : i32
    %c0_i32_0 = arith.constant 0 : i32
    %c0_i32_1 = arith.constant 0 : i32
    return %arg0, %c0_i32, %c0_i32_0 : i32, i32, i32
  }
  func.func @transform_3(%arg0: i32) -> (i32, i32) {
    %c0_i32 = arith.constant 0 : i32
    %c0_i32_0 = arith.constant 0 : i32
    %c0_i32_1 = arith.constant 0 : i32
    return %c0_i32, %c0_i32_0 : i32, i32
  }
  func.func @transform_4(%arg0: i32) -> (i32, i32) {
    %c0_i32 = arith.constant 0 : i32
    %c0_i32_0 = arith.constant 0 : i32
    %c0_i32_1 = arith.constant 0 : i32
    return %c0_i32, %c0_i32_0 : i32, i32
  }
  func.func @transform_5(%arg0: i32) -> (i32, i32) {
    %c0_i32 = arith.constant 0 : i32
    %c0_i32_0 = arith.constant 0 : i32
    %c0_i32_1 = arith.constant 0 : i32
    return %c0_i32, %c0_i32_0 : i32, i32
  }
  func.func @transform_6(%arg0: i32) -> (i32, i32) {
    %c0_i32 = arith.constant 0 : i32
    %c0_i32_0 = arith.constant 0 : i32
    %c0_i32_1 = arith.constant 0 : i32
    return %c0_i32, %c0_i32_0 : i32, i32
  }
  func.func @transform_7(%arg0: i32) -> (i32, i32) {
    %c0_i32 = arith.constant 0 : i32
    %c0_i32_0 = arith.constant 0 : i32
    %c0_i32_1 = arith.constant 0 : i32
    return %c0_i32, %c0_i32_0 : i32, i32
  }
  func.func @transform_8(%arg0: i32) -> (i32, i32) {
    %c0_i32 = arith.constant 0 : i32
    %c0_i32_0 = arith.constant 0 : i32
    %c0_i32_1 = arith.constant 0 : i32
    return %c0_i32, %c0_i32_0 : i32, i32
  }
  func.func @transform_9(%arg0: i32) -> (i32, i32) {
    %c0_i32 = arith.constant 0 : i32
    %c0_i32_0 = arith.constant 0 : i32
    %c0_i32_1 = arith.constant 0 : i32
    return %c0_i32, %c0_i32_0 : i32, i32
  }
  func.func @transform_10(%arg0: i32) -> (i32, i32) {
    %c0_i32 = arith.constant 0 : i32
    %c0_i32_0 = arith.constant 0 : i32
    %c0_i32_1 = arith.constant 0 : i32
    return %c0_i32, %c0_i32_0 : i32, i32
  }
  func.func @transform_11(%arg0: i32) -> (i32, i32) {
    %c0_i32 = arith.constant 0 : i32
    %c0_i32_0 = arith.constant 0 : i32
    %c0_i32_1 = arith.constant 0 : i32
    return %c0_i32, %c0_i32_0 : i32, i32
  }
  func.func @transform_12(%arg0: i32) -> (i32, i32) {
    %c0_i32 = arith.constant 0 : i32
    %c0_i32_0 = arith.constant 0 : i32
    %c0_i32_1 = arith.constant 0 : i32
    return %c0_i32, %c0_i32_0 : i32, i32
  }
  func.func @transform_13(%arg0: i32) -> (i32, i32) {
    %c0_i32 = arith.constant 0 : i32
    %c0_i32_0 = arith.constant 0 : i32
    %c0_i32_1 = arith.constant 0 : i32
    return %c0_i32, %c0_i32_0 : i32, i32
  }
  func.func @transform_14(%arg0: i32) -> (i32, i32) {
    %c0_i32 = arith.constant 0 : i32
    %c0_i32_0 = arith.constant 0 : i32
    %c0_i32_1 = arith.constant 0 : i32
    return %c0_i32, %c0_i32_0 : i32, i32
  }
  func.func @transform_15(%arg0: i32) -> (i32, i32, i32) {
    %c0_i32 = arith.constant 0 : i32
    %c0_i32_0 = arith.constant 0 : i32
    %c0_i32_1 = arith.constant 0 : i32
    return %arg0, %c0_i32, %c0_i32_0 : i32, i32, i32
  }
}

</mosaic_0001>

<bundles_post_ra>
// kernel: tpu_custom_call.1
= control target key start
LH: loop header
LB: loop body
LE: loop exit
PB: predicated region body
PF: predicated region fallthrough
CT: control target
= control target key end

     0   :  { %s3500_s0 = inlined_call_operand.vmem [shape: bf16[4,8,32], index: 0, kind: input, shape index: {}]   ;;  %s3501_s1 = inlined_call_operand.vmem [shape: bf16[4,8,32], index: 1, kind: input, shape index: {}]   ;;  %s3502_s2 = inlined_call_operand.vmem [shape: bf16[4,8,32], index: 2, kind: input, shape index: {}]   ;;  %s3503_s3 = inlined_call_operand.hbm [shape: bf16[32,32], index: 3, kind: input, shape index: {}]   ;;  %s3504_s4 = inlined_call_operand.hbm [shape: bf16[32,32], index: 4, kind: input, shape index: {}]   ;;  %s3505_s5 = inlined_call_operand.hbm [shape: bf16[32,32], index: 5, kind: input, shape index: {}]   ;;  %s3506_s6 = inlined_call_operand.hbm [shape: f32[1,32], index: 6, kind: input, shape index: {}]   ;;  %s3507_s7 = inlined_call_operand.hbm [shape: f32[1,32], index: 7, kind: input, shape index: {}]   ;;  %s3508_s8 = inlined_call_operand.hbm [shape: f32[1,32], index: 8, kind: input, shape index: {}]   ;;  %s3509_s9 = inlined_call_operand.vmem [shape: bf16[32,32], index: 9, kind: input, shape index: {}]   ;;  %s3510_s10 = inlined_call_operand.vmem [shape: f32[1,32], index: 10, kind: input, shape index: {}]   ;;  %s3511_s11 = inlined_call_operand.hbm [shape: bf16[32,64], index: 11, kind: input, shape index: {}]   ;;  %s3512_s12 = inlined_call_operand.vmem [shape: f32[1,64], index: 12, kind: input, shape index: {}]   ;;  %s3513_s13 = inlined_call_operand.vmem [shape: bf16[64,32], index: 13, kind: input, shape index: {}]   ;;  %s3514_s14 = inlined_call_operand.vmem [shape: f32[1,32], index: 14, kind: input, shape index: {}]   ;;  %s3515_s15 = inlined_call_operand.hbm [shape: f32[4,8,32], index: 15, kind: output, shape index: {}]  }
   0x1   :  { %3530 = sst [smem:[#allocation27_spill]] %s3515_s15 }
   0x2   :  { %20 = vsyncpa [#allocation3], 0 }
   0x3   :  { %21 = vsyncpa [#allocation6], 0 }
   0x4   :  { %22 = vsyncpa [#allocation9], 0 }
   0x5   :  { %23 = vsyncpa [#allocation12], 0 }
   0x6   :  { %24 = vsyncpa [#allocation4], 0 }
   0x7   :  { %26 = vsyncpa [#allocation4 + $0x1], 0  ;;  %s3066_s18 = smov 0   ;;  %s3068_s19 = smov 0  }
   0x8   :  { %s3070_s20 = smov 0   ;;  %s3072_s21 = smov 0  }
   0x9 LB: > { %3531 = sst [smem:[#allocation20_spill]] %s2953_s18  ;;  %s3087_s22 = sadd.s32 4294967295, %s2965_s21   ;;  %s2965_s21 = sphi %s3072_s21, %s3560_s21   ;;  %s2961_s20 = sphi %s3070_s20, %s3562_s20   ;;  %s2957_s19 = sphi %s3068_s19, %s3564_s19   ;;  %s2953_s18 = sphi %s3066_s18, %s3563_s18  }
   0xa   : > { %3532 = sst [smem:[#allocation21_spill]] %s2961_s20  ;;  %s2226_s23 = sadd.s32 4294967294, %s2965_s21  }
   0xb   : > { %3533 = sst [smem:[#allocation22_spill]] %s2965_s21  ;;  %s3091_s24 = sadd.s32 1, %s2965_s21  }
   0xc   : > { %3534 = sst [smem:[#allocation23_spill]] %s3091_s24  ;;  %s369_s25 = sadd.s32 1, %s2961_s20 }
   0xd   : > { %s366_s26 = ssub.s32 %s2965_s21, %s3091_s24  ;;  %p379_p0 = scmp.ne.s32.totalorder %s2961_s20, %s2957_s19 }
   0xe   : > { %p367_p1 = scmp.eq.s32.totalorder %s366_s26, 0  ;;  %p380_p2 = scmp.eq.s32.totalorder %s3087_s22, 1 }
   0xf   : > { %p385_p3 = scmp.ne.s32.totalorder %s2957_s19, %s2953_s18  ;;  %p386_p4 = scmp.eq.s32.totalorder %s2226_s23, 1 }
  0x10   : > { %s3102_s27 = scalar_select %p367_p1, %s2961_s20, %s369_s25  }
  0x11   : > { %p3104_p5 = por %p380_p2, %p379_p0  ;;  %p3108_p6 = por %p386_p4, %p385_p3 }
  0x12   : > { %3535 = sst [smem:[#allocation24_spill]] %s3102_s27  ;;  %p2227_p7 = scmp.ge.s32.totalorder %s2965_s21, 1 }
  0x13   : > { %s3536_s28 = scalar_select %p3104_p5, 1, 0 }
  0x14   : > { %s3538_s29 = scalar_select %p3108_p6, 1, 0 }
  0x15   : > { %3537 = sst [smem:[#allocation25_spill]] %s3536_s28  ;;  %p393_p8 = scmp.lt.s32.totalorder %s2965_s21, 3 }
  0x16   : > { %3539 = sst [smem:[#allocation26_spill]] %s3538_s29  ;;  %p3525_p9 = scmp.eq.s32.totalorder %s3087_s22, 0 }
  0x17   : > { %p3115_p10 = pnand %p2227_p7, %p393_p8  ;;  %s2967_s16 = smov [#allocation5]  }
  0x18   : > { %s418_s17 = sshll.u32 %s2967_s16, 4  ;;  %s2968_s25 = smov [#allocation8]   ;;  %s419_s17 = int_to_ptr.vmem [resolvable:$true] %s418_s17 }
  0x19   : > { %s3540_s30 = scalar_select %p3115_p10, 1, 0 }
  0x1a   : > { %p2544_p11 = pneg %p3115_p10  ;;  %s445_s26 = sshll.u32 %s2968_s25, 4  ;;  %s446_s26 = int_to_ptr.vmem [resolvable:$true] %s445_s26 }
  0x1b   : > { %s2969_s27 = smov [#allocation11]   ;;  %s2718_s29 = scalar_lea.vmem %s419_s17, 256 }
  0x1c   : > { %p3123_p12 = pnand %p3525_p9, %p2544_p11  ;;  %s467_s20 = sshll.u32 %s2969_s27, 4  ;;  %s468_s20 = int_to_ptr.vmem [resolvable:$true] %s467_s20 }
  0x1d   : > { %p2719_p0 = scmp.ne.s32.totalorder %s419_s17, %s2718_s29  ;;  %p2726_p3 = scmp.lt.s32.totalorder %s419_s17, %s419_s17 }
  0x1e   : > { %p3129_p13 = pneg %p3123_p12  ;;  %p2727_p4 = scmp.lt.s32.totalorder %s2718_s29, %s2718_s29 }
  0x20   : > { %p2721_p1 = pnand %p2719_p0, %p3129_p13  ;;  %p2728_p7 = por %p2727_p4, %p2726_p3 }
  0x22   : > { %p2722_p2 = pneg %p2721_p1 }
  0x24   : > { %p2729_p8 = pnand %p2728_p7, %p2722_p2 }
  0x26   : > { %2732 = shalt.err (!%p2729_p8)
}
  0x27   : > { %s3527_s16 = smov 64   ;;  %s2971_s27 = smov 4  }
  0x28   : > { %2550 = dma.hbm_to_vmem [thread:$0]  (!%p3123_p12), %s3504_s4, 256, %s419_s17, [#allocation6], %s3527_s16, %s3527_s16, %s2971_s27  }
  0x29   : > { %s2744_s21 = scalar_lea.vmem %s446_s26, 16  ;;  %s2751_s29 = scalar_lea.vmem %s446_s26, 32 }
  0x2a   : > { %p2745_p11 = scmp.ne.s32.totalorder %s446_s26, %s2744_s21  ;;  %p2752_p2 = scmp.lt.s32.totalorder %s446_s26, %s446_s26 }
  0x2b   : > { %p2753_p3 = scmp.lt.s32.totalorder %s2751_s29, %s2744_s21 }
  0x2c   : > { %p2747_p0 = pnand %p2745_p11, %p3129_p13 }
  0x2d   : > { %p2754_p4 = por %p2753_p3, %p2752_p2 }
  0x2e   : > { %p2748_p1 = pneg %p2747_p0 }
  0x30   : > { %p2755_p7 = pnand %p2754_p4, %p2748_p1 }
  0x32   : > { %2758 = shalt.err (!%p2755_p7)
}
  0x33   : > { %2556 = dma.hbm_to_vmem [thread:$0]  (!%p3123_p12), %s3506_s6, 16, %s446_s26, [#allocation9]  }
  0x34   : > { %s2770_s18 = scalar_lea.vmem %s468_s20, 16  ;;  %s2777_s17 = scalar_lea.vmem %s468_s20, 32 }
  0x35   : > { %p2771_p8 = scmp.ne.s32.totalorder %s468_s20, %s2770_s18  ;;  %p2778_p0 = scmp.lt.s32.totalorder %s468_s20, %s468_s20 }
  0x36   : > { %p2779_p6 = scmp.lt.s32.totalorder %s2777_s17, %s2770_s18 }
  0x37   : > { %p2773_p9 = pnand %p2771_p8, %p3129_p13 }
  0x38   : > { %p2780_p5 = por %p2779_p6, %p2778_p0 }
  0x39   : > { %p2774_p11 = pneg %p2773_p9 }
  0x3b   : > { %p2781_p2 = pnand %p2780_p5, %p2774_p11 }
  0x3d   : > { %2784 = shalt.err (!%p2781_p2)
}
  0x3e   : > { %2562 = dma.hbm_to_vmem [thread:$0]  (!%p3123_p12), %s3508_s8, 16, %s468_s20, [#allocation12]  }
  0x3f   : > { %s2972_s15 = smov [#allocation2]   ;;  %s2973_s26 = smov [#allocation7]  }
  0x40   : > { %s405_s28 = sshll.u32 %s2972_s15, 4  ;;  %s431_s29 = sshll.u32 %s2973_s26, 4  ;;  %s406_s28 = int_to_ptr.vmem [resolvable:$true] %s405_s28  ;;  %s432_s29 = int_to_ptr.vmem [resolvable:$true] %s431_s29 }
  0x41   : > { %s2796_s16 = scalar_lea.vmem %s406_s28, 256  ;;  %p2804_p6 = scmp.lt.s32.totalorder %s406_s28, %s406_s28 }
  0x42   : > { %p2797_p9 = scmp.ne.s32.totalorder %s406_s28, %s2796_s16  ;;  %p2805_p5 = scmp.lt.s32.totalorder %s2796_s16, %s2796_s16 }
  0x44   : > { %p2799_p1 = pnand %p2797_p9, %p3129_p13  ;;  %p2806_p4 = por %p2805_p5, %p2804_p6 }
  0x46   : > { %p2800_p3 = pneg %p2799_p1 }
  0x48   : > { %p2807_p7 = pnand %p2806_p4, %p2800_p3 }
  0x4a   : > { %2810 = shalt.err (!%p2807_p7)
}
  0x4b   : > { %s3543_s18 = smov 64   ;;  %s2822_s21 = scalar_lea.vmem %s432_s29, 256 }
  0x4c   : > { %2547 = dma.hbm_to_vmem [thread:$0]  (!%p3123_p12), %s3503_s3, 256, %s406_s28, [#allocation3], %s3543_s18, %s3543_s18, %s2971_s27  }
  0x4d   : > { %p2823_p8 = scmp.ne.s32.totalorder %s432_s29, %s2822_s21  ;;  %p2830_p2 = scmp.lt.s32.totalorder %s432_s29, %s432_s29 }
  0x4e   : > { %p2831_p9 = scmp.lt.s32.totalorder %s2822_s21, %s2822_s21 }
  0x4f   : > { %p2825_p11 = pnand %p2823_p8, %p3129_p13 }
  0x50   : > { %p2832_p1 = por %p2831_p9, %p2830_p2 }
  0x51   : > { %p2826_p0 = pneg %p2825_p11 }
  0x53   : > { %p2833_p3 = pnand %p2832_p1, %p2826_p0 }
  0x55   : > { %2836 = shalt.err (!%p2833_p3)
}
  0x56   : > { %2553 = dma.hbm_to_vmem [thread:$0]  (!%p3123_p12), %s3505_s5, 256, %s432_s29, [#allocation6], %s3543_s18, %s3543_s18, %s2971_s27  }
  0x57   : > { %s2974_s15 = smov [#allocation10]   ;;  %s2975_s26 = smov [#allocation13]  }
  0x58   : > { %s456_s28 = sshll.u32 %s2974_s15, 4  ;;  %s483_s20 = sshll.u32 %s2975_s26, 4  ;;  %s457_s28 = int_to_ptr.vmem [resolvable:$true] %s456_s28  ;;  %s484_s20 = int_to_ptr.vmem [resolvable:$true] %s483_s20 }
  0x59   : > { %s2848_s17 = scalar_lea.vmem %s457_s28, 16  ;;  %s2855_s21 = scalar_lea.vmem %s457_s28, 32 }
  0x5a   : > { %p2849_p6 = scmp.ne.s32.totalorder %s457_s28, %s2848_s17  ;;  %p2856_p7 = scmp.lt.s32.totalorder %s457_s28, %s457_s28 }
  0x5b   : > { %p2857_p8 = scmp.lt.s32.totalorder %s2855_s21, %s2848_s17 }
  0x5c   : > { %p2851_p5 = pnand %p2849_p6, %p3129_p13 }
  0x5d   : > { %p2858_p11 = por %p2857_p8, %p2856_p7 }
  0x5e   : > { %p2852_p4 = pneg %p2851_p5 }
  0x60   : > { %p2859_p0 = pnand %p2858_p11, %p2852_p4 }
  0x62   : > { %2862 = shalt.err (!%p2859_p0)
}
  0x63   : > { %2559 = dma.hbm_to_vmem [thread:$0]  (!%p3123_p12), %s3507_s7, 16, %s457_s28, [#allocation9]  }
  0x64   : > { %s2874_s25 = scalar_lea.vmem %s484_s20, 256  ;;  %p2882_p3 = scmp.lt.s32.totalorder %s484_s20, %s484_s20 }
  0x65   : > { %p2875_p2 = scmp.ne.s32.totalorder %s484_s20, %s2874_s25  ;;  %p2883_p6 = scmp.lt.s32.totalorder %s2874_s25, %s2874_s25 }
  0x67   : > { %p2877_p9 = pnand %p2875_p2, %p3129_p13  ;;  %p2884_p5 = por %p2883_p6, %p2882_p3 }
  0x69   : > { %p2878_p1 = pneg %p2877_p9 }
  0x6b   : > { %p2885_p10 = pnand %p2884_p5, %p2878_p1 }
  0x6d   : > { %2888 = shalt.err (!%p2885_p10)
}
  0x6e   : > { %2565 = dma.hbm_to_vmem [thread:$0]  (!%p3123_p12), %s3511_s11, 256, %s484_s20, [#allocation12], %s3543_s18, %s3543_s18, %s2971_s27  }
  0x6f   : > { %p3544_p4 = scmp.ne.s32.totalorder %s3540_s30, 0 }
  0x70   : > { %p3545_p13 = scmp.eq.s32.totalorder (!%p3544_p4), %s3087_s22, 0 }
  0x71   : > { %535 = sbr.rel (%p3544_p4) target bundleno = 3381 (0xd35), region = 80 }
  0x76   : > { %2932 = dma.done.wait (%p3545_p13), [#allocation3], 256   ;;  %p3546_p7 = pmov %p3545_p13 }
  0x78   : > { %2934 = vsyncadd (%p3546_p7), [#allocation3], 4294967040  ;;  %p3547_p10 = pmov %p3546_p7 }
  0x79   : > { %p3548_p8 = pmov %p3546_p7 }
  0x7a   : > { %2936 = dma.done.wait (%p3547_p10), [#allocation6], 512  }
  0x7b   : > { %2938 = vsyncadd (%p3548_p8), [#allocation6], 4294966784  ;;  %p3549_p11 = pmov %p3546_p7 }
  0x7c   : > { %p3550_p12 = pmov %p3546_p7 }
  0x7d   : > { %2940 = dma.done.wait (%p3549_p11), [#allocation9], 32  }
  0x7e   : > { %2942 = vsyncadd (%p3550_p12), [#allocation9], 4294967264  ;;  %p3551_p0 = pmov %p3546_p7 }
  0x80   : > { %2944 = dma.done.wait (%p3551_p0), [#allocation12], 272   ;;  %p3552_p2 = pmov %p3551_p0 }
  0x81   : > { %s2245_s24 = sshll.u32 %s3087_s22, 1  ;;  %v2976_v0 = vmov 0.0   ;;  %vm2977_vm0 = vmmov 0   ;;  %v2650_v1 = vld [vmem:[#allocation5 + $0x8] sm:$0xff]   ;;  %v2651_v2 = vld [vmem:[#allocation2 + $0x8] sm:$0xff]   ;;  %v2652_v3 = vld [vmem:[#allocation5] sm:$0xff]  }
  0x82   : > { %2946 = vsyncadd (%p3552_p2), [#allocation12], 4294967024  ;;  %2374 = vmatprep.subr.bf16.mxu1 %v2976_v0  ;;  %2366 = vmatprep.subr.bf16.mxu0 %v2976_v0  ;;  %p618_p9 = scmp.lt.s32.totalorder %s2245_s24, 3  ;;  %v2653_v4 = vld [vmem:[#allocation2] sm:$0xff]   ;;  %vm671_vm1 = vcmask 261120   ;;  %v2656_v7 = vld [vmem:[#allocation7 + $0x8] sm:$0xff]  }
  0x83   : > { %2378 = vmatprep.mubr.msk.bf16.mxu1 %vm2977_vm0, %v2976_v0  ;;  %2370 = vmatprep.mubr.msk.bf16.mxu0 %vm2977_vm0, %v2976_v0  ;;  %v2657_v8 = vld [vmem:[#allocation7] sm:$0xff]   ;;  %v2256_v10 = vld [vmem:[#allocation10] ss:$0 sm:$0xff]  ;;  %v2251_v15 = vld [vmem:[#allocation8] ss:$0 sm:$0xff]  ;;  %vm878_vm2 = vcmask 64512  }
  0x84   : > { %s3566_s24 = smov (!%p618_p9, %s2245_s24), 3  ;;  %2375 = vmatpush3.bf16.msra.mxu1 %v2650_v1  ;;  %2367 = vmatpush3.bf16.msra.mxu0 %v2651_v2  ;;  %s2978_s25 = smov 120   ;;  %v2261_v30 = vld [vmem:[#allocation11] ss:$0 sm:$0xff]  ;;  %vm998_vm3 = vcmask 1043456   ;;  %vm1774_vm4 = vcmask 130048  }
  0x85   : > { %s2246_s30 = sshll.u32 %s3566_s24, 2  ;;  %2376 = vmatprep.subr.bf16.mxu1 %v2976_v0  ;;  %2368 = vmatprep.subr.bf16.mxu0 %v2976_v0  ;;  %s2979_s15 = smov 112   ;;  %vm1777_vm5 = vcmask 195584   ;;  %vm2010_vm8 = vcmask 523264  }
  0x86   : > { %s627_s18 = scalar_lea.vmem %s3501_s1, %s2246_s30  ;;  %s621_s17 = scalar_lea.vmem %s3500_s0, %s2246_s30 }
  0x87   : > { %v2654_v5 = vld [vmem:[%s627_s18] sm:$0xff]   ;;  %s633_s29 = scalar_lea.vmem %s3502_s2, %s2246_s30  ;;  %s2980_s26 = smov 104  }
  0x88   : > { %2377 = vmatpush3.bf16.msra.mxu1 %v2652_v3  ;;  %v2655_v6 = vld [vmem:[%s621_s17] sm:$0xff]   ;;  %2369 = vmatpush3.bf16.msra.mxu0 %v2653_v4  ;;  %s2981_s24 = smov 8   ;;  %s2982_s30 = smov 16  }
  0x89   : > { %2390 = vmatprep.subr.bf16.mxu1 %v2976_v0  ;;  %2382 = vmatprep.subr.bf16.mxu0 %v2976_v0  ;;  %v2658_v9 = vld [vmem:[%s633_s29] sm:$0xff]   ;;  %s2983_s20 = smov 24   ;;  %s3553_s29 = sld [smem:[#allocation25_spill]] }
  0x8a   : > { %s3554_s27 = sld [smem:[#allocation27_spill]] }
  0x8b   : > { %2379 = vmatmul.mubr.msk.bf16.vlgmr.msra.gmra.mxu1 %vm671_vm1, %v2654_v5  ;;  %2371 = vmatmul.mubr.msk.bf16.vlgmr.msra.gmra.mxu0 %vm671_vm1, %v2655_v6 }
  0x8c   : > { %2392 = vmatprep.mubr.msk.bf16.mxu1 %vm2977_vm0, %v2976_v0  ;;  %2383 = vmatpush3.bf16.msra.mxu0 %v2656_v7 }
  0x8d   : > { %2386 = vmatprep.mubr.msk.bf16.mxu0 %vm2977_vm0, %v2976_v0  ;;  %2384 = vmatprep.subr.bf16.mxu0 %v2976_v0 }
  0x8f   : > { %p3555_p3 = scmp.ne.s32.totalorder %s3553_s29, 0 }
  0x90   : > { %2385 = vmatpush3.bf16.msra.mxu0 %v2657_v8 }
  0x91   : > { %2396 = vmatprep.subr.bf16.mxu0 %v2976_v0 }
  0x93   : > { %2387 = vmatmul.mubr.msk.bf16.vlgmr.msra.gmra.mxu0 %vm671_vm1, %v2658_v9 }
  0x94   : > { %2398 = vmatprep.mubr.msk.bf16.mxu0 %vm2977_vm0, %v2976_v0 }
 0x14b   : > { %v782_v11 = vpop.f32.mrf.mxu1  ;;  %v709_v13 = vpop.f32.mrf.mxu0 }
 0x14c   : > { %v783_v12 = vadd.f32 %v2256_v10, %v782_v11  ;;  %v710_v19 = vadd.f32 %v2251_v15, %v709_v13 }
 0x14d   : > { %v2380_v14 = vpop.f32.mrf.mxu1  ;;  %v2372_v17 = vpop.f32.mrf.mxu0 }
 0x14e   : > { %v3243_v16 = vpack.c.bf16 %v783_v12, %v783_v12  ;;  %v3250_v26 = vpack.c.bf16 %v710_v19, %v710_v19 }
 0x14f   : > { %v785_v18 = vpop.f32.mrf.mxu1  ;;  %v712_v22 = vpop.f32.mrf.mxu0 }
 0x150   : > { %v786_v20 = vadd.f32 %v2256_v10, %v785_v18  ;;  %v883_v21 = vsel %vm878_vm2, %v3243_v16, 0  ;;  %v713_v28 = vadd.f32 %v2251_v15, %v712_v22 }
 0x151   : > { %v2381_v23 = vpop.f32.mrf.mxu1  ;;  %2391 = vmatpush3.bf16.xpose.msra.mxu1 %v883_v21  ;;  %v2373_v25 = vpop.f32.mrf.mxu0 }
 0x152   : > { %v3247_v24 = vpack.c.bf16 %v786_v20, %v786_v20  ;;  %2402 = vmatprep.subr.bf16.mxu1 %v2976_v0  ;;  %v3261_v29 = vpack.c.bf16 %v713_v28, %v713_v28 }
 0x153   : > { %v855_v31 = vpop.f32.mrf.mxu0 }
 0x154   : > { %1140 = vrot.lane.b32.xlu1 %v3247_v24, %s2978_s25  ;;  %v929_v27 = vsel %vm878_vm2, %v3247_v24, 0  ;;  %v856_v33 = vadd.f32 %v2261_v30, %v855_v31 }
 0x155   : > { %2397 = vmatpush3.bf16.xpose.msra.mxu0 %v929_v27  ;;  %v2388_v32 = vpop.f32.mrf.mxu0 }
 0x156   : > { %2408 = vmatprep.subr.bf16.mxu0 %v2976_v0  ;;  %v3267_v37 = vpack.c.bf16 %v856_v33, %v856_v33 }
 0x157   : > { %v858_v34 = vpop.f32.mrf.mxu0 }
 0x158   : > { %2393 = vmatmul.mubr.msk.bf16.vlgmr.msra.gmra.mxu1 %vm878_vm2, %v3250_v26  ;;  %v859_v35 = vadd.f32 %v2261_v30, %v858_v34  ;;  %v1000_v39 = vsel %vm998_vm3, %v3267_v37, 0 }
 0x159   : > { %2404 = vmatprep.mubr.msk.bf16.mxu1 %vm2977_vm0, %v2976_v0  ;;  %v2389_v36 = vpop.f32.mrf.mxu0  ;;  %2403 = vmatpush3.bf16.msra.mxu1 %v1000_v39 }
 0x15a   : > { %v3269_v38 = vpack.c.bf16 %v859_v35, %v859_v35  ;;  %2414 = vmatprep.subr.bf16.mxu1 %v2976_v0 }
 0x15c   : > { %2399 = vmatmul.mubr.msk.bf16.vlgmr.msra.gmra.mxu0 %vm878_vm2, %v3261_v29  ;;  %v1046_v40 = vsel %vm998_vm3, %v3269_v38, 0 }
 0x15d   : > { %2410 = vmatprep.mubr.msk.bf16.mxu0 %vm2977_vm0, %v2976_v0  ;;  %2409 = vmatpush3.bf16.msra.mxu0 %v1046_v40 }
 0x15e   : > { %2420 = vmatprep.subr.bf16.mxu0 %v2976_v0 }
 0x1c6   : > { %v1141_v61 = vpop.permute.xlu1 %1140 }
 0x1c7   : > { %v1146_v9 = vsel %vm878_vm2, %v1141_v61, 0 }
 0x218   : > { %v919_v41 = vpop.f32.mrf.mxu1 }
 0x219   : > { %v971_v42 = vsel %vm878_vm2, %v919_v41, -inf }
 0x21a   : > { %972 = vmax.xlane.f32.xlu0 %v971_v42  ;;  %v2394_v43 = vpop.f32.mrf.mxu1 }
 0x21c   : > { %v922_v44 = vpop.f32.mrf.mxu1  ;;  %v965_v45 = vpop.f32.mrf.mxu0 }
 0x21d   : > { %v974_v46 = vsel %vm878_vm2, %v965_v45, -inf }
 0x21e   : > { %v2395_v47 = vpop.f32.mrf.mxu1  ;;  %975 = vmax.xlane.f32.xlu0 %v974_v46  ;;  %v2400_v48 = vpop.f32.mrf.mxu0 }
 0x220   : > { %v968_v49 = vpop.f32.mrf.mxu0 }
 0x222   : > { %v2401_v50 = vpop.f32.mrf.mxu0 }
 0x234   : > { %1090 = vrot.lane.b32.xlu0 %v3243_v16, %s2978_s25 }
 0x2a3   : > { %v973_v51 = vpop.xlane.xlu0 %972 }
 0x2a4   : > { %v977_v52 = vsub.f32 %v919_v41, %v973_v51 }
 0x2a6   : > { %v979_v53 = vmul.f32 1.442695, %v977_v52 }
 0x2a7   : > { %v976_v54 = vpop.xlane.xlu0 %975 }
 0x2a8   : > { %2667 = vpow2.f32 %v979_v53  ;;  %v978_v55 = vsub.f32 %v965_v45, %v976_v54 }
 0x2aa   : > { %v981_v56 = vmul.f32 1.442695, %v978_v55 }
 0x2ab   : > { %v1091_v3 = vpop.permute.xlu0 %1090 }
 0x2ac   : > { %2669 = vpow2.f32 %v981_v56  ;;  %v1096_v6 = vsel %vm878_vm2, %v1091_v3, 0 }
 0x2b5   : > { %v2668_v57 = vpop.eup %2667 }
 0x2b6   : > { %v983_v58 = vsel %vm878_vm2, %v2668_v57, 0.0 }
 0x2b7   : > { %984 = vadd.xlane.f32.xlu1 %v983_v58 }
 0x2b9   : > { %v2670_v59 = vpop.eup %2669 }
 0x2ba   : > { %v986_v60 = vsel %vm878_vm2, %v2670_v59, 0.0 }
 0x2bb   : > { %987 = vadd.xlane.f32.xlu1 %v986_v60 }
 0x2cc   : > { %1088 = vrot.lane.b32.xlu1 %v3250_v26, %s2978_s25 }
 0x2d0   : > { %1138 = vrot.lane.b32.xlu1 %v3261_v29, %s2978_s25 }
 0x340   : > { %v985_v62 = vpop.xlane.xlu1 %984 }
 0x341   : > { %2671 = vrcp.f32 %v985_v62 }
 0x344   : > { %v988_v63 = vpop.xlane.xlu1 %987 }
 0x345   : > { %2673 = vrcp.f32 %v988_v63 }
 0x348   : > { %v1089_v10 = vpop.permute.xlu1 %1088 }
 0x34c   : > { %v1139_v11 = vpop.permute.xlu1 %1138 }
 0x34e   : > { %v2672_v1 = vpop.eup %2671 }
 0x34f   : > { %v991_v2 = vmul.f32 %v2672_v1, %v2668_v57 }
 0x351   : > { %v993_v4 = vpack.c.bf16 %v991_v2, %v991_v2 }
 0x352   : > { %v2674_v5 = vpop.eup %2673 }
 0x353   : > { %2405 = vmatmul.mubr.msk.bf16.vlgmr.msra.gmra.mxu1 %vm878_vm2, %v993_v4  ;;  %v992_v7 = vmul.f32 %v2674_v5, %v2670_v59 }
 0x354   : > { %2415 = vmatpush3.bf16.xpose.msra.mxu1 %v1096_v6  ;;  %2416 = vmatprep.mubr.msk.bf16.mxu1 %vm2977_vm0, %v2976_v0 }
 0x355   : > { %v994_v8 = vpack.c.bf16 %v992_v7, %v992_v7  ;;  %2426 = vmatprep.subr.bf16.mxu1 %v2976_v0 }
 0x357   : > { %2411 = vmatmul.mubr.msk.bf16.vlgmr.msra.gmra.mxu0 %vm878_vm2, %v994_v8 }
 0x358   : > { %2421 = vmatpush3.bf16.xpose.msra.mxu0 %v1146_v9  ;;  %2422 = vmatprep.mubr.msk.bf16.mxu0 %vm2977_vm0, %v2976_v0 }
 0x359   : > { %2432 = vmatprep.subr.bf16.mxu0 %v2976_v0 }
 0x35b   : > { %2417 = vmatmul.mubr.msk.bf16.vlgmr.msra.gmra.mxu1 %vm878_vm2, %v1089_v10 }
 0x35c   : > { %2428 = vmatprep.mubr.msk.bf16.mxu1 %vm2977_vm0, %v2976_v0 }
 0x35f   : > { %2423 = vmatmul.mubr.msk.bf16.vlgmr.msra.gmra.mxu0 %vm878_vm2, %v1139_v11 }
 0x360   : > { %2434 = vmatprep.mubr.msk.bf16.mxu0 %vm2977_vm0, %v2976_v0 }
 0x413   : > { %v3303_v12 = vpop.f32.mrf.mxu1 }
 0x415   : > { %v2406_v13 = vpop.f32.mrf.mxu1 }
 0x417   : > { %v1039_v14 = vpop.f32.mrf.mxu1  ;;  %v3305_v15 = vpop.f32.mrf.mxu0 }
 0x419   : > { %v2407_v17 = vpop.f32.mrf.mxu1  ;;  %v2412_v18 = vpop.f32.mrf.mxu0 }
 0x41b   : > { %v1085_v19 = vpop.f32.mrf.mxu0  ;;  %v1132_v20 = vpop.f32.mrf.mxu1 }
 0x41c   : > { %v1188_v21 = vsel %vm878_vm2, %v1132_v20, -inf }
 0x41d   : > { %1189 = vmax.xlane.f32.xlu0 %v1188_v21  ;;  %v2413_v22 = vpop.f32.mrf.mxu0  ;;  %v2418_v23 = vpop.f32.mrf.mxu1 }
 0x41f   : > { %v1135_v25 = vpop.f32.mrf.mxu1  ;;  %v1182_v27 = vpop.f32.mrf.mxu0 }
 0x420   : > { %v1191_v28 = vsel %vm878_vm2, %v1182_v27, -inf }
 0x421   : > { %v2419_v30 = vpop.f32.mrf.mxu1  ;;  %1192 = vmax.xlane.f32.xlu1 %v1191_v28  ;;  %v2424_v31 = vpop.f32.mrf.mxu0 }
 0x423   : > { %v1185_v32 = vpop.f32.mrf.mxu0 }
 0x425   : > { %v2425_v33 = vpop.f32.mrf.mxu0 }
 0x432   : > { %1260 = vrot.lane.b32.xlu1 %v3269_v38, %s2978_s25 }
 0x436   : > { %1310 = vrot.lane.b32.xlu1 %v3243_v16, %s2979_s15 }
 0x43a   : > { %1360 = vrot.lane.b32.xlu1 %v3247_v24, %s2979_s15 }
 0x43e   : > { %1358 = vrot.lane.b32.xlu1 %v3261_v29, %s2979_s15 }
 0x4a6   : > { %v1190_v34 = vpop.xlane.xlu0 %1189 }
 0x4a7   : > { %v1194_v35 = vsub.f32 %v1132_v20, %v1190_v34 }
 0x4a9   : > { %v1196_v36 = vmul.f32 1.442695, %v1194_v35 }
 0x4aa   : > { %v1193_v39 = vpop.xlane.xlu1 %1192 }
 0x4ab   : > { %2675 = vpow2.f32 %v1196_v36  ;;  %v1195_v40 = vsub.f32 %v1182_v27, %v1193_v39 }
 0x4ad   : > { %v1198_v41 = vmul.f32 1.442695, %v1195_v40 }
 0x4ae   : > { %v1261_v42 = vpop.permute.xlu1 %1260 }
 0x4af   : > { %2677 = vpow2.f32 %v1198_v41  ;;  %v1266_v43 = vsel %vm998_vm3, %v1261_v42, 0 }
 0x4b0   : > { %2433 = vmatpush3.bf16.msra.mxu0 %v1266_v43 }
 0x4b1   : > { %2444 = vmatprep.subr.bf16.mxu0 %v2976_v0 }
 0x4b2   : > { %v1311_v53 = vpop.permute.xlu1 %1310 }
 0x4b3   : > { %v1316_v57 = vsel %vm878_vm2, %v1311_v53, 0 }
 0x4b6   : > { %v1361_v59 = vpop.permute.xlu1 %1360 }
 0x4b7   : > { %v1366_v61 = vsel %vm878_vm2, %v1361_v59, 0 }
 0x4b8   : > { %v2676_v44 = vpop.eup %2675 }
 0x4b9   : > { %v1200_v45 = vsel %vm878_vm2, %v2676_v44, 0.0 }
 0x4ba   : > { %1201 = vadd.xlane.f32.xlu0 %v1200_v45  ;;  %v1359_v63 = vpop.permute.xlu1 %1358 }
 0x4bc   : > { %v2678_v46 = vpop.eup %2677 }
 0x4bd   : > { %v1203_v47 = vsel %vm878_vm2, %v2678_v46, 0.0 }
 0x4be   : > { %1204 = vadd.xlane.f32.xlu0 %v1203_v47 }
 0x4d4   : > { %1212 = vrot.lane.b32.xlu0 %v3267_v37, %s2978_s25 }
 0x4d8   : > { %1308 = vrot.lane.b32.xlu0 %v3250_v26, %s2979_s15 }
 0x543   : > { %v1202_v48 = vpop.xlane.xlu0 %1201 }
 0x544   : > { %2679 = vrcp.f32 %v1202_v48 }
 0x547   : > { %v1205_v49 = vpop.xlane.xlu0 %1204 }
 0x548   : > { %2681 = vrcp.f32 %v1205_v49 }
 0x54b   : > { %v1213_v50 = vpop.permute.xlu0 %1212 }
 0x54c   : > { %v1218_v51 = vsel %vm998_vm3, %v1213_v50, 0 }
 0x54d   : > { %2427 = vmatpush3.bf16.msra.mxu1 %v1218_v51 }
 0x54e   : > { %2438 = vmatprep.subr.bf16.mxu1 %v2976_v0 }
 0x54f   : > { %v1309_v62 = vpop.permute.xlu0 %1308 }
 0x551   : > { %v2680_v52 = vpop.eup %2679 }
 0x552   : > { %v1208_v54 = vmul.f32 %v2680_v52, %v2676_v44 }
 0x554   : > { %v1210_v55 = vpack.c.bf16 %v1208_v54, %v1208_v54 }
 0x555   : > { %v2682_v56 = vpop.eup %2681 }
 0x556   : > { %2429 = vmatmul.mubr.msk.bf16.vlgmr.msra.gmra.mxu1 %vm878_vm2, %v1210_v55  ;;  %v1209_v58 = vmul.f32 %v2682_v56, %v2678_v46 }
 0x557   : > { %2439 = vmatpush3.bf16.xpose.msra.mxu1 %v1316_v57  ;;  %2440 = vmatprep.mubr.msk.bf16.mxu1 %vm2977_vm0, %v2976_v0 }
 0x558   : > { %v1211_v60 = vpack.c.bf16 %v1209_v58, %v1209_v58  ;;  %2450 = vmatprep.subr.bf16.mxu1 %v2976_v0 }
 0x55a   : > { %2435 = vmatmul.mubr.msk.bf16.vlgmr.msra.gmra.mxu0 %vm878_vm2, %v1211_v60 }
 0x55b   : > { %2445 = vmatpush3.bf16.xpose.msra.mxu0 %v1366_v61  ;;  %2446 = vmatprep.mubr.msk.bf16.mxu0 %vm2977_vm0, %v2976_v0 }
 0x55c   : > { %2456 = vmatprep.subr.bf16.mxu0 %v2976_v0 }
 0x55e   : > { %2441 = vmatmul.mubr.msk.bf16.vlgmr.msra.gmra.mxu1 %vm878_vm2, %v1309_v62 }
 0x55f   : > { %2452 = vmatprep.mubr.msk.bf16.mxu1 %vm2977_vm0, %v2976_v0 }
 0x562   : > { %2447 = vmatmul.mubr.msk.bf16.vlgmr.msra.gmra.mxu0 %vm878_vm2, %v1359_v63 }
 0x563   : > { %2458 = vmatprep.mubr.msk.bf16.mxu0 %vm2977_vm0, %v2976_v0 }
 0x616   : > { %v3343_v1 = vpop.f32.mrf.mxu1 }
 0x618   : > { %v2430_v2 = vpop.f32.mrf.mxu1 }
 0x61a   : > { %v1257_v3 = vpop.f32.mrf.mxu1  ;;  %v3345_v4 = vpop.f32.mrf.mxu0 }
 0x61b   : > { %v2635_v5 = vpack.i.bf16 %v3345_v4, %v3343_v1 }
 0x61c   : > { %v2431_v6 = vpop.f32.mrf.mxu1  ;;  %v2436_v7 = vpop.f32.mrf.mxu0 }
 0x61e   : > { %v1305_v8 = vpop.f32.mrf.mxu0  ;;  %v1352_v9 = vpop.f32.mrf.mxu1 }
 0x61f   : > { %v1408_v10 = vsel %vm878_vm2, %v1352_v9, -inf }
 0x620   : > { %1409 = vmax.xlane.f32.xlu0 %v1408_v10  ;;  %v2437_v11 = vpop.f32.mrf.mxu0  ;;  %v2442_v13 = vpop.f32.mrf.mxu1 }
 0x622   : > { %v1355_v14 = vpop.f32.mrf.mxu1  ;;  %v1402_v17 = vpop.f32.mrf.mxu0 }
 0x623   : > { %v1411_v18 = vsel %vm878_vm2, %v1402_v17, -inf }
 0x624   : > { %v2443_v19 = vpop.f32.mrf.mxu1  ;;  %1412 = vmax.xlane.f32.xlu1 %v1411_v18  ;;  %v2448_v20 = vpop.f32.mrf.mxu0 }
 0x626   : > { %v1405_v21 = vpop.f32.mrf.mxu0 }
 0x628   : > { %v2449_v22 = vpop.f32.mrf.mxu0 }
 0x635   : > { %1480 = vrot.lane.b32.xlu1 %v3269_v38, %s2979_s15 }
 0x639   : > { %1530 = vrot.lane.b32.xlu1 %v3243_v16, %s2980_s26 }
 0x63d   : > { %1580 = vrot.lane.b32.xlu1 %v3247_v24, %s2980_s26 }
 0x641   : > { %1578 = vrot.lane.b32.xlu1 %v3261_v29, %s2980_s26 }
 0x6a9   : > { %v1410_v23 = vpop.xlane.xlu0 %1409 }
 0x6aa   : > { %v1414_v25 = vsub.f32 %v1352_v9, %v1410_v23 }
 0x6ac   : > { %v1416_v27 = vmul.f32 1.442695, %v1414_v25 }
 0x6ad   : > { %v1413_v28 = vpop.xlane.xlu1 %1412 }
 0x6ae   : > { %2683 = vpow2.f32 %v1416_v27  ;;  %v1415_v30 = vsub.f32 %v1402_v17, %v1413_v28 }
 0x6b0   : > { %v1418_v31 = vmul.f32 1.442695, %v1415_v30 }
 0x6b1   : > { %v1481_v32 = vpop.permute.xlu1 %1480 }
 0x6b2   : > { %2685 = vpow2.f32 %v1418_v31  ;;  %v1486_v33 = vsel %vm998_vm3, %v1481_v32, 0 }
 0x6b3   : > { %2457 = vmatpush3.bf16.msra.mxu0 %v1486_v33 }
 0x6b4   : > { %2468 = vmatprep.subr.bf16.mxu0 %v2976_v0 }
 0x6b5   : > { %v1531_v42 = vpop.permute.xlu1 %1530 }
 0x6b6   : > { %v1536_v46 = vsel %vm878_vm2, %v1531_v42, 0 }
 0x6b9   : > { %v1581_v47 = vpop.permute.xlu1 %1580 }
 0x6ba   : > { %v1586_v49 = vsel %vm878_vm2, %v1581_v47, 0 }
 0x6bb   : > { %v2684_v16 = vpop.eup %2683 }
 0x6bc   : > { %v1420_v24 = vsel %vm878_vm2, %v2684_v16, 0.0 }
 0x6bd   : > { %1421 = vadd.xlane.f32.xlu0 %v1420_v24  ;;  %v1579_v51 = vpop.permute.xlu1 %1578  ;;  %v2660_v24 = vld [vmem:[%s3509_s9] sm:$0xff]  }
 0x6bf   : > { %v2686_v34 = vpop.eup %2685 }
 0x6c0   : > { %v1423_v29 = vsel %vm878_vm2, %v2686_v34, 0.0 }
 0x6c1   : > { %1424 = vadd.xlane.f32.xlu0 %v1423_v29 }
 0x6d7   : > { %1432 = vrot.lane.b32.xlu0 %v3267_v37, %s2979_s15 }
 0x6db   : > { %1528 = vrot.lane.b32.xlu0 %v3250_v26, %s2980_s26 }
 0x746   : > { %v1422_v35 = vpop.xlane.xlu0 %1421 }
 0x747   : > { %2687 = vrcp.f32 %v1422_v35 }
 0x74a   : > { %v1425_v36 = vpop.xlane.xlu0 %1424 }
 0x74b   : > { %2689 = vrcp.f32 %v1425_v36 }
 0x74e   : > { %v1433_v39 = vpop.permute.xlu0 %1432 }
 0x74f   : > { %v1438_v40 = vsel %vm998_vm3, %v1433_v39, 0 }
 0x750   : > { %2451 = vmatpush3.bf16.msra.mxu1 %v1438_v40 }
 0x751   : > { %2462 = vmatprep.subr.bf16.mxu1 %v2976_v0 }
 0x752   : > { %v1529_v50 = vpop.permute.xlu0 %1528 }
 0x754   : > { %v2688_v41 = vpop.eup %2687 }
 0x755   : > { %v1428_v43 = vmul.f32 %v2688_v41, %v2684_v16  ;;  %v2659_v16 = vld [vmem:[%s3509_s9 + $0x8] sm:$0xff]  }
 0x757   : > { %v1430_v44 = vpack.c.bf16 %v1428_v43, %v1428_v43 }
 0x758   : > { %v2690_v45 = vpop.eup %2689 }
 0x759   : > { %2453 = vmatmul.mubr.msk.bf16.vlgmr.msra.gmra.mxu1 %vm878_vm2, %v1430_v44  ;;  %v1429_v26 = vmul.f32 %v2690_v45, %v2686_v34 }
 0x75a   : > { %2463 = vmatpush3.bf16.xpose.msra.mxu1 %v1536_v46  ;;  %2464 = vmatprep.mubr.msk.bf16.mxu1 %vm2977_vm0, %v2976_v0 }
 0x75b   : > { %v1431_v48 = vpack.c.bf16 %v1429_v26, %v1429_v26  ;;  %2474 = vmatprep.subr.bf16.mxu1 %v2976_v0 }
 0x75d   : > { %2459 = vmatmul.mubr.msk.bf16.vlgmr.msra.gmra.mxu0 %vm878_vm2, %v1431_v48 }
 0x75e   : > { %2469 = vmatpush3.bf16.xpose.msra.mxu0 %v1586_v49  ;;  %2470 = vmatprep.mubr.msk.bf16.mxu0 %vm2977_vm0, %v2976_v0 }
 0x75f   : > { %2480 = vmatprep.subr.bf16.mxu0 %v2976_v0 }
 0x761   : > { %2465 = vmatmul.mubr.msk.bf16.vlgmr.msra.gmra.mxu1 %vm878_vm2, %v1529_v50 }
 0x762   : > { %2476 = vmatprep.mubr.msk.bf16.mxu1 %vm2977_vm0, %v2976_v0 }
 0x765   : > { %2471 = vmatmul.mubr.msk.bf16.vlgmr.msra.gmra.mxu0 %vm878_vm2, %v1579_v51 }
 0x766   : > { %2482 = vmatprep.mubr.msk.bf16.mxu0 %vm2977_vm0, %v2976_v0 }
 0x819   : > { %v1474_v52 = vpop.f32.mrf.mxu1 }
 0x81b   : > { %v2454_v53 = vpop.f32.mrf.mxu1 }
 0x81d   : > { %v1477_v54 = vpop.f32.mrf.mxu1  ;;  %v1522_v55 = vpop.f32.mrf.mxu0 }
 0x81e   : > { %v2640_v10 = vpack.i.bf16 %v1522_v55, %v1474_v52 }
 0x81f   : > { %v2455_v56 = vpop.f32.mrf.mxu1  ;;  %v2460_v57 = vpop.f32.mrf.mxu0 }
 0x821   : > { %v1525_v58 = vpop.f32.mrf.mxu0  ;;  %v1572_v59 = vpop.f32.mrf.mxu1 }
 0x822   : > { %v1628_v60 = vsel %vm878_vm2, %v1572_v59, -inf }
 0x823   : > { %1629 = vmax.xlane.f32.xlu0 %v1628_v60  ;;  %v2461_v61 = vpop.f32.mrf.mxu0  ;;  %v2466_v62 = vpop.f32.mrf.mxu1 }
 0x825   : > { %v1575_v63 = vpop.f32.mrf.mxu1  ;;  %v1622_v2 = vpop.f32.mrf.mxu0 }
 0x826   : > { %v1631_v3 = vsel %vm878_vm2, %v1622_v2, -inf }
 0x827   : > { %v2467_v6 = vpop.f32.mrf.mxu1  ;;  %1632 = vmax.xlane.f32.xlu1 %v1631_v3  ;;  %v2472_v7 = vpop.f32.mrf.mxu0 }
 0x828   : > { %v2663_v7 = vld [vmem:[%s3513_s13 + $0x18] sm:$0xff]  }
 0x829   : > { %v1625_v8 = vpop.f32.mrf.mxu0 }
 0x82a   : > { %v2664_v8 = vld [vmem:[%s3513_s13 + $0x10] sm:$0xff]  }
 0x82b   : > { %v2473_v9 = vpop.f32.mrf.mxu0 }
 0x82c   : > { %v2665_v9 = vld [vmem:[%s3513_s13 + $0x8] sm:$0xff]  }
 0x838   : > { %1700 = vrot.lane.b32.xlu1 %v3269_v38, %s2980_s26 }
 0x83c   : > { %2636 = vrot.lane.b32.xlu1 %v2635_v5, %s2981_s24 }
 0x840   : > { %2641 = vrot.lane.b32.xlu1 %v2640_v10, %s2982_s30  ;;  %v2666_v10 = vld [vmem:[%s3513_s13] sm:$0xff]  }
 0x8ac   : > { %v1630_v11 = vpop.xlane.xlu0 %1629 }
 0x8ad   : > { %v1634_v13 = vsub.f32 %v1572_v59, %v1630_v11  ;;  %v2661_v59 = vld [vmem:[#allocation13 + $0x8] sm:$0xff]  }
 0x8ae   : > { %v2292_v11 = vld [vmem:[%s3512_s12] ss:$0 sm:$0xff] }
 0x8af   : > { %v1636_v14 = vmul.f32 1.442695, %v1634_v13 }
 0x8b0   : > { %v1633_v17 = vpop.xlane.xlu1 %1632 }
 0x8b1   : > { %2691 = vpow2.f32 %v1636_v14  ;;  %v1635_v18 = vsub.f32 %v1622_v2, %v1633_v17 }
 0x8b3   : > { %v1638_v19 = vmul.f32 1.442695, %v1635_v18 }
 0x8b4   : > { %v1701_v20 = vpop.permute.xlu1 %1700 }
 0x8b5   : > { %2693 = vpow2.f32 %v1638_v19  ;;  %v1706_v38 = vsel %vm998_vm3, %v1701_v20, 0 }
 0x8b6   : > { %2481 = vmatpush3.bf16.msra.mxu0 %v1706_v38 }
 0x8b7   : > { %2494 = vmatprep.subr.bf16.mxu0 %v2976_v0 }
 0x8b8   : > { %v2637_v44 = vpop.permute.xlu1 %2636 }
 0x8b9   : > { %v2639_v46 = vunpack.i.h.bf16 %v2637_v44  ;;  %v2638_v26 = vunpack.i.l.bf16 %v2637_v44 }
 0x8bb   : > { %v1773_v50 = vsel %vm878_vm2, %v3305_v15, %v2639_v46  ;;  %v1772_v51 = vsel %vm878_vm2, %v3303_v12, %v2638_v26  ;;  %v2662_v15 = vld [vmem:[#allocation13] sm:$0xff]   ;;  %v2288_v12 = vld [vmem:[%s3510_s10] ss:$0 sm:$0xff] }
 0x8bc   : > { %v2642_v45 = vpop.permute.xlu1 %2641 }
 0x8bd   : > { %v2644_v47 = vunpack.i.h.bf16 %v2642_v45  ;;  %v2643_v48 = vunpack.i.l.bf16 %v2642_v45 }
 0x8be   : > { %v2692_v21 = vpop.eup %2691 }
 0x8bf   : > { %v1640_v1 = vsel %vm878_vm2, %v2692_v21, 0.0  ;;  %v1775_v54 = vsel %vm1774_vm4, %v1772_v51, %v2643_v48  ;;  %v1776_v55 = vsel %vm1774_vm4, %v1773_v50, %v2644_v47 }
 0x8c0   : > { %1641 = vadd.xlane.f32.xlu0 %v1640_v1 }
 0x8c2   : > { %v2694_v4 = vpop.eup %2693 }
 0x8c3   : > { %v1643_v5 = vsel %vm878_vm2, %v2694_v4, 0.0 }
 0x8c4   : > { %1644 = vadd.xlane.f32.xlu0 %v1643_v5 }
 0x8da   : > { %1652 = vrot.lane.b32.xlu0 %v3267_v37, %s2980_s26  ;;  %s2313_s26 = sshll.u32 %s3087_s22, 8 }
 0x8db   : > { %s3456_s18 = scalar_lea.hbm %s3554_s27, %s2313_s26 }
 0x949   : > { %v1642_v22 = vpop.xlane.xlu0 %1641 }
 0x94a   : > { %2695 = vrcp.f32 %v1642_v22 }
 0x94d   : > { %v1645_v23 = vpop.xlane.xlu0 %1644 }
 0x94e   : > { %2697 = vrcp.f32 %v1645_v23 }
 0x951   : > { %v1653_v25 = vpop.permute.xlu0 %1652 }
 0x952   : > { %v1658_v27 = vsel %vm998_vm3, %v1653_v25, 0 }
 0x953   : > { %2475 = vmatpush3.bf16.msra.mxu1 %v1658_v27 }
 0x954   : > { %2486 = vmatprep.subr.bf16.mxu1 %v2976_v0 }
 0x957   : > { %v2696_v28 = vpop.eup %2695 }
 0x958   : > { %v1648_v30 = vmul.f32 %v2696_v28, %v2692_v21 }
 0x95a   : > { %v1650_v31 = vpack.c.bf16 %v1648_v30, %v1648_v30 }
 0x95b   : > { %v2698_v32 = vpop.eup %2697 }
 0x95c   : > { %2477 = vmatmul.mubr.msk.bf16.vlgmr.msra.gmra.mxu1 %vm878_vm2, %v1650_v31  ;;  %v1649_v33 = vmul.f32 %v2698_v32, %v2694_v4 }
 0x95d   : > { %2490 = vmatprep.mubr.msk.bf16.mxu1 %vm2977_vm0, %v2976_v0  ;;  %2487 = vmatpush3.bf16.msra.mxu1 %v2659_v16 }
 0x95e   : > { %v1651_v37 = vpack.c.bf16 %v1649_v33, %v1649_v33  ;;  %2488 = vmatprep.subr.bf16.mxu1 %v2976_v0 }
 0x960   : > { %2483 = vmatmul.mubr.msk.bf16.vlgmr.msra.gmra.mxu0 %vm878_vm2, %v1651_v37 }
 0x961   : > { %2498 = vmatprep.mubr.msk.bf16.mxu0 %vm2977_vm0, %v2976_v0  ;;  %2489 = vmatpush3.bf16.msra.mxu1 %v2660_v24 }
 0x962   : > { %2502 = vmatprep.subr.bf16.mxu1 %v2976_v0  ;;  %2495 = vmatpush3.bf16.msra.mxu0 %v2661_v59 }
 0x963   : > { %2496 = vmatprep.subr.bf16.mxu0 %v2976_v0 }
 0x966   : > { %2497 = vmatpush3.bf16.msra.mxu0 %v2662_v15 }
 0xa1c   : > { %v1694_v34 = vpop.f32.mrf.mxu1 }
 0xa1e   : > { %v2478_v29 = vpop.f32.mrf.mxu1 }
 0xa20   : > { %v1697_v35 = vpop.f32.mrf.mxu1  ;;  %v1742_v36 = vpop.f32.mrf.mxu0 }
 0xa21   : > { %v2645_v39 = vpack.i.bf16 %v1742_v36, %v1694_v34 }
 0xa22   : > { %v2479_v40 = vpop.f32.mrf.mxu1  ;;  %v2484_v41 = vpop.f32.mrf.mxu0 }
 0xa23   : > { %2646 = vrot.lane.b32.xlu0 %v2645_v39, %s2983_s20  ;;  %s614_s20 = sand.u32 1, %s2957_s19  }
 0xa24   : > { %v1745_v42 = vpop.f32.mrf.mxu0  ;;  %s2244_s17 = sshll.u32 %s614_s20, 4  ;;  %s3459_s28 = scalar_lea.sflag [#allocation4], %s614_s20 }
 0xa25   : > { %s616_s25 = scalar_lea.vmem [#allocation14], %s2244_s17  ;;  %s2984_s17 = smov [#allocation14]  }
 0xa26   : > { %v2485_v43 = vpop.f32.mrf.mxu0  ;;  %s2071_s15 = sshll.u32 %s616_s25, 4  ;;  %s2893_s21 = sshll.u32 %s2984_s17, 4  ;;  %s3451_s15 = int_to_ptr.vmem [resolvable:$true] %s2071_s15  ;;  %s2894_s21 = int_to_ptr.vmem [resolvable:$false] %s2893_s21 }
 0xa27   : > { %s2889_s22 = scalar_lea.vmem %s3451_s15, 256  ;;  %s2895_s16 = scalar_lea.vmem %s2894_s21, 512 }
 0xa28   : > { %p2890_p1 = scmp.ne.s32.totalorder %s3451_s15, %s2889_s22  ;;  %p2896_p4 = scmp.lt.s32.totalorder %s3451_s15, %s2894_s21 }
 0xa29   : > { %p2897_p13 = scmp.lt.s32.totalorder %s2895_s16, %s2889_s22 }
 0xa2a   : > { %p2891_p6 = pnand %p2890_p1, %p3555_p3 }
 0xa2b   : > { %p2898_p7 = por %p2897_p13, %p2896_p4 }
 0xa2c   : > { %p2892_p5 = pneg %p2891_p6 }
 0xa2e   : > { %p2899_p10 = pnand %p2898_p7, %p2892_p5 }
 0xa95   : > { %v2647_v49 = vpop.permute.xlu0 %2646 }
 0xa96   : > { %v2649_v52 = vunpack.i.h.bf16 %v2647_v49  ;;  %v2648_v53 = vunpack.i.l.bf16 %v2647_v49 }
 0xa98   : > { %v1779_v56 = vsel %vm1777_vm5, %v1776_v55, %v2649_v52  ;;  %v1778_v57 = vsel %vm1777_vm5, %v1775_v54, %v2648_v53 }
 0xa99   : > { %v1784_v58 = vpack.c.bf16 %v1779_v56, %v1778_v57 }
 0xa9b   : > { %2491 = vmatmul.mubr.msk.bf16.vlgmr.msra.gmra.mxu1 %vm671_vm1, %v1784_v58 }
 0xa9c   : > { %2510 = vmatprep.mubr.msk.bf16.mxu1 %vm2977_vm0, %v2976_v0  ;;  %2503 = vmatpush3.bf16.msra.mxu1 %v2663_v7 }
 0xa9d   : > { %2504 = vmatprep.subr.bf16.mxu1 %v2976_v0 }
 0xaa0   : > { %2505 = vmatpush3.bf16.msra.mxu1 %v2664_v8 }
 0xaa1   : > { %2506 = vmatprep.subr.bf16.mxu1 %v2976_v0 }
 0xaa4   : > { %2507 = vmatpush3.bf16.msra.mxu1 %v2665_v9 }
 0xaa5   : > { %2508 = vmatprep.subr.bf16.mxu1 %v2976_v0 }
 0xaa8   : > { %2509 = vmatpush3.bf16.msra.mxu1 %v2666_v10 }
 0xb5b   : > { %v1841_v60 = vpop.f32.mrf.mxu1 }
 0xb5c   : > { %v1842_v63 = vadd.f32 %v2288_v12, %v1841_v60 }
 0xb5d   : > { %v2492_v61 = vpop.f32.mrf.mxu1 }
 0xb5f   : > { %v1844_v62 = vpop.f32.mrf.mxu1 }
 0xb60   : > { %v1845_v2 = vadd.f32 %v2288_v12, %v1844_v62 }
 0xb61   : > { %v2493_v3 = vpop.f32.mrf.mxu1 }
 0xb62   : > { %v1852_v6 = vpack.c.bf16 %v1845_v2, %v1842_v63  ;;  %v2296_v3 = vld [vmem:[%s3514_s14] ss:$0 sm:$0xff] }
 0xb64   : > { %2499 = vmatmul.mubr.msk.bf16.vlgmr.msra.gmra.mxu0 %vm671_vm1, %v1852_v6 }
 0xc24   : > { %v1909_v13 = vpop.f32.mrf.mxu0 }
 0xc25   : > { %v1910_v14 = vadd.f32 %v2292_v11, %v1909_v13 }
 0xc26   : > { %v2500_v17 = vpop.f32.mrf.mxu0 }
 0xc27   : > { %v1918_v18 = vmul.f32 0.70710677, %v1910_v14  ;;  %v1916_v60 = vmul.f32 0.5, %v1910_v14 }
 0xc28   : > { %v1912_v19 = vpop.f32.mrf.mxu0 }
 0xc29   : > { %v1920_v20 = vand.u32 2147483647, %v1918_v18  ;;  %v1913_v38 = vadd.f32 %v2292_v11, %v1912_v19  ;;  %vm1960_vm6 = vcmp.ge.f32.partialorder %v1918_v18, 0.0 }
 0xc2a   : > { %v2501_v21 = vpop.f32.mrf.mxu0 }
 0xc2b   : > { %v1922_v1 = vmul.f32 0.3275911, %v1920_v20  ;;  %v1919_v4 = vmul.f32 0.70710677, %v1913_v38  ;;  %v1948_v25 = vsub.f32 0.0, %v1920_v20  ;;  %v1917_v12 = vmul.f32 0.5, %v1913_v38 }
 0xc2d   : > { %v1924_v0 = vadd.f32 1.0, %v1922_v1  ;;  %v1921_v5 = vand.u32 2147483647, %v1919_v4  ;;  %v1950_v27 = vmul.f32 %v1948_v25, %v1920_v20  ;;  %vm1961_vm7 = vcmp.ge.f32.partialorder %v1919_v4, 0.0 }
 0xc2f   : > { %2699 = vrcp.f32 %v1924_v0  ;;  %v1923_v22 = vmul.f32 0.3275911, %v1921_v5  ;;  %v1949_v28 = vsub.f32 0.0, %v1921_v5  ;;  %v1952_v32 = vmul.f32 1.442695, %v1950_v27 }
 0xc31   : > { %v1925_v23 = vadd.f32 1.0, %v1923_v22  ;;  %v1951_v33 = vmul.f32 %v1949_v28, %v1921_v5 }
 0xc33   : > { %2701 = vrcp.f32 %v1925_v23  ;;  %v1954_v29 = vmul.f32 1.442695, %v1951_v33 }
 0xc34   : > { %2703 = vpow2.f32 %v1952_v32 }
 0xc35   : > { %2705 = vpow2.f32 %v1954_v29 }
 0xc3c   : > { %v2700_v30 = vpop.eup %2699 }
 0xc3d   : > { %v1930_v31 = vmul.f32 1.0614054, %v2700_v30 }
 0xc3f   : > { %v1932_v37 = vadd.f32 -1.4531521, %v1930_v31 }
 0xc40   : > { %v2702_v16 = vpop.eup %2701 }
 0xc41   : > { %v1934_v24 = vmul.f32 %v2700_v30, %v1932_v37  ;;  %v1931_v34 = vmul.f32 1.0614054, %v2702_v16  ;;  %v2704_v48 = vpop.eup %2703 }
 0xc42   : > { %v2706_v53 = vpop.eup %2705 }
 0xc43   : > { %v1936_v35 = vadd.f32 1.4214138, %v1934_v24  ;;  %v1933_v36 = vadd.f32 -1.4531521, %v1931_v34 }
 0xc45   : > { %v1938_v39 = vmul.f32 %v2700_v30, %v1936_v35  ;;  %v1935_v40 = vmul.f32 %v2702_v16, %v1933_v36 }
 0xc47   : > { %v1940_v41 = vadd.f32 -0.28449672, %v1938_v39  ;;  %v1937_v42 = vadd.f32 1.4214138, %v1935_v40 }
 0xc49   : > { %v1942_v43 = vmul.f32 %v2700_v30, %v1940_v41  ;;  %v1939_v44 = vmul.f32 %v2702_v16, %v1937_v42 }
 0xc4b   : > { %v1944_v45 = vadd.f32 0.2548296, %v1942_v43  ;;  %v1941_v46 = vadd.f32 -0.28449672, %v1939_v44 }
 0xc4d   : > { %v1946_v26 = vmul.f32 %v2700_v30, %v1944_v45  ;;  %v1943_v47 = vmul.f32 %v2702_v16, %v1941_v46 }
 0xc4f   : > { %v1956_v49 = vmul.f32 %v2704_v48, %v1946_v26  ;;  %v1945_v50 = vadd.f32 0.2548296, %v1943_v47 }
 0xc51   : > { %v1958_v51 = vsub.f32 1.0, %v1956_v49  ;;  %v1947_v52 = vmul.f32 %v2702_v16, %v1945_v50 }
 0xc53   : > { %v1962_v54 = vsub.f32 0.0, %v1958_v51  ;;  %v1957_v55 = vmul.f32 %v2706_v53, %v1947_v52 }
 0xc55   : > { %v1964_v56 = vsel %vm1960_vm6, %v1958_v51, %v1962_v54  ;;  %v1959_v57 = vsub.f32 1.0, %v1957_v55 }
 0xc56   : > { %v1966_v59 = vadd.f32 1.0, %v1964_v56 }
 0xc57   : > { %v1963_v58 = vsub.f32 0.0, %v1959_v57 }
 0xc58   : > { %v1968_v62 = vmul.f32 %v1966_v59, %v1916_v60 }
 0xc59   : > { %v1965_v15 = vsel %vm1961_vm7, %v1959_v57, %v1963_v58 }
 0xc5a   : > { %v1967_v61 = vadd.f32 1.0, %v1965_v15 }
 0xc5c   : > { %v1969_v63 = vmul.f32 %v1967_v61, %v1917_v12 }
 0xc5e   : > { %v1978_v2 = vpack.c.bf16 %v1969_v63, %v1968_v62 }
 0xc60   : > { %2511 = vmatmul.mubr.msk.bf16.vlgmr.msra.gmra.mxu1 %vm2010_vm8, %v1978_v2 }
 0xd20   : > { %v2048_v6 = vpop.f32.mrf.mxu1 }
 0xd21   : > { %v2049_v7 = vadd.f32 %v2296_v3, %v2048_v6 }
 0xd22   : > { %v2512_v8 = vpop.f32.mrf.mxu1 }
 0xd23   : > { %2055 = vst.msk [vmem:[%s616_s25] sm:$0xff] %vm671_vm1, %v2049_v7 }
 0xd24   : > { %v2051_v9 = vpop.f32.mrf.mxu1 }
 0xd25   : > { %v2052_v10 = vadd.f32 %v2296_v3, %v2051_v9 }
 0xd26   : > { %v2513_v11 = vpop.f32.mrf.mxu1 }
 0xd27   : > { %2056 = vst.msk [vmem:[%s616_s25 + $0x8] sm:$0xff] %vm671_vm1, %v2052_v10 }
 0xd28   : > { %2902 = shalt.err (!%p2899_p10)
}
 0xd29   : > { %s2903_s20 = scalar_lea.hbm %s3456_s18, 256  ;;  %s2907_s30 = scalar_lea.hbm %s3554_s27, 512 }
 0xd2a   : > { %p2904_p8 = scmp.ne.s32.totalorder %s3456_s18, %s2903_s20  ;;  %p2908_p0 = scmp.lt.s32.totalorder %s3456_s18, %s3554_s27 }
 0xd2b   : > { %p2909_p2 = scmp.lt.s32.totalorder %s2907_s30, %s2903_s20 }
 0xd2c   : > { %p2905_p11 = pnand %p2904_p8, %p3555_p3 }
 0xd2d   : > { %p2910_p9 = por %p2909_p2, %p2908_p0 }
 0xd2e   : > { %p2906_p12 = pneg %p2905_p11 }
 0xd30   : > { %p2911_p1 = pnand %p2910_p9, %p2906_p12 }
 0xd32   : > { %2914 = shalt.err (!%p2911_p1)
}
 0xd33   : > { %s2985_s22 = smov 128  }
 0xd34   : > { %2542 = dma.vmem_to_hbm [thread:$0]  (%p3555_p3), %s3451_s15, 256, %s3456_s18, %s3459_s28, %s2985_s22, %s2985_s22, %s2981_s24  }
 0xd35 PF: > { %s3556_s21 = sld [smem:[#allocation22_spill]] }
 0xd36   : > { %s3557_s16 = sld [smem:[#allocation20_spill]] }
 0xd37   : > { %s3558_s25 = sld [smem:[#allocation26_spill]] }
 0xd3b   : > { %p2584_p6 = scmp.ge.s32.totalorder %s3556_s21, 2 }
 0xd3c   : > { %s2086_s26 = sand.u32 1, %s3557_s16  }
 0xd3d   : > { %p3559_p5 = scmp.ne.s32.totalorder %s3558_s25, 0  ;;  %s2087_s20 = scalar_lea.sflag [#allocation4], %s2086_s26 }
 0xd3f   : > { %p2567_p4 = pnand %p2584_p6, %p3559_p5 }
 0xd41   : > { %p2568_p13 = pneg %p2567_p4 }
 0xd43   : > { %2948 = dma.done.wait (%p2568_p13), %s2087_s20, 256  }
 0xd44   : > { %2950 = vsyncadd (%p2568_p13), %s2087_s20, 4294967040  ;;  %s3560_s21 = sld [smem:[#allocation23_spill]]  ;;  %s3563_s18 = smov %s2957_s19 }
 0xd45   : > { %s3561_s29 = sld [smem:[#allocation21_spill]] }
 0xd46   : > { %s3562_s20 = sld [smem:[#allocation24_spill]] }
 0xd4a   : > { %p29_p7 = scmp.ge.s32.totalorder %s3560_s21, 4  }
 0xd4b   : > { %s3564_s19 = smov %s3561_s29 }
 0xd4c   :  { %31 = sbr.rel (!%p29_p7) target bundleno = 9 (0x9), region = 150 }
 0xd51   :  { %2092 = vsyncpa [#allocation3], 1 }
 0xd52   :  { %2094 = vsyncpa [#allocation3 + $0x1], 1 }
 0xd53   :  { %2095 = vsyncpa [#allocation6], 1 }
 0xd54   :  { %2096 = vsyncpa [#allocation9], 1 }
 0xd55   :  { %2097 = vsyncpa [#allocation12], 1 }
 0xd56   :  { %2098 = vsyncpa [#allocation4], 1 }
 0xd57   :  { %2100 = vsyncpa [#allocation4 + $0x1], 1 }

// kernel: tpu_custom_call.1
= control target key start
LH: loop header
LB: loop body
LE: loop exit
PB: predicated region body
PF: predicated region fallthrough
CT: control target
= control target key end

     0   :  { %s3500_s0 = inlined_call_operand.vmem [shape: bf16[4,8,32], index: 0, kind: input, shape index: {}]   ;;  %s3501_s1 = inlined_call_operand.vmem [shape: bf16[4,8,32], index: 1, kind: input, shape index: {}]   ;;  %s3502_s2 = inlined_call_operand.vmem [shape: bf16[4,8,32], index: 2, kind: input, shape index: {}]   ;;  %s3503_s3 = inlined_call_operand.hbm [shape: bf16[32,32], index: 3, kind: input, shape index: {}]   ;;  %s3504_s4 = inlined_call_operand.hbm [shape: bf16[32,32], index: 4, kind: input, shape index: {}]   ;;  %s3505_s5 = inlined_call_operand.hbm [shape: bf16[32,32], index: 5, kind: input, shape index: {}]   ;;  %s3506_s6 = inlined_call_operand.hbm [shape: f32[1,32], index: 6, kind: input, shape index: {}]   ;;  %s3507_s7 = inlined_call_operand.hbm [shape: f32[1,32], index: 7, kind: input, shape index: {}]   ;;  %s3508_s8 = inlined_call_operand.hbm [shape: f32[1,32], index: 8, kind: input, shape index: {}]   ;;  %s3509_s9 = inlined_call_operand.vmem [shape: bf16[32,32], index: 9, kind: input, shape index: {}]   ;;  %s3510_s10 = inlined_call_operand.vmem [shape: f32[1,32], index: 10, kind: input, shape index: {}]   ;;  %s3511_s11 = inlined_call_operand.hbm [shape: bf16[32,64], index: 11, kind: input, shape index: {}]   ;;  %s3512_s12 = inlined_call_operand.vmem [shape: f32[1,64], index: 12, kind: input, shape index: {}]   ;;  %s3513_s13 = inlined_call_operand.vmem [shape: bf16[64,32], index: 13, kind: input, shape index: {}]   ;;  %s3514_s14 = inlined_call_operand.vmem [shape: f32[1,32], index: 14, kind: input, shape index: {}]   ;;  %s3515_s15 = inlined_call_operand.hbm [shape: f32[4,8,32], index: 15, kind: output, shape index: {}]  }
   0x1   :  { %3530 = sst [smem:[#allocation27_spill]] %s3515_s15 }
   0x2   :  { %20 = vsyncpa [#allocation3], 0 }
   0x3   :  { %21 = vsyncpa [#allocation6], 0 }
   0x4   :  { %22 = vsyncpa [#allocation9], 0 }
   0x5   :  { %23 = vsyncpa [#allocation12], 0 }
   0x6   :  { %24 = vsyncpa [#allocation4], 0 }
   0x7   :  { %26 = vsyncpa [#allocation4 + $0x1], 0  ;;  %s3066_s18 = smov 0   ;;  %s3068_s19 = smov 0  }
   0x8   :  { %s3070_s20 = smov 0   ;;  %s3072_s21 = smov 0  }
   0x9 LB: > { %3531 = sst [smem:[#allocation20_spill]] %s2953_s18  ;;  %s3087_s22 = sadd.s32 4294967295, %s2965_s21   ;;  %s2965_s21 = sphi %s3072_s21, %s3560_s21   ;;  %s2961_s20 = sphi %s3070_s20, %s3562_s20   ;;  %s2957_s19 = sphi %s3068_s19, %s3564_s19   ;;  %s2953_s18 = sphi %s3066_s18, %s3563_s18  }
   0xa   : > { %3532 = sst [smem:[#allocation21_spill]] %s2961_s20  ;;  %s2226_s23 = sadd.s32 4294967294, %s2965_s21  }
   0xb   : > { %3533 = sst [smem:[#allocation22_spill]] %s2965_s21  ;;  %s3091_s24 = sadd.s32 1, %s2965_s21  }
   0xc   : > { %3534 = sst [smem:[#allocation23_spill]] %s3091_s24  ;;  %s369_s25 = sadd.s32 1, %s2961_s20 }
   0xd   : > { %s366_s26 = ssub.s32 %s2965_s21, %s3091_s24  ;;  %p379_p0 = scmp.ne.s32.totalorder %s2961_s20, %s2957_s19 }
   0xe   : > { %p367_p1 = scmp.eq.s32.totalorder %s366_s26, 0  ;;  %p380_p2 = scmp.eq.s32.totalorder %s3087_s22, 1 }
   0xf   : > { %p385_p3 = scmp.ne.s32.totalorder %s2957_s19, %s2953_s18  ;;  %p386_p4 = scmp.eq.s32.totalorder %s2226_s23, 1 }
  0x10   : > { %s3102_s27 = scalar_select %p367_p1, %s2961_s20, %s369_s25  }
  0x11   : > { %p3104_p5 = por %p380_p2, %p379_p0  ;;  %p3108_p6 = por %p386_p4, %p385_p3 }
  0x12   : > { %3535 = sst [smem:[#allocation24_spill]] %s3102_s27  ;;  %p2227_p7 = scmp.ge.s32.totalorder %s2965_s21, 1 }
  0x13   : > { %s3536_s28 = scalar_select %p3104_p5, 1, 0 }
  0x14   : > { %s3538_s29 = scalar_select %p3108_p6, 1, 0 }
  0x15   : > { %3537 = sst [smem:[#allocation25_spill]] %s3536_s28  ;;  %p393_p8 = scmp.lt.s32.totalorder %s2965_s21, 3 }
  0x16   : > { %3539 = sst [smem:[#allocation26_spill]] %s3538_s29  ;;  %p3525_p9 = scmp.eq.s32.totalorder %s3087_s22, 0 }
  0x17   : > { %p3115_p10 = pnand %p2227_p7, %p393_p8  ;;  %s2967_s16 = smov [#allocation5]  }
  0x18   : > { %s418_s17 = sshll.u32 %s2967_s16, 4  ;;  %s2968_s25 = smov [#allocation8]   ;;  %s419_s17 = int_to_ptr.vmem [resolvable:$true] %s418_s17 }
  0x19   : > { %s3540_s30 = scalar_select %p3115_p10, 1, 0 }
  0x1a   : > { %p2544_p11 = pneg %p3115_p10  ;;  %s445_s26 = sshll.u32 %s2968_s25, 4  ;;  %s446_s26 = int_to_ptr.vmem [resolvable:$true] %s445_s26 }
  0x1b   : > { %s2969_s27 = smov [#allocation11]   ;;  %s2718_s29 = scalar_lea.vmem %s419_s17, 256 }
  0x1c   : > { %p3123_p12 = pnand %p3525_p9, %p2544_p11  ;;  %s467_s20 = sshll.u32 %s2969_s27, 4  ;;  %s468_s20 = int_to_ptr.vmem [resolvable:$true] %s467_s20 }
  0x1d   : > { %p2719_p0 = scmp.ne.s32.totalorder %s419_s17, %s2718_s29  ;;  %p2726_p3 = scmp.lt.s32.totalorder %s419_s17, %s419_s17 }
  0x1e   : > { %p3129_p13 = pneg %p3123_p12  ;;  %p2727_p4 = scmp.lt.s32.totalorder %s2718_s29, %s2718_s29 }
  0x20   : > { %p2721_p1 = pnand %p2719_p0, %p3129_p13  ;;  %p2728_p7 = por %p2727_p4, %p2726_p3 }
  0x22   : > { %p2722_p2 = pneg %p2721_p1 }
  0x24   : > { %p2729_p8 = pnand %p2728_p7, %p2722_p2 }
  0x26   : > { %2732 = shalt.err (!%p2729_p8)
}
  0x27   : > { %s3527_s16 = smov 64   ;;  %s2971_s27 = smov 4  }
  0x28   : > { %2550 = dma.hbm_to_vmem [thread:$0]  (!%p3123_p12), %s3504_s4, 256, %s419_s17, [#allocation6], %s3527_s16, %s3527_s16, %s2971_s27  }
  0x29   : > { %s2744_s21 = scalar_lea.vmem %s446_s26, 16  ;;  %s2751_s29 = scalar_lea.vmem %s446_s26, 32 }
  0x2a   : > { %p2745_p11 = scmp.ne.s32.totalorder %s446_s26, %s2744_s21  ;;  %p2752_p2 = scmp.lt.s32.totalorder %s446_s26, %s446_s26 }
  0x2b   : > { %p2753_p3 = scmp.lt.s32.totalorder %s2751_s29, %s2744_s21 }
  0x2c   : > { %p2747_p0 = pnand %p2745_p11, %p3129_p13 }
  0x2d   : > { %p2754_p4 = por %p2753_p3, %p2752_p2 }
  0x2e   : > { %p2748_p1 = pneg %p2747_p0 }
  0x30   : > { %p2755_p7 = pnand %p2754_p4, %p2748_p1 }
  0x32   : > { %2758 = shalt.err (!%p2755_p7)
}
  0x33   : > { %2556 = dma.hbm_to_vmem [thread:$0]  (!%p3123_p12), %s3506_s6, 16, %s446_s26, [#allocation9]  }
  0x34   : > { %s2770_s18 = scalar_lea.vmem %s468_s20, 16  ;;  %s2777_s17 = scalar_lea.vmem %s468_s20, 32 }
  0x35   : > { %p2771_p8 = scmp.ne.s32.totalorder %s468_s20, %s2770_s18  ;;  %p2778_p0 = scmp.lt.s32.totalorder %s468_s20, %s468_s20 }
  0x36   : > { %p2779_p6 = scmp.lt.s32.totalorder %s2777_s17, %s2770_s18 }
  0x37   : > { %p2773_p9 = pnand %p2771_p8, %p3129_p13 }
  0x38   : > { %p2780_p5 = por %p2779_p6, %p2778_p0 }
  0x39   : > { %p2774_p11 = pneg %p2773_p9 }
  0x3b   : > { %p2781_p2 = pnand %p2780_p5, %p2774_p11 }
  0x3d   : > { %2784 = shalt.err (!%p2781_p2)
}
  0x3e   : > { %2562 = dma.hbm_to_vmem [thread:$0]  (!%p3123_p12), %s3508_s8, 16, %s468_s20, [#allocation12]  }
  0x3f   : > { %s2972_s15 = smov [#allocation2]   ;;  %s2973_s26 = smov [#allocation7]  }
  0x40   : > { %s405_s28 = sshll.u32 %s2972_s15, 4  ;;  %s431_s29 = sshll.u32 %s2973_s26, 4  ;;  %s406_s28 = int_to_ptr.vmem [resolvable:$true] %s405_s28  ;;  %s432_s29 = int_to_ptr.vmem [resolvable:$true] %s431_s29 }
  0x41   : > { %s2796_s16 = scalar_lea.vmem %s406_s28, 256  ;;  %p2804_p6 = scmp.lt.s32.totalorder %s406_s28, %s406_s28 }
  0x42   : > { %p2797_p9 = scmp.ne.s32.totalorder %s406_s28, %s2796_s16  ;;  %p2805_p5 = scmp.lt.s32.totalorder %s2796_s16, %s2796_s16 }
  0x44   : > { %p2799_p1 = pnand %p2797_p9, %p3129_p13  ;;  %p2806_p4 = por %p2805_p5, %p2804_p6 }
  0x46   : > { %p2800_p3 = pneg %p2799_p1 }
  0x48   : > { %p2807_p7 = pnand %p2806_p4, %p2800_p3 }
  0x4a   : > { %2810 = shalt.err (!%p2807_p7)
}
  0x4b   : > { %s3543_s18 = smov 64   ;;  %s2822_s21 = scalar_lea.vmem %s432_s29, 256 }
  0x4c   : > { %2547 = dma.hbm_to_vmem [thread:$0]  (!%p3123_p12), %s3503_s3, 256, %s406_s28, [#allocation3], %s3543_s18, %s3543_s18, %s2971_s27  }
  0x4d   : > { %p2823_p8 = scmp.ne.s32.totalorder %s432_s29, %s2822_s21  ;;  %p2830_p2 = scmp.lt.s32.totalorder %s432_s29, %s432_s29 }
  0x4e   : > { %p2831_p9 = scmp.lt.s32.totalorder %s2822_s21, %s2822_s21 }
  0x4f   : > { %p2825_p11 = pnand %p2823_p8, %p3129_p13 }
  0x50   : > { %p2832_p1 = por %p2831_p9, %p2830_p2 }
  0x51   : > { %p2826_p0 = pneg %p2825_p11 }
  0x53   : > { %p2833_p3 = pnand %p2832_p1, %p2826_p0 }
  0x55   : > { %2836 = shalt.err (!%p2833_p3)
}
  0x56   : > { %2553 = dma.hbm_to_vmem [thread:$0]  (!%p3123_p12), %s3505_s5, 256, %s432_s29, [#allocation6], %s3543_s18, %s3543_s18, %s2971_s27  }
  0x57   : > { %s2974_s15 = smov [#allocation10]   ;;  %s2975_s26 = smov [#allocation13]  }
  0x58   : > { %s456_s28 = sshll.u32 %s2974_s15, 4  ;;  %s483_s20 = sshll.u32 %s2975_s26, 4  ;;  %s457_s28 = int_to_ptr.vmem [resolvable:$true] %s456_s28  ;;  %s484_s20 = int_to_ptr.vmem [resolvable:$true] %s483_s20 }
  0x59   : > { %s2848_s17 = scalar_lea.vmem %s457_s28, 16  ;;  %s2855_s21 = scalar_lea.vmem %s457_s28, 32 }
  0x5a   : > { %p2849_p6 = scmp.ne.s32.totalorder %s457_s28, %s2848_s17  ;;  %p2856_p7 = scmp.lt.s32.totalorder %s457_s28, %s457_s28 }
  0x5b   : > { %p2857_p8 = scmp.lt.s32.totalorder %s2855_s21, %s2848_s17 }
  0x5c   : > { %p2851_p5 = pnand %p2849_p6, %p3129_p13 }
  0x5d   : > { %p2858_p11 = por %p2857_p8, %p2856_p7 }
  0x5e   : > { %p2852_p4 = pneg %p2851_p5 }
  0x60   : > { %p2859_p0 = pnand %p2858_p11, %p2852_p4 }
  0x62   : > { %2862 = shalt.err (!%p2859_p0)
}
  0x63   : > { %2559 = dma.hbm_to_vmem [thread:$0]  (!%p3123_p12), %s3507_s7, 16, %s457_s28, [#allocation9]  }
  0x64   : > { %s2874_s25 = scalar_lea.vmem %s484_s20, 256  ;;  %p2882_p3 = scmp.lt.s32.totalorder %s484_s20, %s484_s20 }
  0x65   : > { %p2875_p2 = scmp.ne.s32.totalorder %s484_s20, %s2874_s25  ;;  %p2883_p6 = scmp.lt.s32.totalorder %s2874_s25, %s2874_s25 }
  0x67   : > { %p2877_p9 = pnand %p2875_p2, %p3129_p13  ;;  %p2884_p5 = por %p2883_p6, %p2882_p3 }
  0x69   : > { %p2878_p1 = pneg %p2877_p9 }
  0x6b   : > { %p2885_p10 = pnand %p2884_p5, %p2878_p1 }
  0x6d   : > { %2888 = shalt.err (!%p2885_p10)
}
  0x6e   : > { %2565 = dma.hbm_to_vmem [thread:$0]  (!%p3123_p12), %s3511_s11, 256, %s484_s20, [#allocation12], %s3543_s18, %s3543_s18, %s2971_s27  }
  0x6f   : > { %p3544_p4 = scmp.ne.s32.totalorder %s3540_s30, 0 }
  0x70   : > { %p3545_p13 = scmp.eq.s32.totalorder (!%p3544_p4), %s3087_s22, 0 }
  0x71   : > { %535 = sbr.rel (%p3544_p4) target bundleno = 3381 (0xd35), region = 80 }
  0x76   : > { %2932 = dma.done.wait (%p3545_p13), [#allocation3], 256   ;;  %p3546_p7 = pmov %p3545_p13 }
  0x78   : > { %2934 = vsyncadd (%p3546_p7), [#allocation3], 4294967040  ;;  %p3547_p10 = pmov %p3546_p7 }
  0x79   : > { %p3548_p8 = pmov %p3546_p7 }
  0x7a   : > { %2936 = dma.done.wait (%p3547_p10), [#allocation6], 512  }
  0x7b   : > { %2938 = vsyncadd (%p3548_p8), [#allocation6], 4294966784  ;;  %p3549_p11 = pmov %p3546_p7 }
  0x7c   : > { %p3550_p12 = pmov %p3546_p7 }
  0x7d   : > { %2940 = dma.done.wait (%p3549_p11), [#allocation9], 32  }
  0x7e   : > { %2942 = vsyncadd (%p3550_p12), [#allocation9], 4294967264  ;;  %p3551_p0 = pmov %p3546_p7 }
  0x80   : > { %2944 = dma.done.wait (%p3551_p0), [#allocation12], 272   ;;  %p3552_p2 = pmov %p3551_p0 }
  0x81   : > { %s2245_s24 = sshll.u32 %s3087_s22, 1  ;;  %v2976_v0 = vmov 0.0   ;;  %vm2977_vm0 = vmmov 0   ;;  %v2650_v1 = vld [vmem:[#allocation5 + $0x8] sm:$0xff]   ;;  %v2651_v2 = vld [vmem:[#allocation2 + $0x8] sm:$0xff]   ;;  %v2652_v3 = vld [vmem:[#allocation5] sm:$0xff]  }
  0x82   : > { %2946 = vsyncadd (%p3552_p2), [#allocation12], 4294967024  ;;  %2374 = vmatprep.subr.bf16.mxu1 %v2976_v0  ;;  %2366 = vmatprep.subr.bf16.mxu0 %v2976_v0  ;;  %p618_p9 = scmp.lt.s32.totalorder %s2245_s24, 3  ;;  %v2653_v4 = vld [vmem:[#allocation2] sm:$0xff]   ;;  %vm671_vm1 = vcmask 261120   ;;  %v2656_v7 = vld [vmem:[#allocation7 + $0x8] sm:$0xff]  }
  0x83   : > { %2378 = vmatprep.mubr.msk.bf16.mxu1 %vm2977_vm0, %v2976_v0  ;;  %2370 = vmatprep.mubr.msk.bf16.mxu0 %vm2977_vm0, %v2976_v0  ;;  %v2657_v8 = vld [vmem:[#allocation7] sm:$0xff]   ;;  %v2256_v10 = vld [vmem:[#allocation10] ss:$0 sm:$0xff]  ;;  %v2251_v15 = vld [vmem:[#allocation8] ss:$0 sm:$0xff]  ;;  %vm878_vm2 = vcmask 64512  }
  0x84   : > { %s3566_s24 = smov (!%p618_p9, %s2245_s24), 3  ;;  %2375 = vmatpush3.bf16.msra.mxu1 %v2650_v1  ;;  %2367 = vmatpush3.bf16.msra.mxu0 %v2651_v2  ;;  %s2978_s25 = smov 120   ;;  %v2261_v30 = vld [vmem:[#allocation11] ss:$0 sm:$0xff]  ;;  %vm998_vm3 = vcmask 1043456   ;;  %vm1774_vm4 = vcmask 130048  }
  0x85   : > { %s2246_s30 = sshll.u32 %s3566_s24, 2  ;;  %2376 = vmatprep.subr.bf16.mxu1 %v2976_v0  ;;  %2368 = vmatprep.subr.bf16.mxu0 %v2976_v0  ;;  %s2979_s15 = smov 112   ;;  %vm1777_vm5 = vcmask 195584   ;;  %vm2010_vm8 = vcmask 523264  }
  0x86   : > { %s627_s18 = scalar_lea.vmem %s3501_s1, %s2246_s30  ;;  %s621_s17 = scalar_lea.vmem %s3500_s0, %s2246_s30 }
  0x87   : > { %v2654_v5 = vld [vmem:[%s627_s18] sm:$0xff]   ;;  %s633_s29 = scalar_lea.vmem %s3502_s2, %s2246_s30  ;;  %s2980_s26 = smov 104  }
  0x88   : > { %2377 = vmatpush3.bf16.msra.mxu1 %v2652_v3  ;;  %v2655_v6 = vld [vmem:[%s621_s17] sm:$0xff]   ;;  %2369 = vmatpush3.bf16.msra.mxu0 %v2653_v4  ;;  %s2981_s24 = smov 8   ;;  %s2982_s30 = smov 16  }
  0x89   : > { %2390 = vmatprep.subr.bf16.mxu1 %v2976_v0  ;;  %2382 = vmatprep.subr.bf16.mxu0 %v2976_v0  ;;  %v2658_v9 = vld [vmem:[%s633_s29] sm:$0xff]   ;;  %s2983_s20 = smov 24   ;;  %s3553_s29 = sld [smem:[#allocation25_spill]] }
  0x8a   : > { %s3554_s27 = sld [smem:[#allocation27_spill]] }
  0x8b   : > { %2379 = vmatmul.mubr.msk.bf16.vlgmr.msra.gmra.mxu1 %vm671_vm1, %v2654_v5  ;;  %2371 = vmatmul.mubr.msk.bf16.vlgmr.msra.gmra.mxu0 %vm671_vm1, %v2655_v6 }
  0x8c   : > { %2392 = vmatprep.mubr.msk.bf16.mxu1 %vm2977_vm0, %v2976_v0  ;;  %2383 = vmatpush3.bf16.msra.mxu0 %v2656_v7 }
  0x8d   : > { %2386 = vmatprep.mubr.msk.bf16.mxu0 %vm2977_vm0, %v2976_v0  ;;  %2384 = vmatprep.subr.bf16.mxu0 %v2976_v0 }
  0x8f   : > { %p3555_p3 = scmp.ne.s32.totalorder %s3553_s29, 0 }
  0x90   : > { %2385 = vmatpush3.bf16.msra.mxu0 %v2657_v8 }
  0x91   : > { %2396 = vmatprep.subr.bf16.mxu0 %v2976_v0 }
  0x93   : > { %2387 = vmatmul.mubr.msk.bf16.vlgmr.msra.gmra.mxu0 %vm671_vm1, %v2658_v9 }
  0x94   : > { %2398 = vmatprep.mubr.msk.bf16.mxu0 %vm2977_vm0, %v2976_v0 }
 0x14b   : > { %v782_v11 = vpop.f32.mrf.mxu1  ;;  %v709_v13 = vpop.f32.mrf.mxu0 }
 0x14c   : > { %v783_v12 = vadd.f32 %v2256_v10, %v782_v11  ;;  %v710_v19 = vadd.f32 %v2251_v15, %v709_v13 }
 0x14d   : > { %v2380_v14 = vpop.f32.mrf.mxu1  ;;  %v2372_v17 = vpop.f32.mrf.mxu0 }
 0x14e   : > { %v3243_v16 = vpack.c.bf16 %v783_v12, %v783_v12  ;;  %v3250_v26 = vpack.c.bf16 %v710_v19, %v710_v19 }
 0x14f   : > { %v785_v18 = vpop.f32.mrf.mxu1  ;;  %v712_v22 = vpop.f32.mrf.mxu0 }
 0x150   : > { %v786_v20 = vadd.f32 %v2256_v10, %v785_v18  ;;  %v883_v21 = vsel %vm878_vm2, %v3243_v16, 0  ;;  %v713_v28 = vadd.f32 %v2251_v15, %v712_v22 }
 0x151   : > { %v2381_v23 = vpop.f32.mrf.mxu1  ;;  %2391 = vmatpush3.bf16.xpose.msra.mxu1 %v883_v21  ;;  %v2373_v25 = vpop.f32.mrf.mxu0 }
 0x152   : > { %v3247_v24 = vpack.c.bf16 %v786_v20, %v786_v20  ;;  %2402 = vmatprep.subr.bf16.mxu1 %v2976_v0  ;;  %v3261_v29 = vpack.c.bf16 %v713_v28, %v713_v28 }
 0x153   : > { %v855_v31 = vpop.f32.mrf.mxu0 }
 0x154   : > { %1140 = vrot.lane.b32.xlu1 %v3247_v24, %s2978_s25  ;;  %v929_v27 = vsel %vm878_vm2, %v3247_v24, 0  ;;  %v856_v33 = vadd.f32 %v2261_v30, %v855_v31 }
 0x155   : > { %2397 = vmatpush3.bf16.xpose.msra.mxu0 %v929_v27  ;;  %v2388_v32 = vpop.f32.mrf.mxu0 }
 0x156   : > { %2408 = vmatprep.subr.bf16.mxu0 %v2976_v0  ;;  %v3267_v37 = vpack.c.bf16 %v856_v33, %v856_v33 }
 0x157   : > { %v858_v34 = vpop.f32.mrf.mxu0 }
 0x158   : > { %2393 = vmatmul.mubr.msk.bf16.vlgmr.msra.gmra.mxu1 %vm878_vm2, %v3250_v26  ;;  %v859_v35 = vadd.f32 %v2261_v30, %v858_v34  ;;  %v1000_v39 = vsel %vm998_vm3, %v3267_v37, 0 }
 0x159   : > { %2404 = vmatprep.mubr.msk.bf16.mxu1 %vm2977_vm0, %v2976_v0  ;;  %v2389_v36 = vpop.f32.mrf.mxu0  ;;  %2403 = vmatpush3.bf16.msra.mxu1 %v1000_v39 }
 0x15a   : > { %v3269_v38 = vpack.c.bf16 %v859_v35, %v859_v35  ;;  %2414 = vmatprep.subr.bf16.mxu1 %v2976_v0 }
 0x15c   : > { %2399 = vmatmul.mubr.msk.bf16.vlgmr.msra.gmra.mxu0 %vm878_vm2, %v3261_v29  ;;  %v1046_v40 = vsel %vm998_vm3, %v3269_v38, 0 }
 0x15d   : > { %2410 = vmatprep.mubr.msk.bf16.mxu0 %vm2977_vm0, %v2976_v0  ;;  %2409 = vmatpush3.bf16.msra.mxu0 %v1046_v40 }
 0x15e   : > { %2420 = vmatprep.subr.bf16.mxu0 %v2976_v0 }
 0x1c6   : > { %v1141_v61 = vpop.permute.xlu1 %1140 }
 0x1c7   : > { %v1146_v9 = vsel %vm878_vm2, %v1141_v61, 0 }
 0x218   : > { %v919_v41 = vpop.f32.mrf.mxu1 }
 0x219   : > { %v971_v42 = vsel %vm878_vm2, %v919_v41, -inf }
 0x21a   : > { %972 = vmax.xlane.f32.xlu0 %v971_v42  ;;  %v2394_v43 = vpop.f32.mrf.mxu1 }
 0x21c   : > { %v922_v44 = vpop.f32.mrf.mxu1  ;;  %v965_v45 = vpop.f32.mrf.mxu0 }
 0x21d   : > { %v974_v46 = vsel %vm878_vm2, %v965_v45, -inf }
 0x21e   : > { %v2395_v47 = vpop.f32.mrf.mxu1  ;;  %975 = vmax.xlane.f32.xlu0 %v974_v46  ;;  %v2400_v48 = vpop.f32.mrf.mxu0 }
 0x220   : > { %v968_v49 = vpop.f32.mrf.mxu0 }
 0x222   : > { %v2401_v50 = vpop.f32.mrf.mxu0 }
 0x234   : > { %1090 = vrot.lane.b32.xlu0 %v3243_v16, %s2978_s25 }
 0x2a3   : > { %v973_v51 = vpop.xlane.xlu0 %972 }
 0x2a4   : > { %v977_v52 = vsub.f32 %v919_v41, %v973_v51 }
 0x2a6   : > { %v979_v53 = vmul.f32 1.442695, %v977_v52 }
 0x2a7   : > { %v976_v54 = vpop.xlane.xlu0 %975 }
 0x2a8   : > { %2667 = vpow2.f32 %v979_v53  ;;  %v978_v55 = vsub.f32 %v965_v45, %v976_v54 }
 0x2aa   : > { %v981_v56 = vmul.f32 1.442695, %v978_v55 }
 0x2ab   : > { %v1091_v3 = vpop.permute.xlu0 %1090 }
 0x2ac   : > { %2669 = vpow2.f32 %v981_v56  ;;  %v1096_v6 = vsel %vm878_vm2, %v1091_v3, 0 }
 0x2b5   : > { %v2668_v57 = vpop.eup %2667 }
 0x2b6   : > { %v983_v58 = vsel %vm878_vm2, %v2668_v57, 0.0 }
 0x2b7   : > { %984 = vadd.xlane.f32.xlu1 %v983_v58 }
 0x2b9   : > { %v2670_v59 = vpop.eup %2669 }
 0x2ba   : > { %v986_v60 = vsel %vm878_vm2, %v2670_v59, 0.0 }
 0x2bb   : > { %987 = vadd.xlane.f32.xlu1 %v986_v60 }
 0x2cc   : > { %1088 = vrot.lane.b32.xlu1 %v3250_v26, %s2978_s25 }
 0x2d0   : > { %1138 = vrot.lane.b32.xlu1 %v3261_v29, %s2978_s25 }
 0x340   : > { %v985_v62 = vpop.xlane.xlu1 %984 }
 0x341   : > { %2671 = vrcp.f32 %v985_v62 }
 0x344   : > { %v988_v63 = vpop.xlane.xlu1 %987 }
 0x345   : > { %2673 = vrcp.f32 %v988_v63 }
 0x348   : > { %v1089_v10 = vpop.permute.xlu1 %1088 }
 0x34c   : > { %v1139_v11 = vpop.permute.xlu1 %1138 }
 0x34e   : > { %v2672_v1 = vpop.eup %2671 }
 0x34f   : > { %v991_v2 = vmul.f32 %v2672_v1, %v2668_v57 }
 0x351   : > { %v993_v4 = vpack.c.bf16 %v991_v2, %v991_v2 }
 0x352   : > { %v2674_v5 = vpop.eup %2673 }
 0x353   : > { %2405 = vmatmul.mubr.msk.bf16.vlgmr.msra.gmra.mxu1 %vm878_vm2, %v993_v4  ;;  %v992_v7 = vmul.f32 %v2674_v5, %v2670_v59 }
 0x354   : > { %2415 = vmatpush3.bf16.xpose.msra.mxu1 %v1096_v6  ;;  %2416 = vmatprep.mubr.msk.bf16.mxu1 %vm2977_vm0, %v2976_v0 }
 0x355   : > { %v994_v8 = vpack.c.bf16 %v992_v7, %v992_v7  ;;  %2426 = vmatprep.subr.bf16.mxu1 %v2976_v0 }
 0x357   : > { %2411 = vmatmul.mubr.msk.bf16.vlgmr.msra.gmra.mxu0 %vm878_vm2, %v994_v8 }
 0x358   : > { %2421 = vmatpush3.bf16.xpose.msra.mxu0 %v1146_v9  ;;  %2422 = vmatprep.mubr.msk.bf16.mxu0 %vm2977_vm0, %v2976_v0 }
 0x359   : > { %2432 = vmatprep.subr.bf16.mxu0 %v2976_v0 }
 0x35b   : > { %2417 = vmatmul.mubr.msk.bf16.vlgmr.msra.gmra.mxu1 %vm878_vm2, %v1089_v10 }
 0x35c   : > { %2428 = vmatprep.mubr.msk.bf16.mxu1 %vm2977_vm0, %v2976_v0 }
 0x35f   : > { %2423 = vmatmul.mubr.msk.bf16.vlgmr.msra.gmra.mxu0 %vm878_vm2, %v1139_v11 }
 0x360   : > { %2434 = vmatprep.mubr.msk.bf16.mxu0 %vm2977_vm0, %v2976_v0 }
 0x413   : > { %v3303_v12 = vpop.f32.mrf.mxu1 }
 0x415   : > { %v2406_v13 = vpop.f32.mrf.mxu1 }
 0x417   : > { %v1039_v14 = vpop.f32.mrf.mxu1  ;;  %v3305_v15 = vpop.f32.mrf.mxu0 }
 0x419   : > { %v2407_v17 = vpop.f32.mrf.mxu1  ;;  %v2412_v18 = vpop.f32.mrf.mxu0 }
 0x41b   : > { %v1085_v19 = vpop.f32.mrf.mxu0  ;;  %v1132_v20 = vpop.f32.mrf.mxu1 }
 0x41c   : > { %v1188_v21 = vsel %vm878_vm2, %v1132_v20, -inf }
 0x41d   : > { %1189 = vmax.xlane.f32.xlu0 %v1188_v21  ;;  %v2413_v22 = vpop.f32.mrf.mxu0  ;;  %v2418_v23 = vpop.f32.mrf.mxu1 }
 0x41f   : > { %v1135_v25 = vpop.f32.mrf.mxu1  ;;  %v1182_v27 = vpop.f32.mrf.mxu0 }
 0x420   : > { %v1191_v28 = vsel %vm878_vm2, %v1182_v27, -inf }
 0x421   : > { %v2419_v30 = vpop.f32.mrf.mxu1  ;;  %1192 = vmax.xlane.f32.xlu1 %v1191_v28  ;;  %v2424_v31 = vpop.f32.mrf.mxu0 }
 0x423   : > { %v1185_v32 = vpop.f32.mrf.mxu0 }
 0x425   : > { %v2425_v33 = vpop.f32.mrf.mxu0 }
 0x432   : > { %1260 = vrot.lane.b32.xlu1 %v3269_v38, %s2978_s25 }
 0x436   : > { %1310 = vrot.lane.b32.xlu1 %v3243_v16, %s2979_s15 }
 0x43a   : > { %1360 = vrot.lane.b32.xlu1 %v3247_v24, %s2979_s15 }
 0x43e   : > { %1358 = vrot.lane.b32.xlu1 %v3261_v29, %s2979_s15 }
 0x4a6   : > { %v1190_v34 = vpop.xlane.xlu0 %1189 }
 0x4a7   : > { %v1194_v35 = vsub.f32 %v1132_v20, %v1190_v34 }
 0x4a9   : > { %v1196_v36 = vmul.f32 1.442695, %v1194_v35 }
 0x4aa   : > { %v1193_v39 = vpop.xlane.xlu1 %1192 }
 0x4ab   : > { %2675 = vpow2.f32 %v1196_v36  ;;  %v1195_v40 = vsub.f32 %v1182_v27, %v1193_v39 }
 0x4ad   : > { %v1198_v41 = vmul.f32 1.442695, %v1195_v40 }
 0x4ae   : > { %v1261_v42 = vpop.permute.xlu1 %1260 }
 0x4af   : > { %2677 = vpow2.f32 %v1198_v41  ;;  %v1266_v43 = vsel %vm998_vm3, %v1261_v42, 0 }
 0x4b0   : > { %2433 = vmatpush3.bf16.msra.mxu0 %v1266_v43 }
 0x4b1   : > { %2444 = vmatprep.subr.bf16.mxu0 %v2976_v0 }
 0x4b2   : > { %v1311_v53 = vpop.permute.xlu1 %1310 }
 0x4b3   : > { %v1316_v57 = vsel %vm878_vm2, %v1311_v53, 0 }
 0x4b6   : > { %v1361_v59 = vpop.permute.xlu1 %1360 }
 0x4b7   : > { %v1366_v61 = vsel %vm878_vm2, %v1361_v59, 0 }
 0x4b8   : > { %v2676_v44 = vpop.eup %2675 }
 0x4b9   : > { %v1200_v45 = vsel %vm878_vm2, %v2676_v44, 0.0 }
 0x4ba   : > { %1201 = vadd.xlane.f32.xlu0 %v1200_v45  ;;  %v1359_v63 = vpop.permute.xlu1 %1358 }
 0x4bc   : > { %v2678_v46 = vpop.eup %2677 }
 0x4bd   : > { %v1203_v47 = vsel %vm878_vm2, %v2678_v46, 0.0 }
 0x4be   : > { %1204 = vadd.xlane.f32.xlu0 %v1203_v47 }
 0x4d4   : > { %1212 = vrot.lane.b32.xlu0 %v3267_v37, %s2978_s25 }
 0x4d8   : > { %1308 = vrot.lane.b32.xlu0 %v3250_v26, %s2979_s15 }
 0x543   : > { %v1202_v48 = vpop.xlane.xlu0 %1201 }
 0x544   : > { %2679 = vrcp.f32 %v1202_v48 }
 0x547   : > { %v1205_v49 = vpop.xlane.xlu0 %1204 }
 0x548   : > { %2681 = vrcp.f32 %v1205_v49 }
 0x54b   : > { %v1213_v50 = vpop.permute.xlu0 %1212 }
 0x54c   : > { %v1218_v51 = vsel %vm998_vm3, %v1213_v50, 0 }
 0x54d   : > { %2427 = vmatpush3.bf16.msra.mxu1 %v1218_v51 }
 0x54e   : > { %2438 = vmatprep.subr.bf16.mxu1 %v2976_v0 }
 0x54f   : > { %v1309_v62 = vpop.permute.xlu0 %1308 }
 0x551   : > { %v2680_v52 = vpop.eup %2679 }
 0x552   : > { %v1208_v54 = vmul.f32 %v2680_v52, %v2676_v44 }
 0x554   : > { %v1210_v55 = vpack.c.bf16 %v1208_v54, %v1208_v54 }
 0x555   : > { %v2682_v56 = vpop.eup %2681 }
 0x556   : > { %2429 = vmatmul.mubr.msk.bf16.vlgmr.msra.gmra.mxu1 %vm878_vm2, %v1210_v55  ;;  %v1209_v58 = vmul.f32 %v2682_v56, %v2678_v46 }
 0x557   : > { %2439 = vmatpush3.bf16.xpose.msra.mxu1 %v1316_v57  ;;  %2440 = vmatprep.mubr.msk.bf16.mxu1 %vm2977_vm0, %v2976_v0 }
 0x558   : > { %v1211_v60 = vpack.c.bf16 %v1209_v58, %v1209_v58  ;;  %2450 = vmatprep.subr.bf16.mxu1 %v2976_v0 }
 0x55a   : > { %2435 = vmatmul.mubr.msk.bf16.vlgmr.msra.gmra.mxu0 %vm878_vm2, %v1211_v60 }
 0x55b   : > { %2445 = vmatpush3.bf16.xpose.msra.mxu0 %v1366_v61  ;;  %2446 = vmatprep.mubr.msk.bf16.mxu0 %vm2977_vm0, %v2976_v0 }
 0x55c   : > { %2456 = vmatprep.subr.bf16.mxu0 %v2976_v0 }
 0x55e   : > { %2441 = vmatmul.mubr.msk.bf16.vlgmr.msra.gmra.mxu1 %vm878_vm2, %v1309_v62 }
 0x55f   : > { %2452 = vmatprep.mubr.msk.bf16.mxu1 %vm2977_vm0, %v2976_v0 }
 0x562   : > { %2447 = vmatmul.mubr.msk.bf16.vlgmr.msra.gmra.mxu0 %vm878_vm2, %v1359_v63 }
 0x563   : > { %2458 = vmatprep.mubr.msk.bf16.mxu0 %vm2977_vm0, %v2976_v0 }
 0x616   : > { %v3343_v1 = vpop.f32.mrf.mxu1 }
 0x618   : > { %v2430_v2 = vpop.f32.mrf.mxu1 }
 0x61a   : > { %v1257_v3 = vpop.f32.mrf.mxu1  ;;  %v3345_v4 = vpop.f32.mrf.mxu0 }
 0x61b   : > { %v2635_v5 = vpack.i.bf16 %v3345_v4, %v3343_v1 }
 0x61c   : > { %v2431_v6 = vpop.f32.mrf.mxu1  ;;  %v2436_v7 = vpop.f32.mrf.mxu0 }
 0x61e   : > { %v1305_v8 = vpop.f32.mrf.mxu0  ;;  %v1352_v9 = vpop.f32.mrf.mxu1 }
 0x61f   : > { %v1408_v10 = vsel %vm878_vm2, %v1352_v9, -inf }
 0x620   : > { %1409 = vmax.xlane.f32.xlu0 %v1408_v10  ;;  %v2437_v11 = vpop.f32.mrf.mxu0  ;;  %v2442_v13 = vpop.f32.mrf.mxu1 }
 0x622   : > { %v1355_v14 = vpop.f32.mrf.mxu1  ;;  %v1402_v17 = vpop.f32.mrf.mxu0 }
 0x623   : > { %v1411_v18 = vsel %vm878_vm2, %v1402_v17, -inf }
 0x624   : > { %v2443_v19 = vpop.f32.mrf.mxu1  ;;  %1412 = vmax.xlane.f32.xlu1 %v1411_v18  ;;  %v2448_v20 = vpop.f32.mrf.mxu0 }
 0x626   : > { %v1405_v21 = vpop.f32.mrf.mxu0 }
 0x628   : > { %v2449_v22 = vpop.f32.mrf.mxu0 }
 0x635   : > { %1480 = vrot.lane.b32.xlu1 %v3269_v38, %s2979_s15 }
 0x639   : > { %1530 = vrot.lane.b32.xlu1 %v3243_v16, %s2980_s26 }
 0x63d   : > { %1580 = vrot.lane.b32.xlu1 %v3247_v24, %s2980_s26 }
 0x641   : > { %1578 = vrot.lane.b32.xlu1 %v3261_v29, %s2980_s26 }
 0x6a9   : > { %v1410_v23 = vpop.xlane.xlu0 %1409 }
 0x6aa   : > { %v1414_v25 = vsub.f32 %v1352_v9, %v1410_v23 }
 0x6ac   : > { %v1416_v27 = vmul.f32 1.442695, %v1414_v25 }
 0x6ad   : > { %v1413_v28 = vpop.xlane.xlu1 %1412 }
 0x6ae   : > { %2683 = vpow2.f32 %v1416_v27  ;;  %v1415_v30 = vsub.f32 %v1402_v17, %v1413_v28 }
 0x6b0   : > { %v1418_v31 = vmul.f32 1.442695, %v1415_v30 }
 0x6b1   : > { %v1481_v32 = vpop.permute.xlu1 %1480 }
 0x6b2   : > { %2685 = vpow2.f32 %v1418_v31  ;;  %v1486_v33 = vsel %vm998_vm3, %v1481_v32, 0 }
 0x6b3   : > { %2457 = vmatpush3.bf16.msra.mxu0 %v1486_v33 }
 0x6b4   : > { %2468 = vmatprep.subr.bf16.mxu0 %v2976_v0 }
 0x6b5   : > { %v1531_v42 = vpop.permute.xlu1 %1530 }
 0x6b6   : > { %v1536_v46 = vsel %vm878_vm2, %v1531_v42, 0 }
 0x6b9   : > { %v1581_v47 = vpop.permute.xlu1 %1580 }
 0x6ba   : > { %v1586_v49 = vsel %vm878_vm2, %v1581_v47, 0 }
 0x6bb   : > { %v2684_v16 = vpop.eup %2683 }
 0x6bc   : > { %v1420_v24 = vsel %vm878_vm2, %v2684_v16, 0.0 }
 0x6bd   : > { %1421 = vadd.xlane.f32.xlu0 %v1420_v24  ;;  %v1579_v51 = vpop.permute.xlu1 %1578  ;;  %v2660_v24 = vld [vmem:[%s3509_s9] sm:$0xff]  }
 0x6bf   : > { %v2686_v34 = vpop.eup %2685 }
 0x6c0   : > { %v1423_v29 = vsel %vm878_vm2, %v2686_v34, 0.0 }
 0x6c1   : > { %1424 = vadd.xlane.f32.xlu0 %v1423_v29 }
 0x6d7   : > { %1432 = vrot.lane.b32.xlu0 %v3267_v37, %s2979_s15 }
 0x6db   : > { %1528 = vrot.lane.b32.xlu0 %v3250_v26, %s2980_s26 }
 0x746   : > { %v1422_v35 = vpop.xlane.xlu0 %1421 }
 0x747   : > { %2687 = vrcp.f32 %v1422_v35 }
 0x74a   : > { %v1425_v36 = vpop.xlane.xlu0 %1424 }
 0x74b   : > { %2689 = vrcp.f32 %v1425_v36 }
 0x74e   : > { %v1433_v39 = vpop.permute.xlu0 %1432 }
 0x74f   : > { %v1438_v40 = vsel %vm998_vm3, %v1433_v39, 0 }
 0x750   : > { %2451 = vmatpush3.bf16.msra.mxu1 %v1438_v40 }
 0x751   : > { %2462 = vmatprep.subr.bf16.mxu1 %v2976_v0 }
 0x752   : > { %v1529_v50 = vpop.permute.xlu0 %1528 }
 0x754   : > { %v2688_v41 = vpop.eup %2687 }
 0x755   : > { %v1428_v43 = vmul.f32 %v2688_v41, %v2684_v16  ;;  %v2659_v16 = vld [vmem:[%s3509_s9 + $0x8] sm:$0xff]  }
 0x757   : > { %v1430_v44 = vpack.c.bf16 %v1428_v43, %v1428_v43 }
 0x758   : > { %v2690_v45 = vpop.eup %2689 }
 0x759   : > { %2453 = vmatmul.mubr.msk.bf16.vlgmr.msra.gmra.mxu1 %vm878_vm2, %v1430_v44  ;;  %v1429_v26 = vmul.f32 %v2690_v45, %v2686_v34 }
 0x75a   : > { %2463 = vmatpush3.bf16.xpose.msra.mxu1 %v1536_v46  ;;  %2464 = vmatprep.mubr.msk.bf16.mxu1 %vm2977_vm0, %v2976_v0 }
 0x75b   : > { %v1431_v48 = vpack.c.bf16 %v1429_v26, %v1429_v26  ;;  %2474 = vmatprep.subr.bf16.mxu1 %v2976_v0 }
 0x75d   : > { %2459 = vmatmul.mubr.msk.bf16.vlgmr.msra.gmra.mxu0 %vm878_vm2, %v1431_v48 }
 0x75e   : > { %2469 = vmatpush3.bf16.xpose.msra.mxu0 %v1586_v49  ;;  %2470 = vmatprep.mubr.msk.bf16.mxu0 %vm2977_vm0, %v2976_v0 }
 0x75f   : > { %2480 = vmatprep.subr.bf16.mxu0 %v2976_v0 }
 0x761   : > { %2465 = vmatmul.mubr.msk.bf16.vlgmr.msra.gmra.mxu1 %vm878_vm2, %v1529_v50 }
 0x762   : > { %2476 = vmatprep.mubr.msk.bf16.mxu1 %vm2977_vm0, %v2976_v0 }
 0x765   : > { %2471 = vmatmul.mubr.msk.bf16.vlgmr.msra.gmra.mxu0 %vm878_vm2, %v1579_v51 }
 0x766   : > { %2482 = vmatprep.mubr.msk.bf16.mxu0 %vm2977_vm0, %v2976_v0 }
 0x819   : > { %v1474_v52 = vpop.f32.mrf.mxu1 }
 0x81b   : > { %v2454_v53 = vpop.f32.mrf.mxu1 }
 0x81d   : > { %v1477_v54 = vpop.f32.mrf.mxu1  ;;  %v1522_v55 = vpop.f32.mrf.mxu0 }
 0x81e   : > { %v2640_v10 = vpack.i.bf16 %v1522_v55, %v1474_v52 }
 0x81f   : > { %v2455_v56 = vpop.f32.mrf.mxu1  ;;  %v2460_v57 = vpop.f32.mrf.mxu0 }
 0x821   : > { %v1525_v58 = vpop.f32.mrf.mxu0  ;;  %v1572_v59 = vpop.f32.mrf.mxu1 }
 0x822   : > { %v1628_v60 = vsel %vm878_vm2, %v1572_v59, -inf }
 0x823   : > { %1629 = vmax.xlane.f32.xlu0 %v1628_v60  ;;  %v2461_v61 = vpop.f32.mrf.mxu0  ;;  %v2466_v62 = vpop.f32.mrf.mxu1 }
 0x825   : > { %v1575_v63 = vpop.f32.mrf.mxu1  ;;  %v1622_v2 = vpop.f32.mrf.mxu0 }
 0x826   : > { %v1631_v3 = vsel %vm878_vm2, %v1622_v2, -inf }
 0x827   : > { %v2467_v6 = vpop.f32.mrf.mxu1  ;;  %1632 = vmax.xlane.f32.xlu1 %v1631_v3  ;;  %v2472_v7 = vpop.f32.mrf.mxu0 }
 0x828   : > { %v2663_v7 = vld [vmem:[%s3513_s13 + $0x18] sm:$0xff]  }
 0x829   : > { %v1625_v8 = vpop.f32.mrf.mxu0 }
 0x82a   : > { %v2664_v8 = vld [vmem:[%s3513_s13 + $0x10] sm:$0xff]  }
 0x82b   : > { %v2473_v9 = vpop.f32.mrf.mxu0 }
 0x82c   : > { %v2665_v9 = vld [vmem:[%s3513_s13 + $0x8] sm:$0xff]  }
 0x838   : > { %1700 = vrot.lane.b32.xlu1 %v3269_v38, %s2980_s26 }
 0x83c   : > { %2636 = vrot.lane.b32.xlu1 %v2635_v5, %s2981_s24 }
 0x840   : > { %2641 = vrot.lane.b32.xlu1 %v2640_v10, %s2982_s30  ;;  %v2666_v10 = vld [vmem:[%s3513_s13] sm:$0xff]  }
 0x8ac   : > { %v1630_v11 = vpop.xlane.xlu0 %1629 }
 0x8ad   : > { %v1634_v13 = vsub.f32 %v1572_v59, %v1630_v11  ;;  %v2661_v59 = vld [vmem:[#allocation13 + $0x8] sm:$0xff]  }
 0x8ae   : > { %v2292_v11 = vld [vmem:[%s3512_s12] ss:$0 sm:$0xff] }
 0x8af   : > { %v1636_v14 = vmul.f32 1.442695, %v1634_v13 }
 0x8b0   : > { %v1633_v17 = vpop.xlane.xlu1 %1632 }
 0x8b1   : > { %2691 = vpow2.f32 %v1636_v14  ;;  %v1635_v18 = vsub.f32 %v1622_v2, %v1633_v17 }
 0x8b3   : > { %v1638_v19 = vmul.f32 1.442695, %v1635_v18 }
 0x8b4   : > { %v1701_v20 = vpop.permute.xlu1 %1700 }
 0x8b5   : > { %2693 = vpow2.f32 %v1638_v19  ;;  %v1706_v38 = vsel %vm998_vm3, %v1701_v20, 0 }
 0x8b6   : > { %2481 = vmatpush3.bf16.msra.mxu0 %v1706_v38 }
 0x8b7   : > { %2494 = vmatprep.subr.bf16.mxu0 %v2976_v0 }
 0x8b8   : > { %v2637_v44 = vpop.permute.xlu1 %2636 }
 0x8b9   : > { %v2639_v46 = vunpack.i.h.bf16 %v2637_v44  ;;  %v2638_v26 = vunpack.i.l.bf16 %v2637_v44 }
 0x8bb   : > { %v1773_v50 = vsel %vm878_vm2, %v3305_v15, %v2639_v46  ;;  %v1772_v51 = vsel %vm878_vm2, %v3303_v12, %v2638_v26  ;;  %v2662_v15 = vld [vmem:[#allocation13] sm:$0xff]   ;;  %v2288_v12 = vld [vmem:[%s3510_s10] ss:$0 sm:$0xff] }
 0x8bc   : > { %v2642_v45 = vpop.permute.xlu1 %2641 }
 0x8bd   : > { %v2644_v47 = vunpack.i.h.bf16 %v2642_v45  ;;  %v2643_v48 = vunpack.i.l.bf16 %v2642_v45 }
 0x8be   : > { %v2692_v21 = vpop.eup %2691 }
 0x8bf   : > { %v1640_v1 = vsel %vm878_vm2, %v2692_v21, 0.0  ;;  %v1775_v54 = vsel %vm1774_vm4, %v1772_v51, %v2643_v48  ;;  %v1776_v55 = vsel %vm1774_vm4, %v1773_v50, %v2644_v47 }
 0x8c0   : > { %1641 = vadd.xlane.f32.xlu0 %v1640_v1 }
 0x8c2   : > { %v2694_v4 = vpop.eup %2693 }
 0x8c3   : > { %v1643_v5 = vsel %vm878_vm2, %v2694_v4, 0.0 }
 0x8c4   : > { %1644 = vadd.xlane.f32.xlu0 %v1643_v5 }
 0x8da   : > { %1652 = vrot.lane.b32.xlu0 %v3267_v37, %s2980_s26  ;;  %s2313_s26 = sshll.u32 %s3087_s22, 8 }
 0x8db   : > { %s3456_s18 = scalar_lea.hbm %s3554_s27, %s2313_s26 }
 0x949   : > { %v1642_v22 = vpop.xlane.xlu0 %1641 }
 0x94a   : > { %2695 = vrcp.f32 %v1642_v22 }
 0x94d   : > { %v1645_v23 = vpop.xlane.xlu0 %1644 }
 0x94e   : > { %2697 = vrcp.f32 %v1645_v23 }
 0x951   : > { %v1653_v25 = vpop.permute.xlu0 %1652 }
 0x952   : > { %v1658_v27 = vsel %vm998_vm3, %v1653_v25, 0 }
 0x953   : > { %2475 = vmatpush3.bf16.msra.mxu1 %v1658_v27 }
 0x954   : > { %2486 = vmatprep.subr.bf16.mxu1 %v2976_v0 }
 0x957   : > { %v2696_v28 = vpop.eup %2695 }
 0x958   : > { %v1648_v30 = vmul.f32 %v2696_v28, %v2692_v21 }
 0x95a   : > { %v1650_v31 = vpack.c.bf16 %v1648_v30, %v1648_v30 }
 0x95b   : > { %v2698_v32 = vpop.eup %2697 }
 0x95c   : > { %2477 = vmatmul.mubr.msk.bf16.vlgmr.msra.gmra.mxu1 %vm878_vm2, %v1650_v31  ;;  %v1649_v33 = vmul.f32 %v2698_v32, %v2694_v4 }
 0x95d   : > { %2490 = vmatprep.mubr.msk.bf16.mxu1 %vm2977_vm0, %v2976_v0  ;;  %2487 = vmatpush3.bf16.msra.mxu1 %v2659_v16 }
 0x95e   : > { %v1651_v37 = vpack.c.bf16 %v1649_v33, %v1649_v33  ;;  %2488 = vmatprep.subr.bf16.mxu1 %v2976_v0 }
 0x960   : > { %2483 = vmatmul.mubr.msk.bf16.vlgmr.msra.gmra.mxu0 %vm878_vm2, %v1651_v37 }
 0x961   : > { %2498 = vmatprep.mubr.msk.bf16.mxu0 %vm2977_vm0, %v2976_v0  ;;  %2489 = vmatpush3.bf16.msra.mxu1 %v2660_v24 }
 0x962   : > { %2502 = vmatprep.subr.bf16.mxu1 %v2976_v0  ;;  %2495 = vmatpush3.bf16.msra.mxu0 %v2661_v59 }
 0x963   : > { %2496 = vmatprep.subr.bf16.mxu0 %v2976_v0 }
 0x966   : > { %2497 = vmatpush3.bf16.msra.mxu0 %v2662_v15 }
 0xa1c   : > { %v1694_v34 = vpop.f32.mrf.mxu1 }
 0xa1e   : > { %v2478_v29 = vpop.f32.mrf.mxu1 }
 0xa20   : > { %v1697_v35 = vpop.f32.mrf.mxu1  ;;  %v1742_v36 = vpop.f32.mrf.mxu0 }
 0xa21   : > { %v2645_v39 = vpack.i.bf16 %v1742_v36, %v1694_v34 }
 0xa22   : > { %v2479_v40 = vpop.f32.mrf.mxu1  ;;  %v2484_v41 = vpop.f32.mrf.mxu0 }
 0xa23   : > { %2646 = vrot.lane.b32.xlu0 %v2645_v39, %s2983_s20  ;;  %s614_s20 = sand.u32 1, %s2957_s19  }
 0xa24   : > { %v1745_v42 = vpop.f32.mrf.mxu0  ;;  %s2244_s17 = sshll.u32 %s614_s20, 4  ;;  %s3459_s28 = scalar_lea.sflag [#allocation4], %s614_s20 }
 0xa25   : > { %s616_s25 = scalar_lea.vmem [#allocation14], %s2244_s17  ;;  %s2984_s17 = smov [#allocation14]  }
 0xa26   : > { %v2485_v43 = vpop.f32.mrf.mxu0  ;;  %s2071_s15 = sshll.u32 %s616_s25, 4  ;;  %s2893_s21 = sshll.u32 %s2984_s17, 4  ;;  %s3451_s15 = int_to_ptr.vmem [resolvable:$true] %s2071_s15  ;;  %s2894_s21 = int_to_ptr.vmem [resolvable:$false] %s2893_s21 }
 0xa27   : > { %s2889_s22 = scalar_lea.vmem %s3451_s15, 256  ;;  %s2895_s16 = scalar_lea.vmem %s2894_s21, 512 }
 0xa28   : > { %p2890_p1 = scmp.ne.s32.totalorder %s3451_s15, %s2889_s22  ;;  %p2896_p4 = scmp.lt.s32.totalorder %s3451_s15, %s2894_s21 }
 0xa29   : > { %p2897_p13 = scmp.lt.s32.totalorder %s2895_s16, %s2889_s22 }
 0xa2a   : > { %p2891_p6 = pnand %p2890_p1, %p3555_p3 }
 0xa2b   : > { %p2898_p7 = por %p2897_p13, %p2896_p4 }
 0xa2c   : > { %p2892_p5 = pneg %p2891_p6 }
 0xa2e   : > { %p2899_p10 = pnand %p2898_p7, %p2892_p5 }
 0xa95   : > { %v2647_v49 = vpop.permute.xlu0 %2646 }
 0xa96   : > { %v2649_v52 = vunpack.i.h.bf16 %v2647_v49  ;;  %v2648_v53 = vunpack.i.l.bf16 %v2647_v49 }
 0xa98   : > { %v1779_v56 = vsel %vm1777_vm5, %v1776_v55, %v2649_v52  ;;  %v1778_v57 = vsel %vm1777_vm5, %v1775_v54, %v2648_v53 }
 0xa99   : > { %v1784_v58 = vpack.c.bf16 %v1779_v56, %v1778_v57 }
 0xa9b   : > { %2491 = vmatmul.mubr.msk.bf16.vlgmr.msra.gmra.mxu1 %vm671_vm1, %v1784_v58 }
 0xa9c   : > { %2510 = vmatprep.mubr.msk.bf16.mxu1 %vm2977_vm0, %v2976_v0  ;;  %2503 = vmatpush3.bf16.msra.mxu1 %v2663_v7 }
 0xa9d   : > { %2504 = vmatprep.subr.bf16.mxu1 %v2976_v0 }
 0xaa0   : > { %2505 = vmatpush3.bf16.msra.mxu1 %v2664_v8 }
 0xaa1   : > { %2506 = vmatprep.subr.bf16.mxu1 %v2976_v0 }
 0xaa4   : > { %2507 = vmatpush3.bf16.msra.mxu1 %v2665_v9 }
 0xaa5   : > { %2508 = vmatprep.subr.bf16.mxu1 %v2976_v0 }
 0xaa8   : > { %2509 = vmatpush3.bf16.msra.mxu1 %v2666_v10 }
 0xb5b   : > { %v1841_v60 = vpop.f32.mrf.mxu1 }
 0xb5c   : > { %v1842_v63 = vadd.f32 %v2288_v12, %v1841_v60 }
 0xb5d   : > { %v2492_v61 = vpop.f32.mrf.mxu1 }
 0xb5f   : > { %v1844_v62 = vpop.f32.mrf.mxu1 }
 0xb60   : > { %v1845_v2 = vadd.f32 %v2288_v12, %v1844_v62 }
 0xb61   : > { %v2493_v3 = vpop.f32.mrf.mxu1 }
 0xb62   : > { %v1852_v6 = vpack.c.bf16 %v1845_v2, %v1842_v63  ;;  %v2296_v3 = vld [vmem:[%s3514_s14] ss:$0 sm:$0xff] }
 0xb64   : > { %2499 = vmatmul.mubr.msk.bf16.vlgmr.msra.gmra.mxu0 %vm671_vm1, %v1852_v6 }
 0xc24   : > { %v1909_v13 = vpop.f32.mrf.mxu0 }
 0xc25   : > { %v1910_v14 = vadd.f32 %v2292_v11, %v1909_v13 }
 0xc26   : > { %v2500_v17 = vpop.f32.mrf.mxu0 }
 0xc27   : > { %v1918_v18 = vmul.f32 0.70710677, %v1910_v14  ;;  %v1916_v60 = vmul.f32 0.5, %v1910_v14 }
 0xc28   : > { %v1912_v19 = vpop.f32.mrf.mxu0 }
 0xc29   : > { %v1920_v20 = vand.u32 2147483647, %v1918_v18  ;;  %v1913_v38 = vadd.f32 %v2292_v11, %v1912_v19  ;;  %vm1960_vm6 = vcmp.ge.f32.partialorder %v1918_v18, 0.0 }
 0xc2a   : > { %v2501_v21 = vpop.f32.mrf.mxu0 }
 0xc2b   : > { %v1922_v1 = vmul.f32 0.3275911, %v1920_v20  ;;  %v1919_v4 = vmul.f32 0.70710677, %v1913_v38  ;;  %v1948_v25 = vsub.f32 0.0, %v1920_v20  ;;  %v1917_v12 = vmul.f32 0.5, %v1913_v38 }
 0xc2d   : > { %v1924_v0 = vadd.f32 1.0, %v1922_v1  ;;  %v1921_v5 = vand.u32 2147483647, %v1919_v4  ;;  %v1950_v27 = vmul.f32 %v1948_v25, %v1920_v20  ;;  %vm1961_vm7 = vcmp.ge.f32.partialorder %v1919_v4, 0.0 }
 0xc2f   : > { %2699 = vrcp.f32 %v1924_v0  ;;  %v1923_v22 = vmul.f32 0.3275911, %v1921_v5  ;;  %v1949_v28 = vsub.f32 0.0, %v1921_v5  ;;  %v1952_v32 = vmul.f32 1.442695, %v1950_v27 }
 0xc31   : > { %v1925_v23 = vadd.f32 1.0, %v1923_v22  ;;  %v1951_v33 = vmul.f32 %v1949_v28, %v1921_v5 }
 0xc33   : > { %2701 = vrcp.f32 %v1925_v23  ;;  %v1954_v29 = vmul.f32 1.442695, %v1951_v33 }
 0xc34   : > { %2703 = vpow2.f32 %v1952_v32 }
 0xc35   : > { %2705 = vpow2.f32 %v1954_v29 }
 0xc3c   : > { %v2700_v30 = vpop.eup %2699 }
 0xc3d   : > { %v1930_v31 = vmul.f32 1.0614054, %v2700_v30 }
 0xc3f   : > { %v1932_v37 = vadd.f32 -1.4531521, %v1930_v31 }
 0xc40   : > { %v2702_v16 = vpop.eup %2701 }
 0xc41   : > { %v1934_v24 = vmul.f32 %v2700_v30, %v1932_v37  ;;  %v1931_v34 = vmul.f32 1.0614054, %v2702_v16  ;;  %v2704_v48 = vpop.eup %2703 }
 0xc42   : > { %v2706_v53 = vpop.eup %2705 }
 0xc43   : > { %v1936_v35 = vadd.f32 1.4214138, %v1934_v24  ;;  %v1933_v36 = vadd.f32 -1.4531521, %v1931_v34 }
 0xc45   : > { %v1938_v39 = vmul.f32 %v2700_v30, %v1936_v35  ;;  %v1935_v40 = vmul.f32 %v2702_v16, %v1933_v36 }
 0xc47   : > { %v1940_v41 = vadd.f32 -0.28449672, %v1938_v39  ;;  %v1937_v42 = vadd.f32 1.4214138, %v1935_v40 }
 0xc49   : > { %v1942_v43 = vmul.f32 %v2700_v30, %v1940_v41  ;;  %v1939_v44 = vmul.f32 %v2702_v16, %v1937_v42 }
 0xc4b   : > { %v1944_v45 = vadd.f32 0.2548296, %v1942_v43  ;;  %v1941_v46 = vadd.f32 -0.28449672, %v1939_v44 }
 0xc4d   : > { %v1946_v26 = vmul.f32 %v2700_v30, %v1944_v45  ;;  %v1943_v47 = vmul.f32 %v2702_v16, %v1941_v46 }
 0xc4f   : > { %v1956_v49 = vmul.f32 %v2704_v48, %v1946_v26  ;;  %v1945_v50 = vadd.f32 0.2548296, %v1943_v47 }
 0xc51   : > { %v1958_v51 = vsub.f32 1.0, %v1956_v49  ;;  %v1947_v52 = vmul.f32 %v2702_v16, %v1945_v50 }
 0xc53   : > { %v1962_v54 = vsub.f32 0.0, %v1958_v51  ;;  %v1957_v55 = vmul.f32 %v2706_v53, %v1947_v52 }
 0xc55   : > { %v1964_v56 = vsel %vm1960_vm6, %v1958_v51, %v1962_v54  ;;  %v1959_v57 = vsub.f32 1.0, %v1957_v55 }
 0xc56   : > { %v1966_v59 = vadd.f32 1.0, %v1964_v56 }
 0xc57   : > { %v1963_v58 = vsub.f32 0.0, %v1959_v57 }
 0xc58   : > { %v1968_v62 = vmul.f32 %v1966_v59, %v1916_v60 }
 0xc59   : > { %v1965_v15 = vsel %vm1961_vm7, %v1959_v57, %v1963_v58 }
 0xc5a   : > { %v1967_v61 = vadd.f32 1.0, %v1965_v15 }
 0xc5c   : > { %v1969_v63 = vmul.f32 %v1967_v61, %v1917_v12 }
 0xc5e   : > { %v1978_v2 = vpack.c.bf16 %v1969_v63, %v1968_v62 }
 0xc60   : > { %2511 = vmatmul.mubr.msk.bf16.vlgmr.msra.gmra.mxu1 %vm2010_vm8, %v1978_v2 }
 0xd20   : > { %v2048_v6 = vpop.f32.mrf.mxu1 }
 0xd21   : > { %v2049_v7 = vadd.f32 %v2296_v3, %v2048_v6 }
 0xd22   : > { %v2512_v8 = vpop.f32.mrf.mxu1 }
 0xd23   : > { %2055 = vst.msk [vmem:[%s616_s25] sm:$0xff] %vm671_vm1, %v2049_v7 }
 0xd24   : > { %v2051_v9 = vpop.f32.mrf.mxu1 }
 0xd25   : > { %v2052_v10 = vadd.f32 %v2296_v3, %v2051_v9 }
 0xd26   : > { %v2513_v11 = vpop.f32.mrf.mxu1 }
 0xd27   : > { %2056 = vst.msk [vmem:[%s616_s25 + $0x8] sm:$0xff] %vm671_vm1, %v2052_v10 }
 0xd28   : > { %2902 = shalt.err (!%p2899_p10)
}
 0xd29   : > { %s2903_s20 = scalar_lea.hbm %s3456_s18, 256  ;;  %s2907_s30 = scalar_lea.hbm %s3554_s27, 512 }
 0xd2a   : > { %p2904_p8 = scmp.ne.s32.totalorder %s3456_s18, %s2903_s20  ;;  %p2908_p0 = scmp.lt.s32.totalorder %s3456_s18, %s3554_s27 }
 0xd2b   : > { %p2909_p2 = scmp.lt.s32.totalorder %s2907_s30, %s2903_s20 }
 0xd2c   : > { %p2905_p11 = pnand %p2904_p8, %p3555_p3 }
 0xd2d   : > { %p2910_p9 = por %p2909_p2, %p2908_p0 }
 0xd2e   : > { %p2906_p12 = pneg %p2905_p11 }
 0xd30   : > { %p2911_p1 = pnand %p2910_p9, %p2906_p12 }
 0xd32   : > { %2914 = shalt.err (!%p2911_p1)
}
 0xd33   : > { %s2985_s22 = smov 128  }
 0xd34   : > { %2542 = dma.vmem_to_hbm [thread:$0]  (%p3555_p3), %s3451_s15, 256, %s3456_s18, %s3459_s28, %s2985_s22, %s2985_s22, %s2981_s24  }
 0xd35 PF: > { %s3556_s21 = sld [smem:[#allocation22_spill]] }
 0xd36   : > { %s3557_s16 = sld [smem:[#allocation20_spill]] }
 0xd37   : > { %s3558_s25 = sld [smem:[#allocation26_spill]] }
 0xd3b   : > { %p2584_p6 = scmp.ge.s32.totalorder %s3556_s21, 2 }
 0xd3c   : > { %s2086_s26 = sand.u32 1, %s3557_s16  }
 0xd3d   : > { %p3559_p5 = scmp.ne.s32.totalorder %s3558_s25, 0  ;;  %s2087_s20 = scalar_lea.sflag [#allocation4], %s2086_s26 }
 0xd3f   : > { %p2567_p4 = pnand %p2584_p6, %p3559_p5 }
 0xd41   : > { %p2568_p13 = pneg %p2567_p4 }
 0xd43   : > { %2948 = dma.done.wait (%p2568_p13), %s2087_s20, 256  }
 0xd44   : > { %2950 = vsyncadd (%p2568_p13), %s2087_s20, 4294967040  ;;  %s3560_s21 = sld [smem:[#allocation23_spill]]  ;;  %s3563_s18 = smov %s2957_s19 }
 0xd45   : > { %s3561_s29 = sld [smem:[#allocation21_spill]] }
 0xd46   : > { %s3562_s20 = sld [smem:[#allocation24_spill]] }
 0xd4a   : > { %p29_p7 = scmp.ge.s32.totalorder %s3560_s21, 4  }
 0xd4b   : > { %s3564_s19 = smov %s3561_s29 }
 0xd4c   :  { %31 = sbr.rel (!%p29_p7) target bundleno = 9 (0x9), region = 150 }
 0xd51   :  { %2092 = vsyncpa [#allocation3], 1 }
 0xd52   :  { %2094 = vsyncpa [#allocation3 + $0x1], 1 }
 0xd53   :  { %2095 = vsyncpa [#allocation6], 1 }
 0xd54   :  { %2096 = vsyncpa [#allocation9], 1 }
 0xd55   :  { %2097 = vsyncpa [#allocation12], 1 }
 0xd56   :  { %2098 = vsyncpa [#allocation4], 1 }
 0xd57   :  { %2100 = vsyncpa [#allocation4 + $0x1], 1 }

</bundles_post_ra>
